<compile_context>
chip_gen: v7x
topology: tpu7x:2x2x1
jax: 0.10.0
libtpu: 0.0.40
codegen_flags: <defaults>
</compile_context>

<pallas_src>
import functools

import jax
import jax.numpy as jnp
import numpy as np
from jax import lax
from jax.experimental import pallas as pl
from jax.experimental.pallas import tpu as pltpu


def _round_up(x, m):
    return (x + m - 1) // m * m


def _pick_batch_tile(batch, block_b):
    """Pick (tile, padded_batch).

    Prefers the largest multiple-of-8 tile <= block_b that divides the batch
    (no padded HBM copies of the big params) while keeping >= 2 grid steps when
    the batch allows it (dual-TensorCore parts).  Falls back to padding only
    for awkward batch sizes where divisor-only tiles would become tiny.
    """
    bp8 = _round_up(batch, 8)
    if bp8 >= 16:
        cap = max(8, (min(int(block_b), bp8 // 2) // 8) * 8)
    else:
        cap = bp8
    best = 8
    for t in range(cap, 7, -8):
        if bp8 % t == 0:
            best = t
            break
    if best * 4 >= cap:
        return best, bp8                      # divisor tile, (almost) no padding
    return cap, _round_up(batch, cap)         # big DMAs beat avoiding one pad


def _pick_subtile(tile):
    """Rows per inner-loop chunk: bounds vreg/VMEM live ranges for big tiles."""
    if tile <= 128:
        return tile
    for d in range(128, 7, -8):
        if tile % d == 0:
            return d
    return 8


# ----------------------------- Pallas kernel ---------------------------------
def _tri_sylvester_kernel(zk_ref, b_ref, dp_ref, r1_ref, r2_ref,
                          em_ref, sm_ref, pt_ref, z_ref, ld_ref,
                          *, sub, has_perm):
    """Fused Sylvester step for one (TB, Z) batch tile.

    r1_ref / r2_ref hold the per-sample matrices flattened to (TB, Z*Z) so the
    VMEM blocks are lane-dense and the HBM DMAs contiguous.  The two
    per-sample contractions
        r2qzb[s, j] = sum_k z_per[s, k] * r2[s, j, k] + b[s, j]
        w[s, i]     = sum_j h[s, j]     * r1[s, i, j]
    are computed as dense VPU multiplies between two tiny constant MXU matmuls:
        expand:  (TB, Z) @ em -> (TB, Z*Z)   with em[k, m] = (m %  Z == k)
        segsum:  (TB, Z*Z) @ sm -> (TB, Z)   with sm[m, j] = (m // Z == j)
    which keeps the Z-wide reductions off the XLU.  The optional Q = P
    permutation is two more tiny (Z, Z) matmuls (pt = P^T).  dp_ref holds the
    wrapper-precomputed diag(r1) * diag(r2).
    """
    f32 = jnp.float32
    em = em_ref[...]                              # (Z, Z*Z)
    sm = sm_ref[...]                              # (Z*Z, Z)
    pt = pt_ref[...] if has_perm else None        # (Z, Z) = P^T

    def dotf(a, m):
        # MXU matmul; HIGHEST keeps the f32 operands at full f32 precision.
        return jnp.dot(a, m, preferred_element_type=f32,
                       precision=lax.Precision.HIGHEST)

    n_chunks = zk_ref.shape[0] // sub

    def process(c):
        if isinstance(c, int):
            row0 = c * sub
        else:
            row0 = pl.multiple_of(c * sub, sub)
        rows = pl.ds(row0, sub)

        zk = zk_ref[rows, :]                      # (sub, Z)  f32
        bb = b_ref[rows, :]                       # (sub, Z)
        dp = dp_ref[rows, :]                      # (sub, Z)  diag(r1)*diag(r2)
        r1 = r1_ref[rows, :].astype(f32)          # (sub, Z*Z)
        r2 = r2_ref[rows, :].astype(f32)          # (sub, Z*Z)

        z_in = dotf(zk, pt) if has_perm else zk   # z_per = zk[:, perm]
        r2qzb = dotf(r2 * dotf(z_in, em), sm) + bb
        h = jnp.tanh(r2qzb)
        w = dotf(r1 * dotf(h, em), sm)
        if has_perm:
            w = dotf(w, pt)                       # w[:, perm]
        z_ref[rows, :] = zk + w

        # log|det J| elements: log|1 + tanh'(r2qzb)_j * r1[j,j] * r2[j,j]|
        diag_j = 1.0 + (1.0 - h * h) * dp
        ld_ref[rows, :] = jnp.log(jnp.abs(diag_j))

    if n_chunks <= 1:
        process(0)
    else:
        pl.loop(0, n_chunks)(process)


# ----------------------------- wrapper ----------------------------------------
def triangular_sylvester(zk, r1, r2, b, permute_z=None, sum_ldj=True,
                         block_b=512, transport_dtype=None):
    """Pallas TPU implementation of TriangularSylvester._forward.

    zk: (B, Z); r1, r2: (B, Z, Z); b: (B, 1, Z) or (B, Z);
    permute_z: None or an integer permutation of range(Z);
    transport_dtype: optional (e.g. jnp.bfloat16) dtype used only to move r1/r2
      through HBM - all kernel arithmetic stays in float32.
    Returns (z, log_det_j) with log_det_j of shape (B,) if sum_ldj else (B, Z).
    """
    f32 = jnp.float32
    B, Z = zk.shape
    zk = jnp.asarray(zk, f32)
    r1 = jnp.asarray(r1, f32)
    r2 = jnp.asarray(r2, f32)
    b2 = jnp.asarray(b, f32).reshape(B, Z)

    # Cheap wrapper-side prep (small (B, Z) data / pure metadata only):
    #  * original diagonals product (kernel never touches (Z, Z) masks),
    #  * lane-dense flat views of r1/r2 (reshape, no HBM copy),
    #  * constant routing matrices for in-kernel expand / segment-sum / permute.
    diag_prod = (jnp.diagonal(r1, axis1=1, axis2=2) *
                 jnp.diagonal(r2, axis1=1, axis2=2)).astype(f32)      # (B, Z)
    tdt = f32 if transport_dtype is None else transport_dtype
    r1f = r1.reshape(B, Z * Z).astype(tdt)
    r2f = r2.reshape(B, Z * Z).astype(tdt)

    lanes = np.arange(Z * Z)
    em = jnp.asarray(lanes[None, :] % Z == np.arange(Z)[:, None], dtype=f32)
    sm = jnp.asarray(lanes[:, None] // Z == np.arange(Z)[None, :], dtype=f32)

    has_perm = permute_z is not None
    if has_perm:
        perm = np.asarray(permute_z).astype(np.int64)
        if not (perm.shape == (Z,)
                and np.array_equal(np.sort(perm), np.arange(Z))):
            raise ValueError(
                "permute_z must be an integer permutation of range(z_size) or "
                "None (note: the torch module's forward() passes its `b` "
                "argument into this slot).")
        pt = jnp.asarray(np.eye(Z, dtype=np.float32)[perm].T)         # P^T
    else:
        pt = jnp.eye(Z, dtype=f32)

    tb, Bp = _pick_batch_tile(B, block_b)
    sub = _pick_subtile(tb)
    if Bp != B:
        pad = lambda a: jnp.pad(a, ((0, Bp - B), (0, 0)))
        zk_p, b_p, dp_p, r1_p, r2_p = (pad(zk), pad(b2), pad(diag_prod),
                                       pad(r1f), pad(r2f))
    else:
        zk_p, b_p, dp_p, r1_p, r2_p = zk, b2, diag_prod, r1f, r2f

    kernel = functools.partial(_tri_sylvester_kernel, sub=sub,
                               has_perm=has_perm)
    # NOTE: with lane-dense r1/r2 blocks the working set is only a few MiB even
    # at tb = 512, so we stay inside every generation's default scoped-VMEM
    # budget (16 MiB v5e / 32 MiB v6e,v7x) - no vmem_limit over-request needed.
    z_out, log_diag = pl.pallas_call(
        kernel,
        out_shape=(jax.ShapeDtypeStruct((Bp, Z), f32),
                   jax.ShapeDtypeStruct((Bp, Z), f32)),
        grid=(Bp // tb,),
        in_specs=[
            pl.BlockSpec((tb, Z), lambda i: (i, 0)),        # zk
            pl.BlockSpec((tb, Z), lambda i: (i, 0)),        # b
            pl.BlockSpec((tb, Z), lambda i: (i, 0)),        # diag(r1)*diag(r2)
            pl.BlockSpec((tb, Z * Z), lambda i: (i, 0)),    # r1 (flat, dense)
            pl.BlockSpec((tb, Z * Z), lambda i: (i, 0)),    # r2 (flat, dense)
            pl.BlockSpec((Z, Z * Z), lambda i: (0, 0)),     # expand matrix
            pl.BlockSpec((Z * Z, Z), lambda i: (0, 0)),     # segment-sum matrix
            pl.BlockSpec((Z, Z), lambda i: (0, 0)),         # P^T
        ],
        out_specs=(pl.BlockSpec((tb, Z), lambda i: (i, 0)),
                   pl.BlockSpec((tb, Z), lambda i: (i, 0))),
        compiler_params=pltpu.CompilerParams(
            dimension_semantics=("parallel",),
        ),
    )(zk_p, b_p, dp_p, r1_p, r2_p, em, sm, pt)

    z_out = z_out[:B]
    log_diag = log_diag[:B]
    return z_out, (jnp.sum(log_diag, axis=-1) if sum_ldj else log_diag)


def triangular_sylvester_forward(zk, r1, r2, q_ortho, b=None, sum_ldj=True):
    # NOTE: the torch module's forward() passes `q_ortho` into _forward's `b`
    # slot and `b` into the `permute_z` slot; permute_z must therefore be an
    # integer permutation of range(z_size) or None.  Preserved here verbatim.
    return triangular_sylvester(zk, r1, r2, q_ortho, permute_z=b,
                                sum_ldj=sum_ldj)


# ----------------------------- pure-JAX reference -----------------------------
def ref_triangular_sylvester(zk, r1, r2, b, permute_z=None, sum_ldj=True):
    zk_e = zk[:, None, :]
    diag_r1 = jnp.diagonal(r1, axis1=1, axis2=2)
    diag_r2 = jnp.diagonal(r2, axis1=1, axis2=2)
    z_per = zk_e[:, :, permute_z] if permute_z is not None else zk_e
    b3 = b.reshape(b.shape[0], 1, -1)
    r2qzb = jnp.einsum("bij,bkj->bik", z_per, r2, precision="highest") + b3
    z = jnp.einsum("bij,bkj->bik", jnp.tanh(r2qzb), r1, precision="highest")
    if permute_z is not None:
        z = z[:, :, permute_z]
    z = (z + zk_e)[:, 0, :]
    diag_j = diag_r1 * diag_r2
    diag_j = (1.0 - jnp.tanh(r2qzb)[:, 0, :] ** 2) * diag_j + 1.0
    log_diag_j = jnp.log(jnp.abs(diag_j))
    ld = jnp.sum(log_diag_j, axis=-1) if sum_ldj else log_diag_j
    return z, ld


# ----------------------------- main -------------------------------------------
if __name__ == "__main__":
    key = jax.random.PRNGKey(0)
    kz, k1, k2, kb = jax.random.split(key, 4)

    B, Z = 128, 16                      # small demo: 2 batch tiles of 64
    zk = jax.random.normal(kz, (B, Z), jnp.float32)
    r1 = 0.1 * jax.random.normal(k1, (B, Z, Z), jnp.float32)
    r2 = 0.1 * jax.random.normal(k2, (B, Z, Z), jnp.float32)
    b = jax.random.normal(kb, (B, 1, Z), jnp.float32)
    flip = np.arange(Z - 1, -1, -1)     # the repo's flip_idx permutation (Q = P)

    tol = dict(rtol=1e-4, atol=1e-4)
    cases = [
        ("identity", None, True),
        ("flip", flip, True),
        ("flip_no_sum", flip, False),
    ]
    for name, perm, sldj in cases:
        fwd = jax.jit(functools.partial(triangular_sylvester,
                                        permute_z=perm, sum_ldj=sldj))
        z, ld = jax.block_until_ready(fwd(zk, r1, r2, b))
        z_ref, ld_ref = ref_triangular_sylvester(zk, r1, r2, b,
                                                 permute_z=perm, sum_ldj=sldj)
        np.testing.assert_allclose(np.asarray(z), np.asarray(z_ref),
                                   err_msg=f"z[{name}]", **tol)
        np.testing.assert_allclose(np.asarray(ld), np.asarray(ld_ref),
                                   err_msg=f"log_det_j[{name}]", **tol)
        assert z.shape == (B, Z)

    # Larger batch: exercises the big-tile path (tb=256, 2 inner sub-chunks).
    B2 = 512
    kz2, k12, k22, kb2 = jax.random.split(jax.random.PRNGKey(1), 4)
    zk2 = jax.random.normal(kz2, (B2, Z), jnp.float32)
    r12 = 0.1 * jax.random.normal(k12, (B2, Z, Z), jnp.float32)
    r22 = 0.1 * jax.random.normal(k22, (B2, Z, Z), jnp.float32)
    b2 = jax.random.normal(kb2, (B2, 1, Z), jnp.float32)
    fwd_big = jax.jit(functools.partial(triangular_sylvester,
                                        permute_z=flip, sum_ldj=True))
    z, ld = jax.block_until_ready(fwd_big(zk2, r12, r22, b2))
    z_ref, ld_ref = ref_triangular_sylvester(zk2, r12, r22, b2,
                                             permute_z=flip, sum_ldj=True)
    np.testing.assert_allclose(np.asarray(z), np.asarray(z_ref),
                               err_msg="z[big]", **tol)
    np.testing.assert_allclose(np.asarray(ld), np.asarray(ld_ref),
                               err_msg="log_det_j[big]", **tol)

    # Opt-in bf16 transport of r1/r2 (halves dominant HBM bytes); validated
    # apples-to-apples against the f32 reference on bf16-quantized r1/r2.
    r1_q = r12.astype(jnp.bfloat16).astype(jnp.float32)
    r2_q = r22.astype(jnp.bfloat16).astype(jnp.float32)
    fwd_bf16 = jax.jit(functools.partial(triangular_sylvester,
                                         permute_z=None, sum_ldj=True,
                                         transport_dtype=jnp.bfloat16))
    z, ld = jax.block_until_ready(fwd_bf16(zk2, r1_q, r2_q, b2))
    z_ref, ld_ref = ref_triangular_sylvester(zk2, r1_q, r2_q, b2,
                                             permute_z=None, sum_ldj=True)
    np.testing.assert_allclose(np.asarray(z), np.asarray(z_ref),
                               err_msg="z[bf16]", **tol)
    np.testing.assert_allclose(np.asarray(ld), np.asarray(ld_ref),
                               err_msg="log_det_j[bf16]", **tol)

    print("KERNEL_OK")
</pallas_src>

<mosaic_0001>
module attributes {stable_mosaic.version = 11 : i64} {
  func.func @_tri_sylvester_kernel(%arg0: i32, %arg1: memref<64x16xf32, #tpu.memory_space<vmem>>, %arg2: memref<64x16xf32, #tpu.memory_space<vmem>>, %arg3: memref<64x16xf32, #tpu.memory_space<vmem>>, %arg4: memref<64x256xf32, #tpu.memory_space<vmem>>, %arg5: memref<64x256xf32, #tpu.memory_space<vmem>>, %arg6: memref<16x256xf32, #tpu.memory_space<vmem>>, %arg7: memref<256x16xf32, #tpu.memory_space<vmem>>, %arg8: memref<16x16xf32, #tpu.memory_space<vmem>>, %arg9: memref<64x16xf32, #tpu.memory_space<vmem>>, %arg10: memref<64x16xf32, #tpu.memory_space<vmem>>) attributes {dimension_semantics = [#tpu.dimension_semantics<parallel>], iteration_bounds = array<i64: 2>, scalar_prefetch = 0 : i64, scratch_operands = 0 : i64, tpu.core_type = #tpu.core_type<tc>, window_params = [{transform_indices = @transform_0, window_bounds = array<i64: 64, 16>}, {transform_indices = @transform_1, window_bounds = array<i64: 64, 16>}, {transform_indices = @transform_2, window_bounds = array<i64: 64, 16>}, {transform_indices = @transform_3, window_bounds = array<i64: 64, 256>}, {transform_indices = @transform_4, window_bounds = array<i64: 64, 256>}, {pipeline_mode = #tpu.pipeline_mode<synchronous>, transform_indices = @transform_5, window_bounds = array<i64: 16, 256>}, {pipeline_mode = #tpu.pipeline_mode<synchronous>, transform_indices = @transform_6, window_bounds = array<i64: 256, 16>}, {pipeline_mode = #tpu.pipeline_mode<synchronous>, transform_indices = @transform_7, window_bounds = array<i64: 16, 16>}, {transform_indices = @transform_8, window_bounds = array<i64: 64, 16>}, {transform_indices = @transform_9, window_bounds = array<i64: 64, 16>}]} {
    %c0 = arith.constant 0 : index
    %c0_0 = arith.constant 0 : index
    %0 = vector.load %arg6[%c0, %c0_0] : memref<16x256xf32, #tpu.memory_space<vmem>>, vector<16x256xf32>
    %c0_1 = arith.constant 0 : index
    %c0_2 = arith.constant 0 : index
    %1 = vector.load %arg7[%c0_1, %c0_2] : memref<256x16xf32, #tpu.memory_space<vmem>>, vector<256x16xf32>
    %c0_3 = arith.constant 0 : index
    %c0_4 = arith.constant 0 : index
    %2 = vector.load %arg1[%c0_3, %c0_4] : memref<64x16xf32, #tpu.memory_space<vmem>>, vector<64x16xf32>
    %c0_5 = arith.constant 0 : index
    %c0_6 = arith.constant 0 : index
    %3 = vector.load %arg2[%c0_5, %c0_6] : memref<64x16xf32, #tpu.memory_space<vmem>>, vector<64x16xf32>
    %c0_7 = arith.constant 0 : index
    %c0_8 = arith.constant 0 : index
    %4 = vector.load %arg3[%c0_7, %c0_8] : memref<64x16xf32, #tpu.memory_space<vmem>>, vector<64x16xf32>
    %c0_9 = arith.constant 0 : index
    %c0_10 = arith.constant 0 : index
    %5 = vector.load %arg4[%c0_9, %c0_10] : memref<64x256xf32, #tpu.memory_space<vmem>>, vector<64x256xf32>
    %c0_11 = arith.constant 0 : index
    %c0_12 = arith.constant 0 : index
    %6 = vector.load %arg5[%c0_11, %c0_12] : memref<64x256xf32, #tpu.memory_space<vmem>>, vector<64x256xf32>
    %cst = arith.constant dense<0.000000e+00> : vector<64x256xf32>
    %7 = tpu.matmul %2, %0, %cst {dimension_numbers = #tpu.dot_dimension_numbers<[1], [0], [0], [1], [0, 0, 1, 1], [], []>, precision = #tpu.contract_precision<fp32>} : vector<64x16xf32>, vector<16x256xf32>, vector<64x256xf32> -> vector<64x256xf32>
    %8 = arith.mulf %6, %7 : vector<64x256xf32>
    %cst_13 = arith.constant dense<0.000000e+00> : vector<64x16xf32>
    %9 = tpu.matmul %8, %1, %cst_13 {dimension_numbers = #tpu.dot_dimension_numbers<[1], [0], [0], [1], [0, 0, 1, 1], [], []>, precision = #tpu.contract_precision<fp32>} : vector<64x256xf32>, vector<256x16xf32>, vector<64x16xf32> -> vector<64x16xf32>
    %10 = arith.addf %9, %3 : vector<64x16xf32>
    %11 = math.tanh %10 : vector<64x16xf32>
    %cst_14 = arith.constant dense<0.000000e+00> : vector<64x256xf32>
    %12 = tpu.matmul %11, %0, %cst_14 {dimension_numbers = #tpu.dot_dimension_numbers<[1], [0], [0], [1], [0, 0, 1, 1], [], []>, precision = #tpu.contract_precision<fp32>} : vector<64x16xf32>, vector<16x256xf32>, vector<64x256xf32> -> vector<64x256xf32>
    %13 = arith.mulf %5, %12 : vector<64x256xf32>
    %cst_15 = arith.constant dense<0.000000e+00> : vector<64x16xf32>
    %14 = tpu.matmul %13, %1, %cst_15 {dimension_numbers = #tpu.dot_dimension_numbers<[1], [0], [0], [1], [0, 0, 1, 1], [], []>, precision = #tpu.contract_precision<fp32>} : vector<64x256xf32>, vector<256x16xf32>, vector<64x16xf32> -> vector<64x16xf32>
    %15 = arith.addf %2, %14 : vector<64x16xf32>
    %c0_16 = arith.constant 0 : index
    %c0_17 = arith.constant 0 : index
    %16 = vector.load %arg9[%c0_16, %c0_17] : memref<64x16xf32, #tpu.memory_space<vmem>>, vector<64x16xf32>
    tpu.vector_store %arg9[%c0_16, %c0_17], %15 {strides = array<i32>} : memref<64x16xf32, #tpu.memory_space<vmem>>, vector<64x16xf32>,
    %17 = arith.mulf %11, %11 : vector<64x16xf32>
    %cst_18 = arith.constant 1.000000e+00 : f32
    %18 = vector.broadcast %cst_18 : f32 to vector<64x16xf32>
    %19 = arith.subf %18, %17 : vector<64x16xf32>
    %20 = arith.mulf %19, %4 : vector<64x16xf32>
    %cst_19 = arith.constant 1.000000e+00 : f32
    %21 = vector.broadcast %cst_19 : f32 to vector<64x16xf32>
    %22 = arith.addf %21, %20 : vector<64x16xf32>
    %23 = math.absf %22 : vector<64x16xf32>
    %24 = math.log %23 : vector<64x16xf32>
    %c0_20 = arith.constant 0 : index
    %c0_21 = arith.constant 0 : index
    %25 = vector.load %arg10[%c0_20, %c0_21] : memref<64x16xf32, #tpu.memory_space<vmem>>, vector<64x16xf32>
    tpu.vector_store %arg10[%c0_20, %c0_21], %24 {strides = array<i32>} : memref<64x16xf32, #tpu.memory_space<vmem>>, vector<64x16xf32>,
    return
  }
  func.func @transform_0(%arg0: i32) -> (i32, i32) {
    %c0_i32 = arith.constant 0 : i32
    %c0_i32_0 = arith.constant 0 : i32
    return %arg0, %c0_i32 : i32, i32
  }
  func.func @transform_1(%arg0: i32) -> (i32, i32) {
    %c0_i32 = arith.constant 0 : i32
    %c0_i32_0 = arith.constant 0 : i32
    return %arg0, %c0_i32 : i32, i32
  }
  func.func @transform_2(%arg0: i32) -> (i32, i32) {
    %c0_i32 = arith.constant 0 : i32
    %c0_i32_0 = arith.constant 0 : i32
    return %arg0, %c0_i32 : i32, i32
  }
  func.func @transform_3(%arg0: i32) -> (i32, i32) {
    %c0_i32 = arith.constant 0 : i32
    %c0_i32_0 = arith.constant 0 : i32
    return %arg0, %c0_i32 : i32, i32
  }
  func.func @transform_4(%arg0: i32) -> (i32, i32) {
    %c0_i32 = arith.constant 0 : i32
    %c0_i32_0 = arith.constant 0 : i32
    return %arg0, %c0_i32 : i32, i32
  }
  func.func @transform_5(%arg0: i32) -> (i32, i32) {
    %c0_i32 = arith.constant 0 : i32
    %c0_i32_0 = arith.constant 0 : i32
    %c0_i32_1 = arith.constant 0 : i32
    return %c0_i32, %c0_i32_0 : i32, i32
  }
  func.func @transform_6(%arg0: i32) -> (i32, i32) {
    %c0_i32 = arith.constant 0 : i32
    %c0_i32_0 = arith.constant 0 : i32
    %c0_i32_1 = arith.constant 0 : i32
    return %c0_i32, %c0_i32_0 : i32, i32
  }
  func.func @transform_7(%arg0: i32) -> (i32, i32) {
    %c0_i32 = arith.constant 0 : i32
    %c0_i32_0 = arith.constant 0 : i32
    %c0_i32_1 = arith.constant 0 : i32
    return %c0_i32, %c0_i32_0 : i32, i32
  }
  func.func @transform_8(%arg0: i32) -> (i32, i32) {
    %c0_i32 = arith.constant 0 : i32
    %c0_i32_0 = arith.constant 0 : i32
    return %arg0, %c0_i32 : i32, i32
  }
  func.func @transform_9(%arg0: i32) -> (i32, i32) {
    %c0_i32 = arith.constant 0 : i32
    %c0_i32_0 = arith.constant 0 : i32
    return %arg0, %c0_i32 : i32, i32
  }
}

</mosaic_0001>

<bundles_post_ra>
// kernel: mul.0
= control target key start
LH: loop header
LB: loop body
LE: loop exit
PB: predicated region body
PF: predicated region fallthrough
CT: control target
= control target key end

     0   :  { %s56_s0 = inlined_call_operand.vmem [shape: f32[16,128], index: 0, kind: input, shape index: {}]   ;;  %s57_s1 = inlined_call_operand.vmem [shape: f32[16,128], index: 1, kind: input, shape index: {}]   ;;  %s58_s2 = inlined_call_operand.vmem [shape: f32[16,128], index: 2, kind: output, shape index: {}]  }
   0x1   :  { %v3_v0 = vld [vmem:[%s56_s0] sm:$0xff]  ;;  %v20_v2 = vld [vmem:[%s56_s0 + $0x8] sm:$0xff] }
   0x2   :  { %v4_v1 = vld [vmem:[%s57_s1] sm:$0xff]  ;;  %v21_v4 = vld [vmem:[%s57_s1 + $0x8] sm:$0xff] }
   0x3   :  { %v7_v3 = vmul.f32 %v4_v1, %v3_v0  ;;  %v16_v5 = vmul.f32 %v21_v4, %v20_v2 }
   0x5   :  { %9 = vst [vmem:[%s58_s2] sm:$0xff] %v7_v3  ;;  %22 = vst [vmem:[%s58_s2 + $0x8] sm:$0xff] %v16_v5 }

// kernel: triangular_sylvester.1
= control target key start
LH: loop header
LB: loop body
LE: loop exit
PB: predicated region body
PF: predicated region fallthrough
CT: control target
= control target key end

     0   :  { %s6432_s30 = smov 0   ;;  %s8392_s0 = inlined_call_operand.vmem [shape: f32[128,16], index: 0, kind: input, shape index: {}]   ;;  %s8393_s1 = inlined_call_operand.vmem [shape: f32[128,16], index: 1, kind: input, shape index: {}]   ;;  %s8394_s2 = inlined_call_operand.vmem [shape: f32[128,16], index: 2, kind: input, shape index: {}]   ;;  %s8395_s3 = inlined_call_operand.vmem [shape: f32[128,256], index: 3, kind: input, shape index: {}]   ;;  %s8396_s4 = inlined_call_operand.vmem [shape: f32[128,256], index: 4, kind: input, shape index: {}]   ;;  %s8397_s5 = inlined_call_operand.vmem [shape: f32[16,256], index: 5, kind: input, shape index: {}]   ;;  %s8398_s6 = inlined_call_operand.vmem [shape: f32[256,16], index: 6, kind: input, shape index: {}]   ;;  %s8399_s7 = inlined_call_operand.vmem [shape: f32[16,16], index: 7, kind: input, shape index: {}]   ;;  %s8400_s8 = inlined_call_operand.vmem [shape: f32[128,16], index: 8, kind: output, shape index: {0}]   ;;  %s8401_s9 = inlined_call_operand.vmem [shape: f32[128,16], index: 9, kind: output, shape index: {1}]  }
   0x1 LB: > { %s5019_s10 = sadd.s32 4294967295, %s6379_s30   ;;  %p5023_p0 = scmp.ge.s32.totalorder %s6379_s30, 1  ;;  %s6379_s30 = sphi %s6432_s30, %s20_s30  }
   0x2   : > { %p337_p1 = scmp.lt.s32.totalorder %s6379_s30, 3 }
   0x4   : > { %p338_p2 = pnand %p5023_p0, %p337_p1 }
   0x6   : > { %341 = sbr.rel (%p338_p2) target bundleno = 1604 (0x644), region = 52 }
   0xd   : > { %v445_v0 = vld [vmem:[%s8397_s5 + $0x8] sm:$0xff]  ;;  %v447_v1 = vld [vmem:[%s8397_s5 + $0x18] sm:$0xff]  ;;  %v444_v2 = vld [vmem:[%s8397_s5] sm:$0xff]  ;;  %s5024_s16 = sshll.u32 %s5019_s10, 3  ;;  %v8421_v7 = vmov 0.0   ;;  %vm536_vm0 = vcmask 130048  }
   0xe   : > { %v561_v3 = vand.u32 4294901760, %v445_v0  ;;  %v565_v4 = vand.u32 4294901760, %v447_v1  ;;  %v446_v5 = vld [vmem:[%s8397_s5 + $0x10] sm:$0xff]  ;;  %v563_v6 = vand.u32 4294901760, %v444_v2  ;;  %629 = vmatprep.mubr.f32.mxu0 %v8421_v7  ;;  %p401_p3 = scmp.lt.s32.totalorder %s5024_s16, 15 }
   0xf   : > { %v567_v8 = vand.u32 4294901760, %v446_v5 }
  0x10   : > { %v6453_v9 = vpack.c.bf16 %v565_v4, %v561_v3  ;;  %v719_v10 = vsub.f32 %v445_v0, %v561_v3  ;;  %v731_v11 = vsub.f32 %v447_v1, %v565_v4  ;;  %s8916_s16 = smov (!%p401_p3, %s5024_s16), 15  ;;  %v6457_v12 = vsub.f32 %v444_v2, %v563_v6 }
  0x11   : > { %v6459_v13 = vpack.c.bf16 %v567_v8, %v563_v6  ;;  %v6461_v14 = vsub.f32 %v446_v5, %v567_v8  ;;  %s6465_s19 = sshll.u32 %s8916_s16, 3  ;;  %s5042_s12 = sshll.u32 %s8916_s16, 4 }
  0x12   : > { %8599 = vst [vmem:[#allocation2_spill] sm:$0xff] %v6453_v9  ;;  %5717 = vmatprep.subr.bf16.mxu0 %v6453_v9  ;;  %v720_v15 = vand.u32 4294901760, %v719_v10  ;;  %v732_v16 = vand.u32 4294901760, %v731_v11  ;;  %v726_v17 = vand.u32 4294901760, %v6457_v12  ;;  %s6473_s22 = scalar_lea.vmem %s8392_s0, %s6465_s19  ;;  %v6529_v58 = vpack.c.bf16 %v731_v11, %v719_v10  ;;  %s7143_s15 = scalar_lea.vmem %s8396_s4, %s5042_s12 }
  0x13   : > { %8600 = vst [vmem:[#allocation3_spill] sm:$0xff] %v6459_v13  ;;  %5719 = vmatpush1.bf16.msra.mxu0 %v6459_v13  ;;  %v738_v18 = vand.u32 4294901760, %v6461_v14  ;;  %v480_v21 = vld [vmem:[%s6473_s22] sm:$0xff]  ;;  %v481_v23 = vld [vmem:[%s6473_s22 + $0x8] sm:$0xff]  ;;  %v482_v24 = vld [vmem:[%s6473_s22 + $0x10] sm:$0xff]  ;;  %s7756_s20 = scalar_lea.vmem %s8393_s1, %s6465_s19  ;;  %s7774_s24 = scalar_lea.vmem %s8394_s2, %s6465_s19 }
  0x14   : > { %v721_v19 = vsub.f32 %v719_v10, %v720_v15  ;;  %v733_v20 = vsub.f32 %v731_v11, %v732_v16  ;;  %v727_v22 = vsub.f32 %v6457_v12, %v726_v17  ;;  %v6480_v25 = vpack.c.bf16 %v732_v16, %v720_v15  ;;  %v483_v30 = vld [vmem:[%s6473_s22 + $0x18] sm:$0xff]  ;;  %v484_v31 = vld [vmem:[%s6473_s22 + $0x20] sm:$0xff]  ;;  %v485_v46 = vld [vmem:[%s6473_s22 + $0x28] sm:$0xff]  ;;  %8603 = vst [vmem:[#allocation6_spill] sm:$0xff] %v6529_v58  ;;  %s7831_s27 = scalar_lea.vmem %s8401_s9, %s6465_s19  ;;  %s8013_s10 = scalar_lea.vmem %s8395_s3, %s5042_s12 }
  0x15   : > { %v538_v26 = vsel %vm536_vm0, %v480_v21, 0  ;;  %v739_v27 = vsub.f32 %v6461_v14, %v738_v18  ;;  %v541_v28 = vsel %vm536_vm0, %v481_v23, 0  ;;  %v544_v29 = vsel %vm536_vm0, %v482_v24, 0  ;;  %v486_v54 = vld [vmem:[%s6473_s22 + $0x30] sm:$0xff]  ;;  %v487_v2 = vld [vmem:[%s6473_s22 + $0x38] sm:$0xff]  ;;  %s8361_s11 = scalar_lea.vmem %s8400_s8, %s6465_s19 }
  0x16   : > { %8601 = vst [vmem:[#allocation4_spill] sm:$0xff] %v6480_v25  ;;  %v722_v32 = vand.u32 4294901760, %v721_v19  ;;  %v734_v33 = vand.u32 4294901760, %v733_v20  ;;  %v6488_v34 = vand.u32 4294901760, %v538_v26  ;;  %v6490_v35 = vand.u32 4294901760, %v541_v28 }
  0x17   : > { %v6492_v36 = vand.u32 4294901760, %v544_v29  ;;  %v547_v37 = vsel %vm536_vm0, %v483_v30, 0  ;;  %v550_v41 = vsel %vm536_vm0, %v484_v31, 0  ;;  %v728_v42 = vand.u32 4294901760, %v727_v22  ;;  %v6621_v31 = vld [vmem:[%s8398_s6] sm:$0xff] }
  0x18   : > { %v6495_v38 = vpack.c.bf16 %v734_v33, %v722_v32  ;;  %v6498_v39 = vsub.f32 %v538_v26, %v6488_v34  ;;  %v6500_v40 = vand.u32 4294901760, %v547_v37  ;;  %v740_v43 = vand.u32 4294901760, %v739_v27 }
  0x19   : > { %v6504_v44 = vsub.f32 %v541_v28, %v6490_v35  ;;  %v6507_v45 = vsub.f32 %v544_v29, %v6492_v36  ;;  %v6513_v49 = vand.u32 4294901760, %v550_v41  ;;  %v553_v53 = vsel %vm536_vm0, %v485_v46, 0 }
  0x1a   : > { %5721 = vmatprep.subr.bf16.mxu0 %v6495_v38  ;;  %v632_v47 = vand.u32 4294901760, %v6498_v39  ;;  %v6520_v52 = vsub.f32 %v547_v37, %v6500_v40  ;;  %v6524_v55 = vpack.c.bf16 %v740_v43, %v728_v42  ;;  %v6534_v60 = vand.u32 4294901760, %v553_v53  ;;  %v6629_v37 = vld [vmem:[%s8398_s6 + $0x8] sm:$0xff]  ;;  %v6635_v42 = vld [vmem:[%s8398_s6 + $0x90] sm:$0xff]  ;;  %v6640_v43 = vld [vmem:[%s8398_s6 + $0x98] sm:$0xff] }
  0x1b   : > { %v643_v48 = vand.u32 4294901760, %v6504_v44  ;;  %v654_v51 = vand.u32 4294901760, %v6507_v45  ;;  %v6532_v59 = vsub.f32 %v550_v41, %v6513_v49  ;;  %v556_v61 = vsel %vm536_vm0, %v486_v54, 0  ;;  %v6648_v54 = vld [vmem:[%s8398_s6 + $0x10] sm:$0xff] }
  0x1c   : > { %v633_v50 = vsub.f32 %v6498_v39, %v632_v47  ;;  %8602 = vst [vmem:[#allocation5_spill] sm:$0xff] %v6524_v55  ;;  %v665_v0 = vand.u32 4294901760, %v6520_v52  ;;  %v6541_v1 = vpack.c.bf16 %v738_v18, %v726_v17  ;;  %v6547_v3 = vand.u32 4294901760, %v556_v61 }
  0x1d   : > { %v644_v56 = vsub.f32 %v6504_v44, %v643_v48  ;;  %v655_v63 = vsub.f32 %v6507_v45, %v654_v51  ;;  %v8419_v6 = vand.u32 4294901760, %v6532_v59  ;;  %v6554_v8 = vsub.f32 %v553_v53, %v6534_v60 }
  0x1e   : > { %v634_v57 = vand.u32 4294901760, %v633_v50  ;;  %8604 = vst [vmem:[#allocation7_spill] sm:$0xff] %v6541_v1  ;;  %v666_v5 = vsub.f32 %v6520_v52, %v665_v0  ;;  %v559_v10 = vsel %vm536_vm0, %v487_v2, 0  ;;  %v6559_v11 = vsub.f32 %v556_v61, %v6547_v3  ;;  %v6671_v2 = vld [vmem:[%s8398_s6 + $0xa8] sm:$0xff] }
  0x1f   : > { %v645_v62 = vand.u32 4294901760, %v644_v56  ;;  %v656_v4 = vand.u32 4294901760, %v655_v63  ;;  %v677_v16 = vsub.f32 %v6532_v59, %v8419_v6  ;;  %v8418_v17 = vand.u32 4294901760, %v6554_v8  ;;  %v6653_v56 = vld [vmem:[%s8398_s6 + $0x18] sm:$0xff] }
  0x20   : > { %635 = vmatmul.mubr.f32.vlgmr.msra.gmra.mrb[0].mxu0 %v634_v57  ;;  %v667_v15 = vand.u32 4294901760, %v666_v5  ;;  %v6565_v18 = vand.u32 4294901760, %v559_v10  ;;  %v8413_v21 = vand.u32 4294901760, %v6559_v11  ;;  %v6589_v30 = vpack.c.bf16 %v6461_v14, %v6457_v12  ;;  %v6611_v12 = vld [vmem:[%s8398_s6 + $0x80] sm:$0xff]  ;;  %v6616_v14 = vld [vmem:[%s8398_s6 + $0x88] sm:$0xff] }
  0x21   : > { %5723 = vmatpush1.bf16.msra.mxu0 %v6524_v55  ;;  %640 = vmatprep.mubr.f32.mxu0 %v8421_v7  ;;  %v678_v19 = vand.u32 4294901760, %v677_v16  ;;  %v688_v20 = vsub.f32 %v6554_v8, %v8418_v17  ;;  %v8411_v32 = vand.u32 4294901760, %v6611_v12  ;;  %v8410_v33 = vand.u32 4294901760, %v6616_v14  ;;  %v6658_v57 = vld [vmem:[%s8398_s6 + $0xa0] sm:$0xff] }
  0x22   : > { %5725 = vmatprep.subr.bf16.mxu0 %v6529_v58  ;;  %v6573_v22 = vsub.f32 %v559_v10, %v6565_v18  ;;  %v699_v24 = vsub.f32 %v6559_v11, %v8413_v21  ;;  %8605 = vst [vmem:[#allocation8_spill] sm:$0xff] %v6589_v30  ;;  %v8409_v41 = vand.u32 4294901760, %v6621_v31  ;;  %v8408_v46 = vand.u32 4294901760, %v6629_v37  ;;  %v6691_v16 = vld [vmem:[%s8398_s6 + $0x20] sm:$0xff] }
  0x23   : > { %v689_v23 = vand.u32 4294901760, %v688_v20  ;;  %v8403_v50 = vand.u32 4294901760, %v6635_v42  ;;  %v8402_v53 = vand.u32 4294901760, %v6640_v43  ;;  %v6664_v61 = vpack.c.bf16 %v8410_v33, %v8411_v32  ;;  %v6703_v20 = vld [vmem:[%s8398_s6 + $0xb0] sm:$0xff] }
  0x24   : > { %646 = vmatmul.mubr.f32.gmra.mrb[2].mxu0 %v645_v62  ;;  %v8412_v26 = vand.u32 4294901760, %v6573_v22  ;;  %v700_v27 = vand.u32 4294901760, %v699_v24  ;;  %v8405_v62 = vand.u32 4294901760, %v6648_v54  ;;  %v8404_v63 = vand.u32 4294901760, %v6653_v56 }
  0x25   : > { %651 = vmatprep.mubr.f32.mxu0 %v8421_v7  ;;  %8606 = vst [vmem:[#allocation9_spill] sm:$0xff] %v6664_v61  ;;  %v6684_v5 = vpack.c.bf16 %v8402_v53, %v8403_v50  ;;  %v8407_v10 = vand.u32 4294901760, %v6658_v57  ;;  %5741 = vmatprep.subr.bf16.mxu1 %v6664_v61  ;;  %v8417_v53 = vand.u32 4294901760, %v6703_v20 }
  0x26   : > { %v710_v28 = vsub.f32 %v6573_v22, %v8412_v26  ;;  %v6717_v24 = vpack.c.bf16 %v8404_v63, %v8405_v62  ;;  %v6734_v63 = vld [vmem:[%s8398_s6 + $0x30] sm:$0xff]  ;;  %v6739_v62 = vld [vmem:[%s8398_s6 + $0x38] sm:$0xff] }
  0x27   : > { %8608 = vst [vmem:[#allocation11_spill] sm:$0xff] %v6684_v5  ;;  %v8420_v33 = vand.u32 4294901760, %v6739_v62 }
  0x28   : > { %657 = vmatmul.mubr.f32.gmra.mrb[4].mxu0 %v656_v4  ;;  %v711_v29 = vand.u32 4294901760, %v710_v28  ;;  %v6678_v4 = vpack.c.bf16 %v8408_v46, %v8409_v41  ;;  %8609 = vst [vmem:[#allocation12_spill] sm:$0xff] %v6717_v24  ;;  %v8427_v41 = vand.u32 4294901760, %v6734_v63 }
  0x29   : > { %662 = vmatprep.mubr.f32.mxu0 %v8421_v7 }
  0x2a   : > { %8607 = vst [vmem:[#allocation10_spill] sm:$0xff] %v6678_v4  ;;  %5743 = vmatpush3.bf16.msra.mxu1 %v6678_v4  ;;  %v527_v4 = vld [vmem:[%s7143_s15 + $0x38] sm:$0xff] }
  0x2b   : > { %5745 = vmatprep.subr.bf16.mxu1 %v6684_v5 }
  0x2c   : > { %668 = vmatmul.mubr.f32.gmra.mrb[6].mxu0 %v667_v15  ;;  %v8406_v15 = vand.u32 4294901760, %v6671_v2 }
  0x2d   : > { %673 = vmatprep.mubr.f32.mxu0 %v8421_v7 }
  0x2e   : > { %5747 = vmatpush3.bf16.msra.mxu1 %v6717_v24 }
  0x30   : > { %679 = vmatmul.mubr.f32.gmra.mrb[8].mxu0 %v678_v19  ;;  %v6696_v19 = vld [vmem:[%s8398_s6 + $0x28] sm:$0xff] }
  0x31   : > { %684 = vmatprep.mubr.f32.mxu0 %v8421_v7  ;;  %v8414_v28 = vand.u32 4294901760, %v6696_v19 }
  0x34   : > { %690 = vmatmul.mubr.f32.gmra.mrb[10].mxu0 %v689_v23  ;;  %v6708_v23 = vld [vmem:[%s8398_s6 + $0xb8] sm:$0xff] }
  0x35   : > { %695 = vmatprep.mubr.f32.mxu0 %v8421_v7  ;;  %v8416_v50 = vand.u32 4294901760, %v6708_v23 }
  0x37   : > { %v6767_v32 = vpack.c.bf16 %v8416_v50, %v8417_v53  ;;  %v6787_v50 = vpack.c.bf16 %v8420_v33, %v8427_v41 }
  0x38   : > { %701 = vmatmul.mubr.f32.gmra.mrb[12].mxu0 %v700_v27  ;;  %v8415_v27 = vand.u32 4294901760, %v6691_v16 }
  0x39   : > { %706 = vmatprep.mubr.f32.mxu0 %v8421_v7  ;;  %8612 = vst [vmem:[#allocation15_spill] sm:$0xff] %v6767_v32  ;;  %8613 = vst [vmem:[#allocation16_spill] sm:$0xff] %v6787_v50 }
  0x3a   : > { %v6757_v46 = vpack.c.bf16 %v8414_v28, %v8415_v27  ;;  %v6774_v28 = vld [vmem:[%s8398_s6 + $0x40] sm:$0xff]  ;;  %v6779_v27 = vld [vmem:[%s8398_s6 + $0x48] sm:$0xff] }
  0x3b   : > { %v8424_v53 = vand.u32 4294901760, %v6774_v28  ;;  %v8423_v17 = vand.u32 4294901760, %v6779_v27 }
  0x3c   : > { %712 = vmatmul.mubr.f32.gmra.mrb[14].mxu0 %v711_v29  ;;  %v6727_v29 = vpack.c.bf16 %v8406_v15, %v8407_v10  ;;  %v6745_v15 = vld [vmem:[%s8398_s6 + $0xc0] sm:$0xff]  ;;  %v6750_v10 = vld [vmem:[%s8398_s6 + $0xc8] sm:$0xff]  ;;  %8611 = vst [vmem:[#allocation14_spill] sm:$0xff] %v6757_v46 }
  0x3d   : > { %802 = vmatprep.mubr.f32.mxu0 %v8421_v7  ;;  %v8426_v26 = vand.u32 4294901760, %v6745_v15  ;;  %v8425_v21 = vand.u32 4294901760, %v6750_v10  ;;  %v6805_v33 = vpack.c.bf16 %v8423_v17, %v8424_v53 }
  0x3e   : > { %8610 = vst [vmem:[#allocation13_spill] sm:$0xff] %v6727_v29  ;;  %5749 = vmatprep.subr.bf16.mxu1 %v6727_v29 }
  0x3f   : > { %5751 = vmatpush3.bf16.msra.mxu1 %v6757_v46  ;;  %v6797_v6 = vpack.c.bf16 %v8425_v21, %v8426_v26  ;;  %8615 = vst [vmem:[#allocation18_spill] sm:$0xff] %v6805_v33  ;;  %v478_v21 = vld [vmem:[%s8398_s6 + $0xf0] sm:$0xff]  ;;  %v479_v26 = vld [vmem:[%s8398_s6 + $0xf8] sm:$0xff] }
  0x40   : > { %804 = vmatmul.mubr.f32.vlgmr.msra.gmra.mrb[0].mxu0 %v6488_v34  ;;  %5753 = vmatprep.subr.bf16.mxu1 %v6767_v32  ;;  %v1502_v41 = vand.u32 4294901760, %v478_v21  ;;  %v523_v32 = vld [vmem:[%s7143_s15 + $0x18] sm:$0xff] }
  0x41   : > { %5727 = vmatpush1.bf16.msra.mxu0 %v6589_v30  ;;  %809 = vmatprep.mubr.f32.mxu0 %v8421_v7  ;;  %8614 = vst [vmem:[#allocation17_spill] sm:$0xff] %v6797_v6 }
  0x42   : > { %5729 = vmatprep.subr.bf16.mxu0 %v6453_v9 }
  0x43   : > { %5755 = vmatpush3.bf16.msra.mxu1 %v6787_v50 }
  0x44   : > { %811 = vmatmul.mubr.f32.gmra.mrb[2].mxu0 %v6490_v35  ;;  %5757 = vmatprep.subr.bf16.mxu1 %v6797_v6 }
  0x45   : > { %816 = vmatprep.mubr.f32.mxu0 %v8421_v7 }
  0x47   : > { %5759 = vmatpush3.bf16.msra.mxu1 %v6805_v33 }
  0x48   : > { %818 = vmatmul.mubr.f32.gmra.mrb[4].mxu0 %v6492_v36 }
  0x49   : > { %823 = vmatprep.mubr.f32.mxu0 %v8421_v7 }
  0x4c   : > { %825 = vmatmul.mubr.f32.gmra.mrb[6].mxu0 %v6500_v40 }
  0x4d   : > { %830 = vmatprep.mubr.f32.mxu0 %v8421_v7 }
  0x50   : > { %832 = vmatmul.mubr.f32.gmra.mrb[8].mxu0 %v6513_v49 }
  0x51   : > { %837 = vmatprep.mubr.f32.mxu0 %v8421_v7 }
  0x54   : > { %839 = vmatmul.mubr.f32.gmra.mrb[10].mxu0 %v6534_v60 }
  0x55   : > { %844 = vmatprep.mubr.f32.mxu0 %v8421_v7 }
  0x58   : > { %846 = vmatmul.mubr.f32.gmra.mrb[12].mxu0 %v6547_v3 }
  0x59   : > { %851 = vmatprep.mubr.f32.mxu0 %v8421_v7 }
  0x5c   : > { %853 = vmatmul.mubr.f32.gmra.mrb[14].mxu0 %v6565_v18 }
  0x5d   : > { %931 = vmatprep.mubr.f32.mxu0 %v8421_v7 }
  0x60   : > { %934 = vmatmul.mubr.f32.vlgmr.msra.gmra.mrb[0].mxu0 %v6498_v39  ;;  %v8616_v39 = vand.u32 4294901760, %v6532_v59 }
  0x61   : > { %5731 = vmatpush1.bf16.msra.mxu0 %v6459_v13  ;;  %939 = vmatprep.mubr.f32.mxu0 %v8421_v7 }
  0x62   : > { %5733 = vmatprep.subr.bf16.mxu0 %v6480_v25 }
  0x64   : > { %942 = vmatmul.mubr.f32.gmra.mrb[2].mxu0 %v6504_v44  ;;  %v8617_v44 = vand.u32 4294901760, %v6554_v8 }
  0x65   : > { %947 = vmatprep.mubr.f32.mxu0 %v8421_v7 }
  0x68   : > { %950 = vmatmul.mubr.f32.gmra.mrb[4].mxu0 %v6507_v45  ;;  %v8618_v45 = vand.u32 4294901760, %v6559_v11 }
  0x69   : > { %955 = vmatprep.mubr.f32.mxu0 %v8421_v7 }
  0x6c   : > { %958 = vmatmul.mubr.f32.gmra.mrb[6].mxu0 %v6520_v52 }
  0x6d   : > { %963 = vmatprep.mubr.f32.mxu0 %v8421_v7 }
  0x70   : > { %966 = vmatmul.mubr.f32.gmra.mrb[8].mxu0 %v6532_v59 }
  0x71   : > { %971 = vmatprep.mubr.f32.mxu0 %v8421_v7 }
  0x74   : > { %974 = vmatmul.mubr.f32.gmra.mrb[10].mxu0 %v6554_v8 }
  0x75   : > { %979 = vmatprep.mubr.f32.mxu0 %v8421_v7 }
  0x78   : > { %982 = vmatmul.mubr.f32.gmra.mrb[12].mxu0 %v6559_v11  ;;  %v460_v11 = vld [vmem:[%s8398_s6 + $0x60] sm:$0xff] }
  0x79   : > { %987 = vmatprep.mubr.f32.mxu0 %v8421_v7 }
  0x7c   : > { %990 = vmatmul.mubr.f32.gmra.mrb[14].mxu0 %v6573_v22 }
  0x7d   : > { %1064 = vmatprep.mubr.f32.mxu0 %v8421_v7 }
  0x80   : > { %1068 = vmatmul.mubr.f32.vlgmr.msra.gmra.mrb[0].mxu0 %v632_v47  ;;  %v8619_v47 = vand.u32 4294901760, %v6573_v22  ;;  %v1448_v22 = vand.u32 4294901760, %v460_v11 }
  0x81   : > { %5735 = vmatpush1.bf16.msra.mxu0 %v6541_v1  ;;  %1073 = vmatprep.mubr.f32.mxu0 %v8421_v7 }
  0x82   : > { %5737 = vmatprep.subr.bf16.mxu0 %v6453_v9 }
  0x84   : > { %1077 = vmatmul.mubr.f32.gmra.mrb[2].mxu0 %v643_v48  ;;  %v459_v48 = vld [vmem:[%s8398_s6 + $0x58] sm:$0xff] }
  0x85   : > { %1082 = vmatprep.mubr.f32.mxu0 %v8421_v7 }
  0x88   : > { %1086 = vmatmul.mubr.f32.gmra.mrb[4].mxu0 %v654_v51  ;;  %v1445_v51 = vand.u32 4294901760, %v459_v48 }
  0x89   : > { %1091 = vmatprep.mubr.f32.mxu0 %v8421_v7 }
  0x8c   : > { %1095 = vmatmul.mubr.f32.gmra.mrb[6].mxu0 %v665_v0  ;;  %v477_v0 = vld [vmem:[%s8398_s6 + $0xe8] sm:$0xff] }
  0x8d   : > { %1100 = vmatprep.mubr.f32.mxu0 %v8421_v7  ;;  %v1499_v8 = vand.u32 4294901760, %v477_v0 }
  0x90   : > { %1104 = vmatmul.mubr.f32.gmra.mrb[8].mxu0 %v8616_v39 }
  0x91   : > { %1109 = vmatprep.mubr.f32.mxu0 %v8421_v7 }
  0x94   : > { %1113 = vmatmul.mubr.f32.gmra.mrb[10].mxu0 %v8617_v44 }
  0x95   : > { %1118 = vmatprep.mubr.f32.mxu0 %v8421_v7 }
  0x98   : > { %1122 = vmatmul.mubr.f32.gmra.mrb[12].mxu0 %v8618_v45  ;;  %v8623_v45 = vand.u32 4294901760, %v6611_v12 }
  0x99   : > { %1127 = vmatprep.mubr.f32.mxu0 %v8421_v7 }
  0x9c   : > { %1131 = vmatmul.mubr.f32.gmra.mrb[14].mxu0 %v8619_v47  ;;  %v6914_v47 = vsub.f32 %v6611_v12, %v8623_v45  ;;  %v1505_v12 = vand.u32 4294901760, %v479_v26  ;;  %v462_v45 = vld [vmem:[%s8398_s6 + $0x70] sm:$0xff] }
  0x9d   : > { %1213 = vmatprep.mubr.f32.mxu0 %v8421_v7  ;;  %v1454_v25 = vand.u32 4294901760, %v462_v45 }
  0x9e   : > { %8624 = vst [vmem:[#allocation22_spill] sm:$0xff] %v6914_v47 }
  0xa0   : > { %1215 = vmatmul.mubr.f32.vlgmr.msra.gmra.mrb[0].mxu0 %v6488_v34 }
  0xa1   : > { %5739 = vmatpush1.bf16.msra.mxu0 %v6459_v13  ;;  %1220 = vmatprep.mubr.f32.mxu0 %v8421_v7 }
  0xa2   : > { %5933 = vmatprep.subr.bf16.mxu0 %v6453_v9  ;;  %v6939_v9 = vpack.c.bf16 %v1505_v12, %v1502_v41 }
  0xa4   : > { %1222 = vmatmul.mubr.f32.gmra.mrb[2].mxu0 %v6490_v35  ;;  %8628 = vst [vmem:[#allocation25_spill] sm:$0xff] %v6939_v9 }
  0xa5   : > { %1227 = vmatprep.mubr.f32.mxu0 %v8421_v7 }
  0xa8   : > { %1229 = vmatmul.mubr.f32.gmra.mrb[4].mxu0 %v6492_v36 }
  0xa9   : > { %1234 = vmatprep.mubr.f32.mxu0 %v8421_v7 }
  0xac   : > { %1236 = vmatmul.mubr.f32.gmra.mrb[6].mxu0 %v6500_v40 }
  0xad   : > { %1241 = vmatprep.mubr.f32.mxu0 %v8421_v7 }
  0xb0   : > { %1243 = vmatmul.mubr.f32.gmra.mrb[8].mxu0 %v6513_v49 }
  0xb1   : > { %1248 = vmatprep.mubr.f32.mxu0 %v8421_v7 }
  0xb4   : > { %1250 = vmatmul.mubr.f32.gmra.mrb[10].mxu0 %v6534_v60 }
  0xb5   : > { %1255 = vmatprep.mubr.f32.mxu0 %v8421_v7 }
  0xb8   : > { %1257 = vmatmul.mubr.f32.gmra.mrb[12].mxu0 %v6547_v3 }
  0xb9   : > { %1262 = vmatprep.mubr.f32.mxu0 %v8421_v7 }
  0xbc   : > { %1264 = vmatmul.mubr.f32.gmra.mrb[14].mxu0 %v6565_v18 }
  0xbd   : > { %1338 = vmatprep.mubr.f32.mxu0 %v8421_v7 }
  0xc0   : > { %1340 = vmatmul.mubr.f32.vlgmr.msra.gmra.mrb[0].mxu0 %v6488_v34  ;;  %v474_v34 = vld [vmem:[%s8398_s6 + $0xd0] sm:$0xff] }
  0xc1   : > { %1345 = vmatprep.mubr.f32.mxu0 %v8421_v7  ;;  %5935 = vmatpush1.bf16.msra.mxu0 %v6459_v13 }
  0xc2   : > { %5937 = vmatprep.subr.bf16.mxu0 %v6495_v38 }
  0xc4   : > { %1347 = vmatmul.mubr.f32.gmra.mrb[2].mxu0 %v6490_v35  ;;  %v475_v35 = vld [vmem:[%s8398_s6 + $0xd8] sm:$0xff] }
  0xc5   : > { %1352 = vmatprep.mubr.f32.mxu0 %v8421_v7  ;;  %v1493_v38 = vand.u32 4294901760, %v475_v35 }
  0xc7   : > { %v6957_v33 = vsub.f32 %v475_v35, %v1493_v38 }
  0xc8   : > { %1354 = vmatmul.mubr.f32.gmra.mrb[4].mxu0 %v6492_v36  ;;  %v1490_v36 = vand.u32 4294901760, %v474_v34 }
  0xc9   : > { %1359 = vmatprep.mubr.f32.mxu0 %v8421_v7  ;;  %8632 = vst [vmem:[#allocation29_spill] sm:$0xff] %v6957_v33 }
  0xca   : > { %v6891_v52 = vpack.c.bf16 %v1493_v38, %v1490_v36  ;;  %v6974_v38 = vsub.f32 %v477_v0, %v1499_v8 }
  0xcc   : > { %1361 = vmatmul.mubr.f32.gmra.mrb[6].mxu0 %v6500_v40  ;;  %v458_v40 = vld [vmem:[%s8398_s6 + $0x50] sm:$0xff]  ;;  %8620 = vst [vmem:[#allocation19_spill] sm:$0xff] %v6891_v52  ;;  %5761 = vmatprep.subr.bf16.mxu1 %v6891_v52  ;;  %v6954_v52 = vsub.f32 %v474_v34, %v1490_v36  ;;  %8636 = vst [vmem:[#allocation33_spill] sm:$0xff] %v6974_v38 }
  0xcd   : > { %1366 = vmatprep.mubr.f32.mxu0 %v8421_v7 }
  0xce   : > { %8631 = vst [vmem:[#allocation28_spill] sm:$0xff] %v6954_v52 }
  0xd0   : > { %1368 = vmatmul.mubr.f32.gmra.mrb[8].mxu0 %v6513_v49  ;;  %v1442_v49 = vand.u32 4294901760, %v458_v40 }
  0xd1   : > { %1373 = vmatprep.mubr.f32.mxu0 %v8421_v7 }
  0xd2   : > { %v6893_v59 = vpack.c.bf16 %v1445_v51, %v1442_v49  ;;  %v6959_v6 = vsub.f32 %v458_v40, %v1442_v49  ;;  %v6980_v49 = vsub.f32 %v460_v11, %v1448_v22 }
  0xd4   : > { %1375 = vmatmul.mubr.f32.gmra.mrb[10].mxu0 %v6534_v60  ;;  %8621 = vst [vmem:[#allocation20_spill] sm:$0xff] %v6893_v59  ;;  %v476_v60 = vld [vmem:[%s8398_s6 + $0xe0] sm:$0xff]  ;;  %5763 = vmatpush3.bf16.msra.mxu1 %v6893_v59  ;;  %8633 = vst [vmem:[#allocation30_spill] sm:$0xff] %v6959_v6 }
  0xd5   : > { %1380 = vmatprep.mubr.f32.mxu0 %v8421_v7  ;;  %8637 = vst [vmem:[#allocation34_spill] sm:$0xff] %v6980_v49 }
  0xd8   : > { %1382 = vmatmul.mubr.f32.gmra.mrb[12].mxu0 %v6547_v3  ;;  %v1496_v3 = vand.u32 4294901760, %v476_v60 }
  0xd9   : > { %1387 = vmatprep.mubr.f32.mxu0 %v8421_v7 }
  0xda   : > { %v6909_v44 = vpack.c.bf16 %v1499_v8, %v1496_v3  ;;  %v8455_v8 = vand.u32 4294901760, %v6980_v49 }
  0xdc   : > { %1389 = vmatmul.mubr.f32.gmra.mrb[14].mxu0 %v6565_v18  ;;  %v461_v18 = vld [vmem:[%s8398_s6 + $0x68] sm:$0xff]  ;;  %8622 = vst [vmem:[#allocation21_spill] sm:$0xff] %v6909_v44  ;;  %5765 = vmatprep.subr.bf16.mxu1 %v6909_v44 }
  0xdd   : > { %2765 = vmatprep.mubr.f32.mxu0 %v8421_v7  ;;  %v1451_v39 = vand.u32 4294901760, %v461_v18  ;;  %v8625_v7 = vand.u32 4294901760, %v6616_v14 }
  0xdf   : > { %v6919_v17 = vsub.f32 %v6616_v14, %v8625_v7  ;;  %v6921_v53 = vpack.c.bf16 %v1451_v39, %v1448_v22  ;;  %v463_v7 = vld [vmem:[%s8398_s6 + $0x78] sm:$0xff]  ;;  %v8445_v14 = vand.u32 4294901760, %v6914_v47 }
  0xe0   : > { %v1457_v13 = vand.u32 4294901760, %v463_v7 }
  0xe1   : > { %8626 = vst [vmem:[#allocation23_spill] sm:$0xff] %v6919_v17  ;;  %8627 = vst [vmem:[#allocation24_spill] sm:$0xff] %v6921_v53  ;;  %v8450_v1 = vand.u32 4294901760, %v6919_v17  ;;  %5767 = vmatpush3.bf16.msra.mxu1 %v6921_v53  ;;  %v1744_v30 = vsub.f32 %v6914_v47, %v8445_v14  ;;  %v8462_v14 = vand.u32 4294901760, %v6954_v52 }
  0xe2   : > { %v6947_v55 = vpack.c.bf16 %v1457_v13, %v1454_v25  ;;  %5769 = vmatprep.subr.bf16.mxu1 %v6939_v9 }
  0xe3   : > { %v1751_v58 = vsub.f32 %v6919_v17, %v8450_v1  ;;  %v1745_v44 = vand.u32 4294901760, %v1744_v30  ;;  %v1814_v1 = vsub.f32 %v6954_v52, %v8462_v14  ;;  %v6965_v30 = vsub.f32 %v459_v48, %v1445_v51 }
  0xe4   : > { %8629 = vst [vmem:[#allocation26_spill] sm:$0xff] %v6947_v55 }
  0xe5   : > { %v1752_v59 = vand.u32 4294901760, %v1751_v58  ;;  %5771 = vmatpush3.bf16.msra.mxu1 %v6947_v55  ;;  %v8451_v58 = vand.u32 4294901760, %v6957_v33  ;;  %8634 = vst [vmem:[#allocation31_spill] sm:$0xff] %v6965_v30  ;;  %v1815_v34 = vand.u32 4294901760, %v1814_v1  ;;  %v8453_v36 = vand.u32 4294901760, %v6965_v30 }
  0xe7   : > { %v6951_v53 = vpack.c.bf16 %v1752_v59, %v1745_v44  ;;  %v8452_v59 = vand.u32 4294901760, %v6959_v6  ;;  %v6968_v44 = vsub.f32 %v476_v60, %v1496_v3  ;;  %v1821_v35 = vsub.f32 %v6957_v33, %v8451_v58 }
  0xe8   : > { %v1709_v1 = vsub.f32 %v6965_v30, %v8453_v36  ;;  %v8456_v60 = vand.u32 4294901760, %v6974_v38  ;;  %v6986_v3 = vsub.f32 %v461_v18, %v1451_v39  ;;  %v1716_v39 = vsub.f32 %v6980_v49, %v8455_v8 }
  0xe9   : > { %8630 = vst [vmem:[#allocation27_spill] sm:$0xff] %v6951_v53  ;;  %5773 = vmatprep.subr.bf16.mxu1 %v6951_v53  ;;  %8635 = vst [vmem:[#allocation32_spill] sm:$0xff] %v6968_v44  ;;  %v1702_v40 = vsub.f32 %v6959_v6, %v8452_v59  ;;  %v8454_v48 = vand.u32 4294901760, %v6968_v44  ;;  %v1822_v51 = vand.u32 4294901760, %v1821_v35  ;;  %v6992_v59 = vsub.f32 %v478_v21, %v1502_v41 }
  0xea   : > { %8638 = vst [vmem:[#allocation35_spill] sm:$0xff] %v6986_v3  ;;  %v1710_v22 = vand.u32 4294901760, %v1709_v1  ;;  %v1835_v35 = vsub.f32 %v6974_v38, %v8456_v60  ;;  %v8461_v36 = vand.u32 4294901760, %v6986_v3  ;;  %v1717_v1 = vand.u32 4294901760, %v1716_v39 }
  0xeb   : > { %v1703_v58 = vand.u32 4294901760, %v1702_v40  ;;  %v1828_v0 = vsub.f32 %v6968_v44, %v8454_v48  ;;  %8639 = vst [vmem:[#allocation36_spill] sm:$0xff] %v6992_v59  ;;  %v6994_v11 = vpack.c.bf16 %v1822_v51, %v1815_v34  ;;  %v8460_v40 = vand.u32 4294901760, %v6992_v59 }
  0xec   : > { %v7004_v48 = vsub.f32 %v479_v26, %v1505_v12  ;;  %v1836_v41 = vand.u32 4294901760, %v1835_v35  ;;  %v1723_v34 = vsub.f32 %v6986_v3, %v8461_v36  ;;  %v7011_v51 = vsub.f32 %v462_v45, %v1454_v25 }
  0xed   : > { %8640 = vst [vmem:[#allocation37_spill] sm:$0xff] %v6994_v11  ;;  %v1829_v18 = vand.u32 4294901760, %v1828_v0  ;;  %v7006_v21 = vpack.c.bf16 %v1710_v22, %v1703_v58  ;;  %v1842_v0 = vsub.f32 %v6992_v59, %v8460_v40  ;;  %v7017_v60 = vsub.f32 %v463_v7, %v1457_v13 }
  0xee   : > { %8641 = vst [vmem:[#allocation38_spill] sm:$0xff] %v7004_v48  ;;  %8643 = vst [vmem:[#allocation40_spill] sm:$0xff] %v7011_v51  ;;  %v8457_v8 = vand.u32 4294901760, %v7004_v48  ;;  %v1724_v12 = vand.u32 4294901760, %v1723_v34  ;;  %v8459_v58 = vand.u32 4294901760, %v7011_v51  ;;  %v8659_v36 = vand.u32 4294901760, %v6640_v43 }
  0xef   : > { %8642 = vst [vmem:[#allocation39_spill] sm:$0xff] %v7006_v21  ;;  %8644 = vst [vmem:[#allocation41_spill] sm:$0xff] %v7017_v60  ;;  %v7019_v26 = vpack.c.bf16 %v1836_v41, %v1829_v18  ;;  %v1843_v22 = vand.u32 4294901760, %v1842_v0  ;;  %v8458_v45 = vand.u32 4294901760, %v7017_v60  ;;  %v7036_v41 = vpack.c.bf16 %v6919_v17, %v6914_v47 }
  0xf0   : > { %v1849_v25 = vsub.f32 %v7004_v48, %v8457_v8  ;;  %v7026_v35 = vpack.c.bf16 %v1724_v12, %v1717_v1  ;;  %v1730_v39 = vsub.f32 %v7011_v51, %v8459_v58  ;;  %v7044_v1 = vpack.c.bf16 %v6957_v33, %v6954_v52 }
  0xf1   : > { %8645 = vst [vmem:[#allocation42_spill] sm:$0xff] %v7019_v26  ;;  %v1737_v7 = vsub.f32 %v7017_v60, %v8458_v45  ;;  %8647 = vst [vmem:[#allocation44_spill] sm:$0xff] %v7036_v41  ;;  %v7048_v12 = vpack.c.bf16 %v6965_v30, %v6959_v6  ;;  %v8658_v58 = vand.u32 4294901760, %v6635_v42  ;;  %v7084_v14 = vsub.f32 %v6640_v43, %v8659_v36 }
  0xf2   : > { %8646 = vst [vmem:[#allocation43_spill] sm:$0xff] %v7026_v35  ;;  %v1850_v13 = vand.u32 4294901760, %v1849_v25  ;;  %v1731_v18 = vand.u32 4294901760, %v1730_v39  ;;  %8650 = vst [vmem:[#allocation47_spill] sm:$0xff] %v7044_v1  ;;  %v7052_v25 = vpack.c.bf16 %v6974_v38, %v6968_v44  ;;  %v7056_v39 = vpack.c.bf16 %v6986_v3, %v6980_v49  ;;  %v520_v44 = vld [vmem:[%s7143_s15] sm:$0xff] }
  0xf3   : > { %v1738_v0 = vand.u32 4294901760, %v1737_v7  ;;  %8651 = vst [vmem:[#allocation48_spill] sm:$0xff] %v7048_v12  ;;  %v8656_v7 = vand.u32 4294901760, %v6621_v31  ;;  %v7079_v40 = vsub.f32 %v6635_v42, %v8658_v58  ;;  %v8660_v53 = vand.u32 4294901760, %v6648_v54  ;;  %v532_v12 = vld [vmem:[%s7143_s15 + $0x60] sm:$0xff] }
  0xf4   : > { %v7038_v34 = vpack.c.bf16 %v1850_v13, %v1843_v22  ;;  %8652 = vst [vmem:[#allocation49_spill] sm:$0xff] %v7052_v25  ;;  %8653 = vst [vmem:[#allocation50_spill] sm:$0xff] %v7056_v39  ;;  %v7060_v22 = vpack.c.bf16 %v7004_v48, %v6992_v59  ;;  %v7064_v13 = vpack.c.bf16 %v7017_v60, %v7011_v51  ;;  %v8663_v58 = vand.u32 4294901760, %v6671_v2 }
  0xf5   : > { %v7040_v8 = vpack.c.bf16 %v1738_v0, %v1731_v18  ;;  %v7069_v18 = vsub.f32 %v6621_v31, %v8656_v7  ;;  %v8657_v0 = vand.u32 4294901760, %v6629_v37  ;;  %v7089_v31 = vsub.f32 %v6648_v54, %v8660_v53 }
  0xf6   : > { %8648 = vst [vmem:[#allocation45_spill] sm:$0xff] %v7038_v34  ;;  %8654 = vst [vmem:[#allocation51_spill] sm:$0xff] %v7060_v22  ;;  %v8661_v7 = vand.u32 4294901760, %v6653_v56  ;;  %v7104_v43 = vsub.f32 %v6671_v2, %v8663_v58  ;;  %v8664_v54 = vand.u32 4294901760, %v6691_v16  ;;  %v8670_v60 = vand.u32 4294901760, %v7084_v14 }
  0xf7   : > { %8649 = vst [vmem:[#allocation46_spill] sm:$0xff] %v7040_v8  ;;  %8655 = vst [vmem:[#allocation52_spill] sm:$0xff] %v7064_v13  ;;  %v7074_v45 = vsub.f32 %v6629_v37, %v8657_v0  ;;  %v8662_v0 = vand.u32 4294901760, %v6658_v57  ;;  %v8675_v3 = vand.u32 4294901760, %v6708_v23  ;;  %v8679_v47 = vand.u32 4294901760, %v6739_v62 }
  0xf8   : > { %v7094_v37 = vsub.f32 %v6653_v56, %v8661_v7  ;;  %v7111_v56 = vsub.f32 %v6691_v16, %v8664_v54  ;;  %v8665_v7 = vand.u32 4294901760, %v6696_v19  ;;  %v8666_v16 = vand.u32 4294901760, %v7069_v18 }
  0xf9   : > { %v7099_v42 = vsub.f32 %v6658_v57, %v8662_v0  ;;  %v8668_v0 = vand.u32 4294901760, %v6703_v20  ;;  %v8674_v59 = vand.u32 4294901760, %v7104_v43 }
  0xfa   : > { %v7116_v57 = vsub.f32 %v6696_v19, %v8665_v7  ;;  %v1632_v54 = vsub.f32 %v7069_v18, %v8666_v16  ;;  %v8667_v19 = vand.u32 4294901760, %v7074_v45  ;;  %v8669_v16 = vand.u32 4294901760, %v7079_v40 }
  0xfb   : > { %v7134_v2 = vsub.f32 %v6703_v20, %v8668_v0  ;;  %v1765_v20 = vsub.f32 %v7084_v14, %v8670_v60  ;;  %v8671_v0 = vand.u32 4294901760, %v7089_v31  ;;  %v8672_v36 = vand.u32 4294901760, %v7094_v37 }
  0xfc   : > { %v1639_v7 = vsub.f32 %v7074_v45, %v8667_v19  ;;  %v1758_v19 = vsub.f32 %v7079_v40, %v8669_v16  ;;  %v8673_v51 = vand.u32 4294901760, %v7099_v42  ;;  %v1779_v16 = vsub.f32 %v7104_v43, %v8674_v59 }
  0xfd   : > { %v1646_v58 = vsub.f32 %v7089_v31, %v8671_v0  ;;  %v1653_v53 = vsub.f32 %v7094_v37, %v8672_v36  ;;  %v7166_v60 = vsub.f32 %v6708_v23, %v8675_v3  ;;  %v1633_v49 = vand.u32 4294901760, %v1632_v54  ;;  %v521_v23 = vld [vmem:[%s7143_s15 + $0x8] sm:$0xff] }
  0xfe   : > { %v1772_v48 = vsub.f32 %v7099_v42, %v8673_v51  ;;  %v1640_v38 = vand.u32 4294901760, %v1639_v7  ;;  %v8676_v36 = vand.u32 4294901760, %v7111_v56  ;;  %v8677_v51 = vand.u32 4294901760, %v7116_v57 }
  0xff   : > { %v8678_v59 = vand.u32 4294901760, %v6734_v63  ;;  %v1759_v3 = vand.u32 4294901760, %v1758_v19  ;;  %v1766_v54 = vand.u32 4294901760, %v1765_v20  ;;  %v1647_v7 = vand.u32 4294901760, %v1646_v58  ;;  %v522_v20 = vld [vmem:[%s7143_s15 + $0x10] sm:$0xff] }
 0x100   : > { %v1660_v30 = vsub.f32 %v7111_v56, %v8676_v36  ;;  %v1667_v6 = vsub.f32 %v7116_v57, %v8677_v51  ;;  %v1654_v0 = vand.u32 4294901760, %v1653_v53  ;;  %v1773_v55 = vand.u32 4294901760, %v1772_v48 }
 0x101   : > { %v7179_v33 = vsub.f32 %v6734_v63, %v8678_v59  ;;  %v1780_v17 = vand.u32 4294901760, %v1779_v16  ;;  %v7186_v51 = vsub.f32 %v6739_v62, %v8679_v47  ;;  %v7188_v59 = vpack.c.bf16 %v1640_v38, %v1633_v49 }
 0x102   : > { %v8681_v19 = vand.u32 4294901760, %v7134_v2  ;;  %v1661_v48 = vand.u32 4294901760, %v1660_v30  ;;  %v1668_v16 = vand.u32 4294901760, %v1667_v6  ;;  %v7200_v62 = vpack.c.bf16 %v1766_v54, %v1759_v3 }
 0x103   : > { %8680 = vst [vmem:[#allocation53_spill] sm:$0xff] %v7188_v59  ;;  %v8486_v36 = vand.u32 4294901760, %v7179_v33  ;;  %v8684_v47 = vand.u32 4294901760, %v6745_v15  ;;  %v7211_v6 = vpack.c.bf16 %v1780_v17, %v1773_v55  ;;  %v8686_v49 = vand.u32 4294901760, %v7166_v60 }
 0x104   : > { %v7193_v58 = vsub.f32 %v7134_v2, %v8681_v19  ;;  %8682 = vst [vmem:[#allocation54_spill] sm:$0xff] %v7200_v62  ;;  %v8495_v3 = vand.u32 4294901760, %v7186_v51 }
 0x105   : > { %8685 = vst [vmem:[#allocation56_spill] sm:$0xff] %v7211_v6 }
 0x193   : > { %v1341_v52 = vpop.f32.mrb[0].mxu0 }
 0x194   : > { %v1395_v9 = vmul.f32 %v1341_v52, %v520_v44  ;;  %v1343_v63 = vpop.f32.mrb[1].mxu0  ;;  %v7202_v52 = vpack.c.bf16 %v1654_v0, %v1647_v7  ;;  %v7207_v44 = vsub.f32 %v6745_v15, %v8684_v47  ;;  %v1787_v15 = vand.u32 4294901760, %v7193_v58  ;;  %v524_v47 = vld [vmem:[%s7143_s15 + $0x20] sm:$0xff]  ;;  %v525_v58 = vld [vmem:[%s7143_s15 + $0x28] sm:$0xff] }
 0x195   : > { %v1396_v53 = vmul.f32 %v1343_v63, %v521_v23  ;;  %v1793_v23 = vsub.f32 %v7166_v60, %v8686_v49  ;;  %v8688_v63 = vand.u32 4294901760, %v6750_v10  ;;  %v7230_v49 = vpack.c.bf16 %v1668_v16, %v1661_v48 }
 0x196   : > { %v7197_v50 = vand.u32 4294901760, %v1395_v9  ;;  %8683 = vst [vmem:[#allocation55_spill] sm:$0xff] %v7202_v52 }
 0x197   : > { %v7209_v38 = vand.u32 4294901760, %v1396_v53  ;;  %v1348_v30 = vpop.f32.mrb[2].mxu0  ;;  %v7224_v19 = vsub.f32 %v6750_v10, %v8688_v63  ;;  %8690 = vst [vmem:[#allocation59_spill] sm:$0xff] %v7230_v49  ;;  %v1794_v63 = vand.u32 4294901760, %v1793_v23 }
 0x198   : > { %v7218_v0 = vsub.f32 %v1395_v9, %v7197_v50  ;;  %v1397_v54 = vmul.f32 %v1348_v30, %v522_v20  ;;  %v1350_v7 = vpop.f32.mrb[3].mxu0  ;;  %v7235_v9 = vsub.f32 %v7179_v33, %v8486_v36  ;;  %v7253_v36 = vsub.f32 %v7186_v51, %v8495_v3 }
 0x199   : > { %v7227_v55 = vsub.f32 %v1396_v53, %v7209_v38  ;;  %v1398_v17 = vmul.f32 %v1350_v7, %v523_v32  ;;  %v8691_v53 = vand.u32 4294901760, %v6774_v28  ;;  %v526_v7 = vld [vmem:[%s7143_s15 + $0x30] sm:$0xff]  ;;  %v7301_v25 = vpack.c.bf16 %v1794_v63, %v1787_v15 }
 0x19a   : > { %8687 = vst [vmem:[#allocation57_spill] sm:$0xff] %v7218_v0  ;;  %v7237_v20 = vand.u32 4294901760, %v1397_v54  ;;  %v530_v63 = vld [vmem:[%s7143_s15 + $0x50] sm:$0xff] }
 0x19b   : > { %8689 = vst [vmem:[#allocation58_spill] sm:$0xff] %v7227_v55  ;;  %v7245_v32 = vsub.f32 %v6774_v28, %v8691_v53  ;;  %v7247_v48 = vand.u32 4294901760, %v1398_v17  ;;  %v1355_v16 = vpop.f32.mrb[4].mxu0  ;;  %v8693_v28 = vand.u32 4294901760, %v7218_v0  ;;  %v8695_v5 = vand.u32 4294901760, %v7227_v55  ;;  %8701 = vst [vmem:[#allocation64_spill] sm:$0xff] %v7301_v25 }
 0x19c   : > { %v7256_v30 = vsub.f32 %v1397_v54, %v7237_v20  ;;  %v1399_v10 = vmul.f32 %v1355_v16, %v524_v47  ;;  %v1357_v46 = vpop.f32.mrb[5].mxu0  ;;  %v8696_v54 = vand.u32 4294901760, %v6779_v27 }
 0x19d   : > { %v1516_v53 = vsub.f32 %v7218_v0, %v8693_v28  ;;  %v7263_v24 = vsub.f32 %v1398_v17, %v7247_v48  ;;  %v1400_v23 = vmul.f32 %v1357_v46, %v525_v58  ;;  %v1510_v3 = vsub.f32 %v7227_v55, %v8695_v5 }
 0x19e   : > { %8692 = vst [vmem:[#allocation60_spill] sm:$0xff] %v7256_v30  ;;  %v7272_v47 = vsub.f32 %v6779_v27, %v8696_v54  ;;  %v7274_v16 = vand.u32 4294901760, %v1399_v10  ;;  %v8697_v46 = vand.u32 4294901760, %v7207_v44  ;;  %v8699_v13 = vand.u32 4294901760, %v7256_v30 }
 0x19f   : > { %8694 = vst [vmem:[#allocation61_spill] sm:$0xff] %v7263_v24  ;;  %v7284_v29 = vand.u32 4294901760, %v1400_v23  ;;  %v1362_v5 = vpop.f32.mrb[6].mxu0  ;;  %v1511_v0 = vand.u32 4294901760, %v1510_v3  ;;  %v8508_v27 = vand.u32 4294901760, %v7263_v24  ;;  %v1517_v17 = vand.u32 4294901760, %v1516_v53 }
 0x1a0   : > { %v7282_v58 = vsub.f32 %v7207_v44, %v8697_v46  ;;  %v7289_v61 = vsub.f32 %v1399_v10, %v7274_v16  ;;  %v1401_v28 = vmul.f32 %v1362_v5, %v526_v7  ;;  %v1364_v55 = vpop.f32.mrb[7].mxu0  ;;  %v1531_v46 = vsub.f32 %v7256_v30, %v8699_v13  ;;  %v528_v3 = vld [vmem:[%s7143_s15 + $0x40] sm:$0xff]  ;;  %v529_v7 = vld [vmem:[%s7143_s15 + $0x48] sm:$0xff] }
 0x1a1   : > { %v7295_v22 = vsub.f32 %v1400_v23, %v7284_v29  ;;  %v1402_v39 = vmul.f32 %v1364_v55, %v527_v4  ;;  %1512 = vmatprep.mubr.f32.mxu1 %v1511_v0  ;;  %v1525_v54 = vsub.f32 %v7263_v24, %v8508_v27  ;;  %v1682_v13 = vand.u32 4294901760, %v7253_v36 }
 0x1a2   : > { %8698 = vst [vmem:[#allocation62_spill] sm:$0xff] %v7289_v61  ;;  %v7303_v10 = vand.u32 4294901760, %v1401_v28  ;;  %1518 = vmatmul.mubr.f32.vlgmr.msra.gmra.mrb[0].mxu1 %v1517_v17  ;;  %v8515_v53 = vand.u32 4294901760, %v7289_v61  ;;  %v8702_v23 = vand.u32 4294901760, %v7224_v19 }
 0x1a3   : > { %8700 = vst [vmem:[#allocation63_spill] sm:$0xff] %v7295_v22  ;;  %v7311_v0 = vand.u32 4294901760, %v1402_v39  ;;  %5775 = vmatpush3.bf16.msra.mxu1 %v7188_v59  ;;  %v1369_v55 = vpop.f32.mrb[8].mxu0  ;;  %v1526_v15 = vand.u32 4294901760, %v1525_v54  ;;  %v8703_v17 = vand.u32 4294901760, %v7295_v22 }
 0x1a4   : > { %v1807_v4 = vsub.f32 %v7224_v19, %v8702_v23  ;;  %v7317_v5 = vsub.f32 %v1401_v28, %v7303_v10  ;;  %v1403_v36 = vmul.f32 %v1369_v55, %v528_v3  ;;  %v1371_v27 = vpop.f32.mrb[9].mxu0  ;;  %5777 = vmatprep.subr.bf16.mxu1 %v7200_v62  ;;  %v1532_v23 = vand.u32 4294901760, %v1531_v46  ;;  %v531_v46 = vld [vmem:[%s7143_s15 + $0x58] sm:$0xff] }
 0x1a5   : > { %v1546_v30 = vsub.f32 %v7289_v61, %v8515_v53  ;;  %v7324_v59 = vsub.f32 %v1402_v39, %v7311_v0  ;;  %v1404_v54 = vmul.f32 %v1371_v27, %v529_v7  ;;  %1527 = vmatprep.mubr.f32.mxu1 %v1526_v15  ;;  %v1540_v28 = vsub.f32 %v7295_v22, %v8703_v17 }
 0x1a6   : > { %v1801_v3 = vand.u32 4294901760, %v7282_v58  ;;  %v7331_v55 = vand.u32 4294901760, %v1403_v36  ;;  %1533 = vmatmul.mubr.f32.gmra.mrb[2].mxu1 %v1532_v23  ;;  %v1808_v24 = vand.u32 4294901760, %v1807_v4  ;;  %v8704_v53 = vand.u32 4294901760, %v7245_v32 }
 0x1a7   : > { %v7338_v27 = vand.u32 4294901760, %v1404_v54  ;;  %5779 = vmatpush3.bf16.msra.mxu1 %v7202_v52  ;;  %v1376_v7 = vpop.f32.mrb[10].mxu0  ;;  %v1541_v15 = vand.u32 4294901760, %v1540_v28  ;;  %v8705_v17 = vand.u32 4294901760, %v7272_v47  ;;  %v8707_v22 = vand.u32 4294901760, %v7317_v5 }
 0x1a8   : > { %v1688_v39 = vsub.f32 %v7245_v32, %v8704_v53  ;;  %v7346_v4 = vsub.f32 %v1403_v36, %v7331_v55  ;;  %v1405_v62 = vmul.f32 %v1376_v7, %v530_v63  ;;  %v1378_v61 = vpop.f32.mrb[11].mxu0  ;;  %5781 = vmatprep.subr.bf16.mxu1 %v7211_v6  ;;  %v1547_v53 = vand.u32 4294901760, %v1546_v30  ;;  %v533_v30 = vld [vmem:[%s7143_s15 + $0x68] sm:$0xff] }
 0x1a9   : > { %v1695_v23 = vsub.f32 %v7272_v47, %v8705_v17  ;;  %v1561_v52 = vsub.f32 %v7317_v5, %v8707_v22  ;;  %v7353_v28 = vsub.f32 %v1404_v54, %v7338_v27  ;;  %v1406_v58 = vmul.f32 %v1378_v61, %v531_v46  ;;  %1542 = vmatprep.mubr.f32.mxu1 %v1541_v15 }
 0x1aa   : > { %8706 = vst [vmem:[#allocation65_spill] sm:$0xff] %v7346_v4  ;;  %v8708_v17 = vand.u32 4294901760, %v7324_v59  ;;  %v8709_v63 = vand.u32 4294901760, %v7235_v9  ;;  %v7363_v6 = vand.u32 4294901760, %v1405_v62  ;;  %1548 = vmatmul.mubr.f32.gmra.mrb[4].mxu1 %v1547_v53  ;;  %v7366_v1 = vpack.c.bf16 %v1808_v24, %v1801_v3 }
 0x1ab   : > { %v8525_v22 = vand.u32 4294901760, %v7346_v4  ;;  %v1689_v54 = vand.u32 4294901760, %v1688_v39  ;;  %v7369_v61 = vand.u32 4294901760, %v1406_v58  ;;  %5783 = vmatpush3.bf16.msra.mxu1 %v7230_v49  ;;  %v1383_v46 = vpop.f32.mrb[12].mxu0  ;;  %v8527_v9 = vand.u32 4294901760, %v7353_v28  ;;  %v534_v49 = vld [vmem:[%s7143_s15 + $0x70] sm:$0xff] }
 0x1ac   : > { %v1555_v36 = vsub.f32 %v7324_v59, %v8708_v17  ;;  %v7361_v7 = vpack.c.bf16 %v1682_v13, %v8709_v63  ;;  %8711 = vst [vmem:[#allocation67_spill] sm:$0xff] %v7363_v6  ;;  %8712 = vst [vmem:[#allocation68_spill] sm:$0xff] %v7366_v1  ;;  %v1696_v13 = vand.u32 4294901760, %v1695_v23  ;;  %v7374_v17 = vsub.f32 %v1405_v62, %v7363_v6  ;;  %v1385_v24 = vpop.f32.mrb[13].mxu0 }
 0x1ad   : > { %8713 = vst [vmem:[#allocation69_spill] sm:$0xff] %v7369_v61  ;;  %v1407_v53 = vmul.f32 %v1383_v46, %v532_v12  ;;  %5785 = vmatprep.subr.bf16.mxu1 %v7301_v25  ;;  %v1562_v3 = vand.u32 4294901760, %v1561_v52  ;;  %v1576_v39 = vsub.f32 %v7346_v4, %v8525_v22  ;;  %v7381_v63 = vsub.f32 %v1406_v58, %v7369_v61  ;;  %v535_v12 = vld [vmem:[%s7143_s15 + $0x78] sm:$0xff] }
 0x1ae   : > { %8710 = vst [vmem:[#allocation66_spill] sm:$0xff] %v7361_v7  ;;  %v1556_v15 = vand.u32 4294901760, %v1555_v36  ;;  %v1408_v36 = vmul.f32 %v1385_v24, %v533_v30  ;;  %v1570_v62 = vsub.f32 %v7353_v28, %v8527_v9  ;;  %v8531_v52 = vand.u32 4294901760, %v7374_v17 }
 0x1af   : > { %v7387_v23 = vand.u32 4294901760, %v1407_v53  ;;  %5787 = vmatpush3.bf16.msra.mxu1 %v7361_v7  ;;  %v1390_v22 = vpop.f32.mrb[14].mxu0  ;;  %v7394_v25 = vpack.c.bf16 %v1696_v13, %v1689_v54  ;;  %v8536_v30 = vand.u32 4294901760, %v7381_v63 }
 0x1b0   : > { %1557 = vmatprep.mubr.f32.mxu1 %v1556_v15  ;;  %v7391_v46 = vand.u32 4294901760, %v1408_v36  ;;  %v1571_v58 = vand.u32 4294901760, %v1570_v62  ;;  %v1409_v24 = vmul.f32 %v1390_v22, %v534_v49  ;;  %v1392_v9 = vpop.f32.mrb[15].mxu0  ;;  %5789 = vmatprep.subr.bf16.mxu1 %v7366_v1  ;;  %v1591_v4 = vsub.f32 %v7374_v17, %v8531_v52  ;;  %v8754_v1 = vld [vmem:[#allocation24_spill] sm:$0xff] }
 0x1b1   : > { %8714 = vst [vmem:[#allocation70_spill] sm:$0xff] %v7387_v23  ;;  %1563 = vmatmul.mubr.f32.gmra.mrb[6].mxu1 %v1562_v3  ;;  %8716 = vst [vmem:[#allocation72_spill] sm:$0xff] %v7394_v25  ;;  %v7398_v15 = vsub.f32 %v1407_v53, %v7387_v23  ;;  %v1577_v3 = vand.u32 4294901760, %v1576_v39  ;;  %v1410_v62 = vmul.f32 %v1392_v9, %v535_v12 }
 0x1b2   : > { %8715 = vst [vmem:[#allocation71_spill] sm:$0xff] %v7391_v46  ;;  %v7405_v7 = vsub.f32 %v1408_v36, %v7391_v46  ;;  %1572 = vmatprep.mubr.f32.mxu1 %v1571_v58  ;;  %v1585_v54 = vsub.f32 %v7381_v63, %v8536_v30  ;;  %v7410_v13 = vand.u32 4294901760, %v1409_v24  ;;  %v1592_v9 = vand.u32 4294901760, %v1591_v4  ;;  %v8730_v30 = vld [vmem:[#allocation49_spill] sm:$0xff] }
 0x1b3   : > { %v8534_v49 = vand.u32 4294901760, %v7398_v15  ;;  %v7413_v22 = vand.u32 4294901760, %v1410_v62  ;;  %5791 = vmatpush3.bf16.msra.mxu1 %v7394_v25  ;;  %v8753_v25 = vld [vmem:[#allocation21_spill] sm:$0xff] }
 0x1b4   : > { %8717 = vst [vmem:[#allocation73_spill] sm:$0xff] %v7410_v13  ;;  %v1586_v53 = vand.u32 4294901760, %v1585_v54  ;;  %v8535_v39 = vand.u32 4294901760, %v7405_v7  ;;  %v7418_v36 = vsub.f32 %v1409_v24, %v7410_v13  ;;  %5793 = vmatprep.subr.bf16.mxu1 %v6994_v11  ;;  %v8752_v11 = vld [vmem:[#allocation20_spill] sm:$0xff] }
 0x1b5   : > { %1578 = vmatmul.mubr.f32.gmra.mrb[8].mxu1 %v1577_v3  ;;  %8718 = vst [vmem:[#allocation74_spill] sm:$0xff] %v7413_v22  ;;  %v1606_v12 = vsub.f32 %v7398_v15, %v8534_v49  ;;  %v7425_v58 = vsub.f32 %v1410_v62, %v7413_v22  ;;  %v8728_v49 = vld [vmem:[#allocation47_spill] sm:$0xff] }
 0x1b6   : > { %1587 = vmatprep.mubr.f32.mxu1 %v1586_v53  ;;  %v1600_v3 = vsub.f32 %v7405_v7, %v8535_v39  ;;  %v8532_v54 = vand.u32 4294901760, %v7418_v36  ;;  %v8729_v39 = vld [vmem:[#allocation48_spill] sm:$0xff] }
 0x1b7   : > { %5795 = vmatpush3.bf16.msra.mxu1 %v7006_v21  ;;  %v8533_v4 = vand.u32 4294901760, %v7425_v58  ;;  %v1607_v52 = vand.u32 4294901760, %v1606_v12  ;;  %v7446_v12 = vpack.c.bf16 %v7074_v45, %v7069_v18  ;;  %v8751_v21 = vld [vmem:[#allocation19_spill] sm:$0xff] }
 0x1b8   : > { %v1601_v24 = vand.u32 4294901760, %v1600_v3  ;;  %5797 = vmatprep.subr.bf16.mxu1 %v7019_v26  ;;  %v1621_v62 = vsub.f32 %v7418_v36, %v8532_v54  ;;  %v7487_v54 = vpack.c.bf16 %v7224_v19, %v7207_v44  ;;  %v8750_v26 = vld [vmem:[#allocation18_spill] sm:$0xff] }
 0x1b9   : > { %1593 = vmatmul.mubr.f32.gmra.mrb[10].mxu1 %v1592_v9  ;;  %v1615_v53 = vsub.f32 %v7425_v58, %v8533_v4  ;;  %8719 = vst [vmem:[#allocation75_spill] sm:$0xff] %v7446_v12  ;;  %v7494_v4 = vpack.c.bf16 %v7272_v47, %v7245_v32 }
 0x1ba   : > { %1602 = vmatprep.mubr.f32.mxu1 %v1601_v24  ;;  %v1622_v3 = vand.u32 4294901760, %v1621_v62  ;;  %v7458_v24 = vpack.c.bf16 %v7094_v37, %v7089_v31  ;;  %v7463_v62 = vpack.c.bf16 %v7104_v43, %v7099_v42  ;;  %8726 = vst [vmem:[#allocation82_spill] sm:$0xff] %v7487_v54 }
 0x1bb   : > { %5799 = vmatpush3.bf16.msra.mxu1 %v7026_v35  ;;  %v1616_v9 = vand.u32 4294901760, %v1615_v53  ;;  %v7470_v53 = vpack.c.bf16 %v7116_v57, %v7111_v56  ;;  %8727 = vst [vmem:[#allocation83_spill] sm:$0xff] %v7494_v4  ;;  %v8749_v35 = vld [vmem:[#allocation65_spill] sm:$0xff] }
 0x1bc   : > { %5801 = vmatprep.subr.bf16.mxu1 %v7038_v34  ;;  %8721 = vst [vmem:[#allocation77_spill] sm:$0xff] %v7458_v24  ;;  %8722 = vst [vmem:[#allocation78_spill] sm:$0xff] %v7463_v62  ;;  %v8748_v34 = vld [vmem:[#allocation17_spill] sm:$0xff] }
 0x1bd   : > { %1608 = vmatmul.mubr.f32.gmra.mrb[12].mxu1 %v1607_v52  ;;  %v7451_v52 = vpack.c.bf16 %v7084_v14, %v7079_v40  ;;  %8723 = vst [vmem:[#allocation79_spill] sm:$0xff] %v7470_v53 }
 0x1be   : > { %1617 = vmatprep.mubr.f32.mxu1 %v1616_v9  ;;  %v7475_v9 = vpack.c.bf16 %v7166_v60, %v7134_v2 }
 0x1bf   : > { %5803 = vmatpush3.bf16.msra.mxu1 %v7040_v8  ;;  %8720 = vst [vmem:[#allocation76_spill] sm:$0xff] %v7451_v52  ;;  %v8747_v8 = vld [vmem:[#allocation16_spill] sm:$0xff] }
 0x1c0   : > { %5805 = vmatprep.subr.bf16.mxu1 %v7036_v41  ;;  %8724 = vst [vmem:[#allocation80_spill] sm:$0xff] %v7475_v9  ;;  %v8746_v41 = vld [vmem:[#allocation15_spill] sm:$0xff] }
 0x1c1   : > { %1623 = vmatmul.mubr.f32.gmra.mrb[14].mxu1 %v1622_v3  ;;  %v7482_v3 = vpack.c.bf16 %v7186_v51, %v7179_v33 }
 0x1c2   : > { %1853 = vmatprep.mubr.f32.mxu1 %v7209_v38 }
 0x1c3   : > { %8725 = vst [vmem:[#allocation81_spill] sm:$0xff] %v7482_v3 }
 0x1c5   : > { %1855 = vmatmul.mubr.f32.vlgmr.msra.gmra.mrb[16].mxu1 %v7197_v50 }
 0x1c6   : > { %5807 = vmatpush3.bf16.msra.mxu1 %v7446_v12  ;;  %1860 = vmatprep.mubr.f32.mxu1 %v7247_v48  ;;  %v8745_v12 = vld [vmem:[#allocation14_spill] sm:$0xff] }
 0x1c7   : > { %5809 = vmatprep.subr.bf16.mxu1 %v7451_v52  ;;  %v8743_v52 = vld [vmem:[#allocation13_spill] sm:$0xff] }
 0x1c9   : > { %1862 = vmatmul.mubr.f32.gmra.mrb[18].mxu1 %v7237_v20 }
 0x1ca   : > { %5811 = vmatpush3.bf16.msra.mxu1 %v7458_v24  ;;  %1867 = vmatprep.mubr.f32.mxu1 %v7284_v29  ;;  %v8741_v24 = vld [vmem:[#allocation12_spill] sm:$0xff] }
 0x1cb   : > { %5813 = vmatprep.subr.bf16.mxu1 %v7463_v62  ;;  %v8739_v62 = vld [vmem:[#allocation11_spill] sm:$0xff] }
 0x1cd   : > { %1869 = vmatmul.mubr.f32.gmra.mrb[20].mxu1 %v7274_v16 }
 0x1ce   : > { %5815 = vmatpush3.bf16.msra.mxu1 %v7470_v53  ;;  %1874 = vmatprep.mubr.f32.mxu1 %v7311_v0  ;;  %v8737_v53 = vld [vmem:[#allocation10_spill] sm:$0xff] }
 0x1cf   : > { %5817 = vmatprep.subr.bf16.mxu1 %v7475_v9  ;;  %v8735_v9 = vld [vmem:[#allocation9_spill] sm:$0xff] }
 0x1d1   : > { %1876 = vmatmul.mubr.f32.gmra.mrb[22].mxu1 %v7303_v10 }
 0x1d2   : > { %5819 = vmatpush3.bf16.msra.mxu1 %v7482_v3  ;;  %1881 = vmatprep.mubr.f32.mxu1 %v7338_v27  ;;  %v8731_v3 = vld [vmem:[#allocation50_spill] sm:$0xff] }
 0x1d3   : > { %5821 = vmatprep.subr.bf16.mxu1 %v7487_v54  ;;  %v8732_v54 = vld [vmem:[#allocation51_spill] sm:$0xff] }
 0x1d5   : > { %1883 = vmatmul.mubr.f32.gmra.mrb[24].mxu1 %v7331_v55 }
 0x1d6   : > { %5823 = vmatpush3.bf16.msra.mxu1 %v7494_v4  ;;  %1888 = vmatprep.mubr.f32.mxu1 %v7369_v61  ;;  %v8733_v4 = vld [vmem:[#allocation52_spill] sm:$0xff]  ;;  %v8762_v61 = vand.u32 4294901760, %v7069_v18 }
 0x1d7   : > { %5825 = vmatprep.subr.bf16.mxu1 %v8728_v49  ;;  %v8734_v49 = vld [vmem:[#allocation58_spill] sm:$0xff] }
 0x1d9   : > { %1890 = vmatmul.mubr.f32.gmra.mrb[26].mxu1 %v7363_v6 }
 0x1da   : > { %5827 = vmatpush3.bf16.msra.mxu1 %v8729_v39  ;;  %1895 = vmatprep.mubr.f32.mxu1 %v7391_v46  ;;  %v8736_v39 = vld [vmem:[#allocation57_spill] sm:$0xff]  ;;  %v8758_v46 = vld [vmem:[#allocation23_spill] sm:$0xff] }
 0x1db   : > { %5829 = vmatprep.subr.bf16.mxu1 %v8730_v30  ;;  %v8738_v30 = vld [vmem:[#allocation61_spill] sm:$0xff]  ;;  %v8759_v6 = vand.u32 4294901760, %v8758_v46  ;;  %v8766_v46 = vand.u32 4294901760, %v8736_v39 }
 0x1dd   : > { %1897 = vmatmul.mubr.f32.gmra.mrb[28].mxu1 %v7387_v23 }
 0x1de   : > { %5831 = vmatpush3.bf16.msra.mxu1 %v8731_v3  ;;  %1902 = vmatprep.mubr.f32.mxu1 %v7413_v22  ;;  %v8740_v3 = vld [vmem:[#allocation60_spill] sm:$0xff]  ;;  %v8756_v22 = vld [vmem:[#allocation22_spill] sm:$0xff] }
 0x1df   : > { %5833 = vmatprep.subr.bf16.mxu1 %v8732_v54  ;;  %v8742_v54 = vld [vmem:[#allocation63_spill] sm:$0xff]  ;;  %v8757_v23 = vand.u32 4294901760, %v8756_v22  ;;  %v8764_v22 = vand.u32 4294901760, %v7079_v40  ;;  %v8772_v40 = vand.u32 4294901760, %v7104_v43  ;;  %v8780_v43 = vand.u32 4294901760, %v7166_v60 }
 0x1e0   : > { %v8788_v60 = vand.u32 4294901760, %v7224_v19 }
 0x1e1   : > { %1904 = vmatmul.mubr.f32.gmra.mrb[30].mxu1 %v7410_v13  ;;  %v8755_v13 = vld [vmem:[#allocation25_spill] sm:$0xff] }
 0x1e2   : > { %5835 = vmatpush3.bf16.msra.mxu1 %v8733_v4  ;;  %2039 = vmatprep.mubr.f32.mxu1 %v8734_v49  ;;  %v8744_v4 = vld [vmem:[#allocation62_spill] sm:$0xff] }
 0x1e3   : > { %5837 = vmatprep.subr.bf16.mxu1 %v8735_v9 }
 0x1e5   : > { %2042 = vmatmul.mubr.f32.vlgmr.msra.gmra.mrb[32].mxu1 %v8736_v39 }
 0x1e6   : > { %5839 = vmatpush3.bf16.msra.mxu1 %v8737_v53  ;;  %2048 = vmatprep.mubr.f32.mxu1 %v8738_v30 }
 0x1e7   : > { %5841 = vmatprep.subr.bf16.mxu1 %v8739_v62 }
 0x1e9   : > { %2051 = vmatmul.mubr.f32.gmra.mrb[34].mxu1 %v8740_v3 }
 0x1ea   : > { %5843 = vmatpush3.bf16.msra.mxu1 %v8741_v24  ;;  %2057 = vmatprep.mubr.f32.mxu1 %v8742_v54 }
 0x1eb   : > { %5845 = vmatprep.subr.bf16.mxu1 %v8743_v52 }
 0x1ed   : > { %2060 = vmatmul.mubr.f32.gmra.mrb[36].mxu1 %v8744_v4 }
 0x1ee   : > { %5847 = vmatpush3.bf16.msra.mxu1 %v8745_v12  ;;  %2066 = vmatprep.mubr.f32.mxu1 %v7324_v59 }
 0x1ef   : > { %5849 = vmatprep.subr.bf16.mxu1 %v8746_v41 }
 0x1f1   : > { %2069 = vmatmul.mubr.f32.gmra.mrb[38].mxu1 %v7317_v5 }
 0x1f2   : > { %5851 = vmatpush3.bf16.msra.mxu1 %v8747_v8  ;;  %2075 = vmatprep.mubr.f32.mxu1 %v7353_v28 }
 0x1f3   : > { %5853 = vmatprep.subr.bf16.mxu1 %v8748_v34 }
 0x1f5   : > { %2078 = vmatmul.mubr.f32.gmra.mrb[40].mxu1 %v8749_v35 }
 0x1f6   : > { %5855 = vmatpush3.bf16.msra.mxu1 %v8750_v26  ;;  %2084 = vmatprep.mubr.f32.mxu1 %v7381_v63 }
 0x1f7   : > { %5857 = vmatprep.subr.bf16.mxu1 %v8751_v21  ;;  %v7545_v21 = vpack.c.bf16 %v8759_v6, %v8757_v23  ;;  %v8765_v6 = vand.u32 4294901760, %v7084_v14  ;;  %v8771_v14 = vand.u32 4294901760, %v7099_v42  ;;  %v8779_v42 = vand.u32 4294901760, %v7134_v2 }
 0x1f8   : > { %v8787_v2 = vand.u32 4294901760, %v7207_v44  ;;  %v8795_v44 = vld [vmem:[#allocation28_spill] sm:$0xff] }
 0x1f9   : > { %2087 = vmatmul.mubr.f32.gmra.mrb[42].mxu1 %v7374_v17  ;;  %v7562_v23 = vpack.c.bf16 %v8765_v6, %v8764_v22  ;;  %v7598_v22 = vpack.c.bf16 %v8780_v43, %v8779_v42  ;;  %v8796_v19 = vand.u32 4294901760, %v8795_v44  ;;  %v8809_v42 = vld [vmem:[#allocation33_spill] sm:$0xff] }
 0x1fa   : > { %5859 = vmatpush3.bf16.msra.mxu1 %v8752_v11  ;;  %2093 = vmatprep.mubr.f32.mxu1 %v7405_v7  ;;  %v8760_v11 = vld [vmem:[#allocation26_spill] sm:$0xff]  ;;  %v8810_v43 = vand.u32 4294901760, %v8809_v42  ;;  %v8840_v42 = vld [vmem:[#allocation24_spill] sm:$0xff] }
 0x1fb   : > { %5861 = vmatprep.subr.bf16.mxu1 %v8753_v25  ;;  %v8761_v25 = vand.u32 4294901760, %v8734_v49  ;;  %v8774_v49 = vand.u32 4294901760, %v8740_v3  ;;  %8781 = vst [vmem:[#allocation10_spill] sm:$0xff] %v7598_v22  ;;  %v8782_v3 = vand.u32 4294901760, %v8744_v4  ;;  %v8790_v4 = vand.u32 4294901760, %v7317_v5 }
 0x1fc   : > { %v8800_v5 = vand.u32 4294901760, %v8749_v35  ;;  %v8812_v35 = vand.u32 4294901760, %v7374_v17  ;;  %v8824_v17 = vand.u32 4294901760, %v7398_v15 }
 0x1fd   : > { %2096 = vmatmul.mubr.f32.gmra.mrb[44].mxu1 %v7398_v15  ;;  %v8832_v15 = vld [vmem:[#allocation18_spill] sm:$0xff] }
 0x1fe   : > { %5863 = vmatpush3.bf16.msra.mxu1 %v8754_v1  ;;  %2102 = vmatprep.mubr.f32.mxu1 %v7425_v58  ;;  %v8763_v1 = vand.u32 4294901760, %v7074_v45  ;;  %v8768_v45 = vand.u32 4294901760, %v7089_v31  ;;  %v8776_v31 = vand.u32 4294901760, %v7111_v56  ;;  %v8784_v56 = vand.u32 4294901760, %v7179_v33 }
 0x1ff   : > { %5865 = vmatprep.subr.bf16.mxu1 %v8755_v13  ;;  %v8792_v33 = vand.u32 4294901760, %v7245_v32  ;;  %v8802_v32 = vld [vmem:[#allocation30_spill] sm:$0xff] }
 0x200   : > { %v7555_v26 = vpack.c.bf16 %v8763_v1, %v8762_v61  ;;  %v8769_v1 = vand.u32 4294901760, %v7094_v37  ;;  %v7580_v61 = vpack.c.bf16 %v8772_v40, %v8771_v14  ;;  %v8777_v37 = vand.u32 4294901760, %v7116_v57  ;;  %v8804_v40 = vld [vmem:[#allocation31_spill] sm:$0xff] }
 0x201   : > { %2105 = vmatmul.mubr.f32.gmra.mrb[46].mxu1 %v7418_v36  ;;  %v8785_v57 = vand.u32 4294901760, %v7186_v51  ;;  %v8793_v51 = vand.u32 4294901760, %v7272_v47  ;;  %v8803_v47 = vand.u32 4294901760, %v8802_v32  ;;  %v8831_v32 = vand.u32 4294901760, %v7418_v36  ;;  %v8833_v36 = vld [vmem:[#allocation69_spill] sm:$0xff] }
 0x202   : > { %5867 = vmatpush3.bf16.msra.mxu1 %v8760_v11  ;;  %2209 = vmatprep.mubr.f32.mxu1 %v8761_v25  ;;  %v8767_v25 = vand.u32 4294901760, %v8738_v30  ;;  %v7573_v18 = vpack.c.bf16 %v8769_v1, %v8768_v45  ;;  %8773 = vst [vmem:[#allocation9_spill] sm:$0xff] %v7580_v61  ;;  %v8775_v30 = vand.u32 4294901760, %v8742_v54  ;;  %v7591_v39 = vpack.c.bf16 %v8777_v37, %v8776_v31  ;;  %v8797_v45 = vld [vmem:[#allocation29_spill] sm:$0xff]  ;;  %v8807_v31 = vld [vmem:[#allocation32_spill] sm:$0xff] }
 0x203   : > { %5869 = vmatprep.subr.bf16.mxu1 %v7545_v21  ;;  %v8783_v54 = vand.u32 4294901760, %v7324_v59  ;;  %v7609_v6 = vpack.c.bf16 %v8785_v57, %v8784_v56  ;;  %v8791_v59 = vand.u32 4294901760, %v7353_v28  ;;  %v8798_v1 = vand.u32 4294901760, %v8797_v45  ;;  %v8816_v57 = vld [vmem:[#allocation35_spill] sm:$0xff] }
 0x204   : > { %8770 = vst [vmem:[#allocation58_spill] sm:$0xff] %v7573_v18  ;;  %8778 = vst [vmem:[#allocation57_spill] sm:$0xff] %v7591_v39  ;;  %v8801_v28 = vand.u32 4294901760, %v7381_v63  ;;  %v8808_v37 = vand.u32 4294901760, %v8807_v31  ;;  %v8813_v63 = vand.u32 4294901760, %v7405_v7  ;;  %v8825_v7 = vand.u32 4294901760, %v7425_v58 }
 0x205   : > { %2213 = vmatmul.mubr.f32.vlgmr.msra.gmra.mrb[48].mxu1 %v8766_v46  ;;  %8786 = vst [vmem:[#allocation61_spill] sm:$0xff] %v7609_v6  ;;  %v7616_v46 = vpack.c.bf16 %v8788_v60, %v8787_v2  ;;  %v7634_v14 = vpack.c.bf16 %v8798_v1, %v8796_v19  ;;  %v8817_v2 = vand.u32 4294901760, %v8816_v57  ;;  %v8826_v19 = vld [vmem:[#allocation40_spill] sm:$0xff]  ;;  %v8828_v1 = vld [vmem:[#allocation41_spill] sm:$0xff]  ;;  %v8834_v58 = vld [vmem:[#allocation19_spill] sm:$0xff] }
 0x206   : > { %5871 = vmatpush3.bf16.msra.mxu1 %v7555_v26  ;;  %2220 = vmatprep.mubr.f32.mxu1 %v8767_v25  ;;  %v7627_v25 = vpack.c.bf16 %v8793_v51, %v8792_v33  ;;  %v8821_v33 = vld [vmem:[#allocation38_spill] sm:$0xff]  ;;  %v8827_v45 = vand.u32 4294901760, %v8826_v19  ;;  %v8838_v31 = vld [vmem:[#allocation21_spill] sm:$0xff] }
 0x207   : > { %5873 = vmatprep.subr.bf16.mxu1 %v7562_v23  ;;  %8789 = vst [vmem:[#allocation11_spill] sm:$0xff] %v7616_v46  ;;  %8799 = vst [vmem:[#allocation12_spill] sm:$0xff] %v7634_v14  ;;  %v8822_v51 = vand.u32 4294901760, %v8821_v33 }
 0x208   : > { %8794 = vst [vmem:[#allocation60_spill] sm:$0xff] %v7627_v25 }
 0x209   : > { %2224 = vmatmul.mubr.f32.gmra.mrb[50].mxu1 %v8774_v49  ;;  %v8805_v49 = vand.u32 4294901760, %v8804_v40  ;;  %v8836_v40 = vld [vmem:[#allocation20_spill] sm:$0xff] }
 0x20a   : > { %5875 = vmatpush3.bf16.msra.mxu1 %v7573_v18  ;;  %2231 = vmatprep.mubr.f32.mxu1 %v8775_v30 }
 0x20b   : > { %5877 = vmatprep.subr.bf16.mxu1 %v7580_v61  ;;  %v7645_v30 = vpack.c.bf16 %v8805_v49, %v8803_v47  ;;  %v8835_v47 = vld [vmem:[#allocation67_spill] sm:$0xff] }
 0x20c   : > { %v8837_v49 = vld [vmem:[#allocation71_spill] sm:$0xff] }
 0x20d   : > { %2235 = vmatmul.mubr.f32.gmra.mrb[52].mxu1 %v8782_v3  ;;  %8806 = vst [vmem:[#allocation63_spill] sm:$0xff] %v7645_v30  ;;  %v7652_v3 = vpack.c.bf16 %v8810_v43, %v8808_v37  ;;  %v8839_v37 = vld [vmem:[#allocation70_spill] sm:$0xff] }
 0x20e   : > { %5879 = vmatpush3.bf16.msra.mxu1 %v7591_v39  ;;  %2242 = vmatprep.mubr.f32.mxu1 %v8783_v54  ;;  %v8814_v54 = vld [vmem:[#allocation34_spill] sm:$0xff] }
 0x20f   : > { %5881 = vmatprep.subr.bf16.mxu1 %v7598_v22  ;;  %8811 = vst [vmem:[#allocation13_spill] sm:$0xff] %v7652_v3  ;;  %v8815_v56 = vand.u32 4294901760, %v8814_v54  ;;  %v8841_v43 = vld [vmem:[#allocation74_spill] sm:$0xff] }
 0x211   : > { %2246 = vmatmul.mubr.f32.gmra.mrb[54].mxu1 %v8790_v4  ;;  %v7663_v60 = vpack.c.bf16 %v8817_v2, %v8815_v56  ;;  %v8819_v4 = vld [vmem:[#allocation36_spill] sm:$0xff] }
 0x212   : > { %5883 = vmatpush3.bf16.msra.mxu1 %v7609_v6  ;;  %2253 = vmatprep.mubr.f32.mxu1 %v8791_v59  ;;  %v8820_v59 = vand.u32 4294901760, %v8819_v4 }
 0x213   : > { %5885 = vmatprep.subr.bf16.mxu1 %v7616_v46  ;;  %8818 = vst [vmem:[#allocation62_spill] sm:$0xff] %v7663_v60 }
 0x214   : > { %v7670_v44 = vpack.c.bf16 %v8822_v51, %v8820_v59 }
 0x215   : > { %2257 = vmatmul.mubr.f32.gmra.mrb[56].mxu1 %v8800_v5  ;;  %v8829_v5 = vand.u32 4294901760, %v8828_v1 }
 0x216   : > { %5887 = vmatpush3.bf16.msra.mxu1 %v7627_v25  ;;  %2264 = vmatprep.mubr.f32.mxu1 %v8801_v28  ;;  %8823 = vst [vmem:[#allocation14_spill] sm:$0xff] %v7670_v44 }
 0x217   : > { %5889 = vmatprep.subr.bf16.mxu1 %v7634_v14  ;;  %v7681_v28 = vpack.c.bf16 %v8829_v5, %v8827_v45  ;;  %v8863_v14 = vld [vmem:[#allocation64_spill] sm:$0xff] }
 0x219   : > { %2268 = vmatmul.mubr.f32.gmra.mrb[58].mxu1 %v8812_v35  ;;  %8830 = vst [vmem:[#allocation15_spill] sm:$0xff] %v7681_v28  ;;  %v8842_v35 = vld [vmem:[#allocation73_spill] sm:$0xff] }
 0x21a   : > { %5891 = vmatpush3.bf16.msra.mxu1 %v7645_v30  ;;  %2275 = vmatprep.mubr.f32.mxu1 %v8813_v63 }
 0x21b   : > { %5893 = vmatprep.subr.bf16.mxu1 %v7652_v3 }
 0x21d   : > { %2279 = vmatmul.mubr.f32.gmra.mrb[60].mxu1 %v8824_v17 }
 0x21e   : > { %5895 = vmatpush3.bf16.msra.mxu1 %v7663_v60  ;;  %2286 = vmatprep.mubr.f32.mxu1 %v8825_v7 }
 0x21f   : > { %5897 = vmatprep.subr.bf16.mxu1 %v7670_v44  ;;  %v8861_v44 = vld [vmem:[#allocation56_spill] sm:$0xff] }
 0x221   : > { %2290 = vmatmul.mubr.f32.gmra.mrb[62].mxu1 %v8831_v32  ;;  %v488_v32 = vld [vmem:[%s7756_s20] sm:$0xff] }
 0x222   : > { %5899 = vmatpush3.bf16.msra.mxu1 %v7681_v28  ;;  %2456 = vmatprep.mubr.f32.mxu1 %v7209_v38 }
 0x223   : > { %5901 = vmatprep.subr.bf16.mxu1 %v8735_v9 }
 0x225   : > { %2458 = vmatmul.mubr.f32.vlgmr.msra.gmra.mrb[64].mxu1 %v7197_v50 }
 0x226   : > { %5903 = vmatpush3.bf16.msra.mxu1 %v8737_v53  ;;  %2463 = vmatprep.mubr.f32.mxu1 %v7247_v48 }
 0x227   : > { %5905 = vmatprep.subr.bf16.mxu1 %v8739_v62 }
 0x229   : > { %2465 = vmatmul.mubr.f32.gmra.mrb[66].mxu1 %v7237_v20 }
 0x22a   : > { %5907 = vmatpush3.bf16.msra.mxu1 %v8741_v24  ;;  %2470 = vmatprep.mubr.f32.mxu1 %v7284_v29 }
 0x22b   : > { %5909 = vmatprep.subr.bf16.mxu1 %v8743_v52 }
 0x22d   : > { %2472 = vmatmul.mubr.f32.gmra.mrb[68].mxu1 %v7274_v16 }
 0x22e   : > { %5911 = vmatpush3.bf16.msra.mxu1 %v8745_v12  ;;  %2477 = vmatprep.mubr.f32.mxu1 %v7311_v0 }
 0x22f   : > { %5913 = vmatprep.subr.bf16.mxu1 %v8746_v41 }
 0x231   : > { %2479 = vmatmul.mubr.f32.gmra.mrb[70].mxu1 %v7303_v10 }
 0x232   : > { %5915 = vmatpush3.bf16.msra.mxu1 %v8747_v8  ;;  %2484 = vmatprep.mubr.f32.mxu1 %v7338_v27 }
 0x233   : > { %5917 = vmatprep.subr.bf16.mxu1 %v8748_v34 }
 0x235   : > { %2486 = vmatmul.mubr.f32.gmra.mrb[72].mxu1 %v7331_v55 }
 0x236   : > { %5919 = vmatpush3.bf16.msra.mxu1 %v8832_v15  ;;  %2491 = vmatprep.mubr.f32.mxu1 %v8833_v36 }
 0x237   : > { %5921 = vmatprep.subr.bf16.mxu1 %v8834_v58 }
 0x239   : > { %2493 = vmatmul.mubr.f32.gmra.mrb[74].mxu1 %v8835_v47 }
 0x23a   : > { %5923 = vmatpush3.bf16.msra.mxu1 %v8836_v40  ;;  %2498 = vmatprep.mubr.f32.mxu1 %v8837_v49 }
 0x23b   : > { %5925 = vmatprep.subr.bf16.mxu1 %v8838_v31 }
 0x23d   : > { %2500 = vmatmul.mubr.f32.gmra.mrb[76].mxu1 %v8839_v37 }
 0x23e   : > { %5927 = vmatpush3.bf16.msra.mxu1 %v8840_v42  ;;  %2505 = vmatprep.mubr.f32.mxu1 %v8841_v43 }
 0x23f   : > { %5929 = vmatprep.subr.bf16.mxu1 %v8755_v13 }
 0x241   : > { %2507 = vmatmul.mubr.f32.gmra.mrb[78].mxu1 %v8842_v35 }
 0x242   : > { %5931 = vmatpush3.bf16.msra.mxu1 %v8760_v11  ;;  %2609 = vmatprep.mubr.f32.mxu1 %v7209_v38 }
 0x243   : > { %5957 = vmatprep.subr.bf16.mxu1 %v8735_v9 }
 0x245   : > { %2611 = vmatmul.mubr.f32.vlgmr.msra.gmra.mrb[80].mxu1 %v7197_v50  ;;  %v8843_v50 = vld [vmem:[#allocation27_spill] sm:$0xff] }
 0x246   : > { %2616 = vmatprep.mubr.f32.mxu1 %v7247_v48  ;;  %5959 = vmatpush3.bf16.msra.mxu1 %v8737_v53 }
 0x247   : > { %5961 = vmatprep.subr.bf16.mxu1 %v8739_v62 }
 0x249   : > { %2618 = vmatmul.mubr.f32.gmra.mrb[82].mxu1 %v7237_v20 }
 0x24a   : > { %2623 = vmatprep.mubr.f32.mxu1 %v7284_v29  ;;  %5963 = vmatpush3.bf16.msra.mxu1 %v8741_v24 }
 0x24b   : > { %5965 = vmatprep.subr.bf16.mxu1 %v8743_v52 }
 0x24d   : > { %2625 = vmatmul.mubr.f32.gmra.mrb[84].mxu1 %v7274_v16 }
 0x24e   : > { %2630 = vmatprep.mubr.f32.mxu1 %v7311_v0  ;;  %5967 = vmatpush3.bf16.msra.mxu1 %v8745_v12 }
 0x24f   : > { %5969 = vmatprep.subr.bf16.mxu1 %v8746_v41 }
 0x251   : > { %2632 = vmatmul.mubr.f32.gmra.mrb[86].mxu1 %v7303_v10 }
 0x252   : > { %2637 = vmatprep.mubr.f32.mxu1 %v7338_v27  ;;  %5971 = vmatpush3.bf16.msra.mxu1 %v8747_v8 }
 0x253   : > { %5973 = vmatprep.subr.bf16.mxu1 %v8748_v34 }
 0x255   : > { %2639 = vmatmul.mubr.f32.gmra.mrb[88].mxu1 %v7331_v55 }
 0x256   : > { %2644 = vmatprep.mubr.f32.mxu1 %v8833_v36  ;;  %5975 = vmatpush3.bf16.msra.mxu1 %v8832_v15 }
 0x257   : > { %5977 = vmatprep.subr.bf16.mxu1 %v8834_v58 }
 0x259   : > { %2646 = vmatmul.mubr.f32.gmra.mrb[90].mxu1 %v8835_v47 }
 0x25a   : > { %2651 = vmatprep.mubr.f32.mxu1 %v8837_v49  ;;  %5979 = vmatpush3.bf16.msra.mxu1 %v8836_v40 }
 0x25b   : > { %5981 = vmatprep.subr.bf16.mxu1 %v8838_v31 }
 0x25d   : > { %2653 = vmatmul.mubr.f32.gmra.mrb[92].mxu1 %v8839_v37 }
 0x25e   : > { %2658 = vmatprep.mubr.f32.mxu1 %v8841_v43  ;;  %5983 = vmatpush3.bf16.msra.mxu1 %v8840_v42  ;;  %v489_v43 = vld [vmem:[%s7756_s20 + $0x8] sm:$0xff] }
 0x25f   : > { %5985 = vmatprep.subr.bf16.mxu1 %v8755_v13 }
 0x261   : > { %2660 = vmatmul.mubr.f32.gmra.mrb[94].mxu1 %v8842_v35 }
 0x262   : > { %5987 = vmatpush3.bf16.msra.mxu1 %v8760_v11 }
 0x263   : > { %5989 = vmatprep.subr.bf16.mxu1 %v8843_v50 }
 0x275   : > { %v5076_v29 = vpop.f32.mrb[0].mxu1 }
 0x276   : > { %v5077_v38 = vpop.f32.mrb[1].mxu1 }
 0x277   : > { %v5078_v20 = vadd.f32 %v5077_v38, %v5076_v29 }
 0x279   : > { %v5079_v48 = vpop.f32.mrb[2].mxu1  ;;  %v1520_v49 = vadd.f32 %v5078_v20, %v488_v32 }
 0x27a   : > { %v5080_v16 = vpop.f32.mrb[3].mxu1 }
 0x27b   : > { %v5081_v10 = vadd.f32 %v5080_v16, %v5079_v48  ;;  %v490_v16 = vld [vmem:[%s7756_s20 + $0x10] sm:$0xff] }
 0x27d   : > { %v5082_v0 = vpop.f32.mrb[4].mxu1  ;;  %v1535_v38 = vadd.f32 %v5081_v10, %v489_v43 }
 0x27e   : > { %v5083_v55 = vpop.f32.mrb[5].mxu1 }
 0x27f   : > { %v5084_v27 = vadd.f32 %v5083_v55, %v5082_v0 }
 0x284   : > { %v5085_v63 = vpop.f32.mrb[6].mxu1 }
 0x285   : > { %v5086_v54 = vpop.f32.mrb[7].mxu1 }
 0x286   : > { %v5087_v56 = vadd.f32 %v5086_v54, %v5085_v63  ;;  %v1550_v54 = vadd.f32 %v5084_v27, %v490_v16 }
 0x288   : > { %v5088_v57 = vpop.f32.mrb[8].mxu1 }
 0x289   : > { %v5089_v2 = vpop.f32.mrb[9].mxu1 }
 0x28a   : > { %v5090_v4 = vadd.f32 %v5089_v2, %v5088_v57  ;;  %v491_v2 = vld [vmem:[%s7756_s20 + $0x18] sm:$0xff] }
 0x28c   : > { %v5091_v59 = vpop.f32.mrb[10].mxu1 }
 0x28d   : > { %v5092_v33 = vpop.f32.mrb[11].mxu1 }
 0x28e   : > { %v5093_v51 = vadd.f32 %v5092_v33, %v5091_v59 }
 0x290   : > { %v5094_v17 = vpop.f32.mrb[12].mxu1 }
 0x291   : > { %v5095_v7 = vpop.f32.mrb[13].mxu1 }
 0x292   : > { %v5096_v19 = vadd.f32 %v5095_v7, %v5094_v17  ;;  %v1565_v17 = vadd.f32 %v5087_v56, %v491_v2 }
 0x294   : > { %v5097_v45 = vpop.f32.mrb[14].mxu1 }
 0x295   : > { %v5098_v1 = vpop.f32.mrb[15].mxu1 }
 0x296   : > { %v5099_v5 = vadd.f32 %v5098_v1, %v5097_v45  ;;  %v492_v45 = vld [vmem:[%s7756_s20 + $0x20] sm:$0xff] }
 0x298   : > { %v5132_v36 = vpop.f32.mrb[16].mxu1 }
 0x299   : > { %v5133_v47 = vpop.f32.mrb[17].mxu1 }
 0x29a   : > { %v5134_v37 = vadd.f32 %v5133_v47, %v5132_v36  ;;  %v1580_v36 = vadd.f32 %v5090_v4, %v492_v45 }
 0x29c   : > { %v1857_v35 = vadd.f32 %v5134_v37, %v1520_v49  ;;  %v5135_v50 = vpop.f32.mrb[18].mxu1  ;;  %v493_v49 = vld [vmem:[%s7756_s20 + $0x28] sm:$0xff] }
 0x29d   : > { %v5136_v29 = vpop.f32.mrb[19].mxu1  ;;  %v1595_v27 = vadd.f32 %v5093_v51, %v493_v49 }
 0x29e   : > { %v5137_v48 = vadd.f32 %v5136_v29, %v5135_v50 }
 0x2a0   : > { %v1864_v0 = vadd.f32 %v5137_v48, %v1535_v38  ;;  %v5138_v55 = vpop.f32.mrb[20].mxu1  ;;  %v494_v38 = vld [vmem:[%s7756_s20 + $0x30] sm:$0xff] }
 0x2a1   : > { %v5139_v63 = vpop.f32.mrb[21].mxu1 }
 0x2a2   : > { %v5140_v57 = vadd.f32 %v5139_v63, %v5138_v55  ;;  %v1610_v63 = vadd.f32 %v5096_v19, %v494_v38 }
 0x2a4   : > { %v1871_v59 = vadd.f32 %v5140_v57, %v1550_v54  ;;  %v5141_v33 = vpop.f32.mrb[22].mxu1  ;;  %v495_v54 = vld [vmem:[%s7756_s20 + $0x38] sm:$0xff] }
 0x2a5   : > { %v5142_v20 = vpop.f32.mrb[23].mxu1 }
 0x2a6   : > { %v5143_v7 = vadd.f32 %v5142_v20, %v5141_v33  ;;  %v1625_v20 = vadd.f32 %v5099_v5, %v495_v54 }
 0x2a8   : > { %v1878_v1 = vadd.f32 %v5143_v7, %v1565_v17  ;;  %v5144_v32 = vpop.f32.mrb[24].mxu1 }
 0x2a9   : > { %v5145_v10 = vpop.f32.mrb[25].mxu1 }
 0x2aa   : > { %v5146_v47 = vadd.f32 %v5145_v10, %v5144_v32 }
 0x2ac   : > { %v1885_v37 = vadd.f32 %v5146_v47, %v1580_v36  ;;  %v5147_v43 = vpop.f32.mrb[26].mxu1 }
 0x2ad   : > { %v5148_v50 = vpop.f32.mrb[27].mxu1 }
 0x2ae   : > { %v5149_v29 = vadd.f32 %v5148_v50, %v5147_v43 }
 0x2b0   : > { %v1892_v48 = vadd.f32 %v5149_v29, %v1595_v27  ;;  %v5150_v16 = vpop.f32.mrb[28].mxu1 }
 0x2b1   : > { %v5151_v55 = vpop.f32.mrb[29].mxu1 }
 0x2b2   : > { %v5152_v56 = vadd.f32 %v5151_v55, %v5150_v16 }
 0x2b4   : > { %v1899_v57 = vadd.f32 %v5152_v56, %v1610_v63  ;;  %v5153_v2 = vpop.f32.mrb[30].mxu1 }
 0x2b5   : > { %v5154_v33 = vpop.f32.mrb[31].mxu1 }
 0x2b6   : > { %v5155_v17 = vadd.f32 %v5154_v33, %v5153_v2 }
 0x2b8   : > { %v1906_v4 = vadd.f32 %v5155_v17, %v1625_v20  ;;  %v5188_v7 = vpop.f32.mrb[32].mxu1 }
 0x2b9   : > { %v5189_v45 = vpop.f32.mrb[33].mxu1 }
 0x2ba   : > { %v5190_v32 = vadd.f32 %v5189_v45, %v5188_v7 }
 0x2bc   : > { %v2044_v10 = vadd.f32 %v5190_v32, %v1857_v35  ;;  %v5191_v36 = vpop.f32.mrb[34].mxu1 }
 0x2bd   : > { %v5192_v51 = vpop.f32.mrb[35].mxu1 }
 0x2be   : > { %v5193_v47 = vadd.f32 %v5192_v51, %v5191_v36 }
 0x2c0   : > { %v2053_v49 = vadd.f32 %v5193_v47, %v1864_v0  ;;  %v5194_v43 = vpop.f32.mrb[36].mxu1 }
 0x2c1   : > { %v5195_v50 = vpop.f32.mrb[37].mxu1 }
 0x2c2   : > { %v5196_v27 = vadd.f32 %v5195_v50, %v5194_v43 }
 0x2c4   : > { %v2062_v19 = vadd.f32 %v5196_v27, %v1871_v59  ;;  %v5197_v29 = vpop.f32.mrb[38].mxu1 }
 0x2c5   : > { %v5198_v38 = vpop.f32.mrb[39].mxu1 }
 0x2c6   : > { %v5199_v16 = vadd.f32 %v5198_v38, %v5197_v29 }
 0x2c8   : > { %v2071_v55 = vadd.f32 %v5199_v16, %v1878_v1  ;;  %v5200_v63 = vpop.f32.mrb[40].mxu1 }
 0x2c9   : > { %v5201_v5 = vpop.f32.mrb[41].mxu1 }
 0x2ca   : > { %v5202_v56 = vadd.f32 %v5201_v5, %v5200_v63 }
 0x2cc   : > { %v2080_v54 = vadd.f32 %v5202_v56, %v1885_v37  ;;  %v5203_v2 = vpop.f32.mrb[42].mxu1 }
 0x2cd   : > { %v5204_v33 = vpop.f32.mrb[43].mxu1 }
 0x2ce   : > { %v5205_v20 = vadd.f32 %v5204_v33, %v5203_v2 }
 0x2d0   : > { %v2089_v35 = vadd.f32 %v5205_v20, %v1892_v48  ;;  %v5206_v17 = vpop.f32.mrb[44].mxu1 }
 0x2d1   : > { %v5207_v7 = vpop.f32.mrb[45].mxu1 }
 0x2d2   : > { %v5208_v45 = vadd.f32 %v5207_v7, %v5206_v17 }
 0x2d4   : > { %v2098_v0 = vadd.f32 %v5208_v45, %v1899_v57  ;;  %v5209_v32 = vpop.f32.mrb[46].mxu1 }
 0x2d5   : > { %v5210_v36 = vpop.f32.mrb[47].mxu1 }
 0x2d6   : > { %v5211_v51 = vadd.f32 %v5210_v36, %v5209_v32 }
 0x2d8   : > { %v2107_v59 = vadd.f32 %v5211_v51, %v1906_v4  ;;  %v5244_v47 = vpop.f32.mrb[48].mxu1 }
 0x2d9   : > { %v5245_v43 = vpop.f32.mrb[49].mxu1 }
 0x2da   : > { %v5246_v50 = vadd.f32 %v5245_v43, %v5244_v47 }
 0x2dc   : > { %v2215_v1 = vadd.f32 %v5246_v50, %v2044_v10  ;;  %v5247_v27 = vpop.f32.mrb[50].mxu1 }
 0x2dd   : > { %v5248_v29 = vpop.f32.mrb[51].mxu1 }
 0x2de   : > { %v5249_v38 = vadd.f32 %v5248_v29, %v5247_v27 }
 0x2e0   : > { %v2226_v37 = vadd.f32 %v5249_v38, %v2053_v49  ;;  %v5250_v16 = vpop.f32.mrb[52].mxu1 }
 0x2e1   : > { %v5251_v63 = vpop.f32.mrb[53].mxu1 }
 0x2e2   : > { %v5252_v5 = vadd.f32 %v5251_v63, %v5250_v16 }
 0x2e4   : > { %v2237_v48 = vadd.f32 %v5252_v5, %v2062_v19  ;;  %v5253_v56 = vpop.f32.mrb[54].mxu1 }
 0x2e5   : > { %v5254_v2 = vpop.f32.mrb[55].mxu1 }
 0x2e6   : > { %v5255_v33 = vadd.f32 %v5254_v2, %v5253_v56 }
 0x2e8   : > { %v2248_v57 = vadd.f32 %v5255_v33, %v2071_v55  ;;  %v5256_v20 = vpop.f32.mrb[56].mxu1 }
 0x2e9   : > { %v5257_v17 = vpop.f32.mrb[57].mxu1 }
 0x2ea   : > { %v5258_v7 = vadd.f32 %v5257_v17, %v5256_v20 }
 0x2ec   : > { %v2259_v4 = vadd.f32 %v5258_v7, %v2080_v54  ;;  %v5259_v45 = vpop.f32.mrb[58].mxu1 }
 0x2ed   : > { %v5260_v32 = vpop.f32.mrb[59].mxu1 }
 0x2ee   : > { %v5261_v36 = vadd.f32 %v5260_v32, %v5259_v45 }
 0x2f0   : > { %v2270_v10 = vadd.f32 %v5261_v36, %v2089_v35  ;;  %v5262_v51 = vpop.f32.mrb[60].mxu1 }
 0x2f1   : > { %v5263_v47 = vpop.f32.mrb[61].mxu1 }
 0x2f2   : > { %v5264_v43 = vadd.f32 %v5263_v47, %v5262_v51 }
 0x2f4   : > { %v2281_v49 = vadd.f32 %v5264_v43, %v2098_v0  ;;  %v5265_v50 = vpop.f32.mrb[62].mxu1 }
 0x2f5   : > { %v5266_v27 = vpop.f32.mrb[63].mxu1 }
 0x2f6   : > { %v5267_v29 = vadd.f32 %v5266_v27, %v5265_v50 }
 0x2f8   : > { %v2292_v19 = vadd.f32 %v5267_v29, %v2107_v59  ;;  %v5300_v38 = vpop.f32.mrb[64].mxu1 }
 0x2f9   : > { %v5301_v16 = vpop.f32.mrb[65].mxu1 }
 0x2fa   : > { %v5302_v63 = vadd.f32 %v5301_v16, %v5300_v38 }
 0x2fc   : > { %v2460_v55 = vadd.f32 %v5302_v63, %v2215_v1  ;;  %v5303_v5 = vpop.f32.mrb[66].mxu1 }
 0x2fd   : > { %v5304_v56 = vpop.f32.mrb[67].mxu1 }
 0x2fe   : > { %v5305_v2 = vadd.f32 %v5304_v56, %v5303_v5 }
 0x300   : > { %v2467_v54 = vadd.f32 %v5305_v2, %v2226_v37  ;;  %v5306_v33 = vpop.f32.mrb[68].mxu1 }
 0x301   : > { %v5307_v20 = vpop.f32.mrb[69].mxu1 }
 0x302   : > { %v5308_v17 = vadd.f32 %v5307_v20, %v5306_v33 }
 0x304   : > { %v2474_v35 = vadd.f32 %v5308_v17, %v2237_v48  ;;  %v5309_v7 = vpop.f32.mrb[70].mxu1 }
 0x305   : > { %v5310_v45 = vpop.f32.mrb[71].mxu1 }
 0x306   : > { %v5311_v32 = vadd.f32 %v5310_v45, %v5309_v7 }
 0x308   : > { %v2481_v0 = vadd.f32 %v5311_v32, %v2248_v57  ;;  %v5312_v36 = vpop.f32.mrb[72].mxu1 }
 0x309   : > { %v5313_v51 = vpop.f32.mrb[73].mxu1 }
 0x30a   : > { %v5314_v47 = vadd.f32 %v5313_v51, %v5312_v36 }
 0x30c   : > { %v2488_v59 = vadd.f32 %v5314_v47, %v2259_v4  ;;  %v5315_v43 = vpop.f32.mrb[74].mxu1 }
 0x30d   : > { %v5316_v50 = vpop.f32.mrb[75].mxu1 }
 0x30e   : > { %v5317_v27 = vadd.f32 %v5316_v50, %v5315_v43 }
 0x310   : > { %v2495_v1 = vadd.f32 %v5317_v27, %v2270_v10  ;;  %v5318_v29 = vpop.f32.mrb[76].mxu1 }
 0x311   : > { %v5319_v38 = vpop.f32.mrb[77].mxu1 }
 0x312   : > { %v5320_v16 = vadd.f32 %v5319_v38, %v5318_v29  ;;  %v496_v38 = vld [vmem:[%s7774_s24] sm:$0xff] }
 0x314   : > { %v7766_v37 = vadd.f32 %v5320_v16, %v2281_v49  ;;  %v5321_v63 = vpop.f32.mrb[78].mxu1 }
 0x315   : > { %v5322_v5 = vpop.f32.mrb[79].mxu1 }
 0x316   : > { %v5323_v48 = vadd.f32 %v5322_v5, %v5321_v63 }
 0x318   : > { %v7768_v56 = vadd.f32 %v5323_v48, %v2292_v19  ;;  %v5356_v2 = vpop.f32.mrb[80].mxu1 }
 0x319   : > { %v5357_v57 = vpop.f32.mrb[81].mxu1 }
 0x31a   : > { %v5358_v33 = vadd.f32 %v5357_v57, %v5356_v2 }
 0x31c   : > { %v2613_v20 = vadd.f32 %v5358_v33, %v2460_v55  ;;  %v5359_v4 = vpop.f32.mrb[82].mxu1 }
 0x31d   : > { %v5360_v17 = vpop.f32.mrb[83].mxu1 }
 0x31e   : > { %6333 = vtanh.f32 %v2613_v20  ;;  %v5361_v7 = vadd.f32 %v5360_v17, %v5359_v4  ;;  %v497_v17 = vld [vmem:[%s7774_s24 + $0x8] sm:$0xff] }
 0x320   : > { %v2620_v10 = vadd.f32 %v5361_v7, %v2467_v54  ;;  %v5362_v45 = vpop.f32.mrb[84].mxu1 }
 0x321   : > { %v5363_v32 = vpop.f32.mrb[85].mxu1 }
 0x322   : > { %6335 = vtanh.f32 %v2620_v10  ;;  %v5364_v49 = vadd.f32 %v5363_v32, %v5362_v45 }
 0x324   : > { %v2627_v36 = vadd.f32 %v5364_v49, %v2474_v35  ;;  %v5365_v51 = vpop.f32.mrb[86].mxu1 }
 0x325   : > { %v5366_v47 = vpop.f32.mrb[87].mxu1 }
 0x326   : > { %6337 = vtanh.f32 %v2627_v36  ;;  %v5367_v19 = vadd.f32 %v5366_v47, %v5365_v51 }
 0x328   : > { %v6334_v55 = vpop.eup %6333  ;;  %v2634_v43 = vadd.f32 %v5367_v19, %v2481_v0  ;;  %v5368_v50 = vpop.f32.mrb[88].mxu1 }
 0x329   : > { %v2674_v54 = vsel %vm536_vm0, %v6334_v55, 0  ;;  %v4817_v27 = vmul.f32 %v6334_v55, %v6334_v55  ;;  %v5369_v29 = vpop.f32.mrb[89].mxu1 }
 0x32a   : > { %v7778_v35 = vand.u32 4294901760, %v2674_v54  ;;  %6339 = vtanh.f32 %v2634_v43  ;;  %v5370_v16 = vadd.f32 %v5369_v29, %v5368_v50  ;;  %v498_v29 = vld [vmem:[%s7774_s24 + $0x10] sm:$0xff] }
 0x32b   : > { %v4825_v63 = vsub.f32 1.0, %v4817_v27 }
 0x32c   : > { %v6336_v5 = vpop.eup %6335  ;;  %v7781_v48 = vsub.f32 %v2674_v54, %v7778_v35  ;;  %v2641_v2 = vadd.f32 %v5370_v16, %v2488_v59  ;;  %v5371_v57 = vpop.f32.mrb[90].mxu1 }
 0x32d   : > { %v4833_v33 = vmul.f32 %v4825_v63, %v496_v38  ;;  %v4818_v0 = vmul.f32 %v6336_v5, %v6336_v5  ;;  %v5372_v20 = vpop.f32.mrb[91].mxu1  ;;  %v2677_v4 = vsel %vm536_vm0, %v6336_v5, 0 }
 0x32e   : > { %6341 = vtanh.f32 %v2641_v2  ;;  %v5373_v7 = vadd.f32 %v5372_v20, %v5371_v57  ;;  %v8571_v10 = vand.u32 4294901760, %v7781_v48  ;;  %v7786_v45 = vand.u32 4294901760, %v2677_v4 }
 0x32f   : > { %v4841_v32 = vadd.f32 1.0, %v4833_v33  ;;  %v4826_v49 = vsub.f32 1.0, %v4818_v0 }
 0x330   : > { %v6338_v36 = vpop.eup %6337  ;;  %v2648_v51 = vadd.f32 %v5373_v7, %v2495_v1  ;;  %v5374_v47 = vpop.f32.mrb[92].mxu1  ;;  %v2769_v59 = vsub.f32 %v7781_v48, %v8571_v10  ;;  %v7792_v19 = vsub.f32 %v2677_v4, %v7786_v45  ;;  %v503_v10 = vld [vmem:[%s7774_s24 + $0x38] sm:$0xff] }
 0x331   : > { %v4849_v55 = vand.u32 2147483647, %v4841_v32  ;;  %v4834_v43 = vmul.f32 %v4826_v49, %v497_v17  ;;  %v4819_v50 = vmul.f32 %v6338_v36, %v6338_v36  ;;  %v5375_v54 = vpop.f32.mrb[93].mxu1  ;;  %v2680_v27 = vsel %vm536_vm0, %v6338_v36, 0  ;;  %v8844_v32 = vld [vmem:[#allocation5_spill] sm:$0xff] }
 0x332   : > { %6343 = vtanh.f32 %v2648_v51  ;;  %v5376_v38 = vadd.f32 %v5375_v54, %v5374_v47  ;;  %v2770_v16 = vand.u32 4294901760, %v2769_v59  ;;  %v8569_v1 = vand.u32 4294901760, %v7792_v19  ;;  %v499_v47 = vld [vmem:[%s7774_s24 + $0x18] sm:$0xff] }
 0x333   : > { %6345 = vlog2.f32 %v4849_v55  ;;  %v4842_v63 = vadd.f32 1.0, %v4834_v43  ;;  %v4827_v5 = vsub.f32 1.0, %v4819_v50  ;;  %v7797_v2 = vand.u32 4294901760, %v2680_v27  ;;  %v8846_v43 = vld [vmem:[#allocation6_spill] sm:$0xff] }
 0x334   : > { %v6340_v57 = vpop.eup %6339  ;;  %v2655_v33 = vadd.f32 %v5376_v38, %v7766_v37  ;;  %v5377_v0 = vpop.f32.mrb[94].mxu1  ;;  %2771 = vmatmul.mubr.f32.vlgmr.msra.gmra.mrb[16].mxu0 %v2770_v16  ;;  %v2780_v20 = vsub.f32 %v7792_v19, %v8569_v1  ;;  %v8845_v36 = vmov 0.0  }
 0x335   : > { %v4850_v4 = vand.u32 2147483647, %v4842_v63  ;;  %v4835_v17 = vmul.f32 %v4827_v5, %v498_v29  ;;  %v4820_v7 = vmul.f32 %v6340_v57, %v6340_v57  ;;  %5939 = vmatpush1.bf16.msra.mxu0 %v8844_v32  ;;  %v5378_v49 = vpop.f32.mrb[95].mxu1  ;;  %2776 = vmatprep.mubr.f32.mxu0 %v8845_v36  ;;  %v7806_v51 = vsub.f32 %v2680_v27, %v7797_v2 }
 0x336   : > { %6347 = vtanh.f32 %v2655_v33  ;;  %v5379_v37 = vadd.f32 %v5378_v49, %v5377_v0  ;;  %v2781_v59 = vand.u32 4294901760, %v2780_v20  ;;  %v2683_v55 = vsel %vm536_vm0, %v6340_v57, 0  ;;  %5941 = vmatprep.subr.bf16.mxu0 %v8846_v43  ;;  %v500_v0 = vld [vmem:[%s7774_s24 + $0x20] sm:$0xff] }
 0x337   : > { %6349 = vlog2.f32 %v4850_v4  ;;  %v4843_v50 = vadd.f32 1.0, %v4835_v17  ;;  %v4828_v54 = vsub.f32 1.0, %v4820_v7  ;;  %v8568_v29 = vand.u32 4294901760, %v7806_v51 }
 0x338   : > { %v6342_v38 = vpop.eup %6341  ;;  %v2662_v16 = vadd.f32 %v5379_v37, %v7768_v56  ;;  %2782 = vmatmul.mubr.f32.gmra.mrb[18].mxu0 %v2781_v59  ;;  %v7813_v27 = vand.u32 4294901760, %v2683_v55 }
 0x339   : > { %v4851_v63 = vand.u32 2147483647, %v4843_v50  ;;  %v4836_v5 = vmul.f32 %v4828_v54, %v499_v47  ;;  %v4821_v33 = vmul.f32 %v6342_v38, %v6342_v38  ;;  %2787 = vmatprep.mubr.f32.mxu0 %v8845_v36  ;;  %v2791_v57 = vsub.f32 %v7806_v51, %v8568_v29 }
 0x33a   : > { %6351 = vtanh.f32 %v2662_v16  ;;  %v7821_v20 = vsub.f32 %v2683_v55, %v7813_v27  ;;  %v2686_v56 = vsel %vm536_vm0, %v6342_v38, 0  ;;  %v501_v38 = vld [vmem:[%s7774_s24 + $0x28] sm:$0xff] }
 0x33b   : > { %6353 = vlog2.f32 %v4851_v63  ;;  %v4844_v4 = vadd.f32 1.0, %v4836_v5  ;;  %v4829_v17 = vsub.f32 1.0, %v4821_v33  ;;  %v2792_v7 = vand.u32 4294901760, %v2791_v57 }
 0x33c   : > { %v6344_v32 = vpop.eup %6343  ;;  %v8567_v49 = vand.u32 4294901760, %v7821_v20  ;;  %v7825_v47 = vand.u32 4294901760, %v2686_v56 }
 0x33d   : > { %v6346_v37 = vpop.eup %6345  ;;  %v4852_v59 = vand.u32 2147483647, %v4844_v4  ;;  %v4837_v55 = vmul.f32 %v4829_v17, %v500_v0  ;;  %v4822_v43 = vmul.f32 %v6344_v32, %v6344_v32  ;;  %2793 = vmatmul.mubr.f32.gmra.mrb[20].mxu0 %v2792_v7  ;;  %v2689_v50 = vsel %vm536_vm0, %v6344_v32, 0 }
 0x33e   : > { %v4858_v54 = vmul.f32 0.6931472, %v6346_v37  ;;  %2798 = vmatprep.mubr.f32.mxu0 %v8845_v36  ;;  %v2802_v16 = vsub.f32 %v7821_v20, %v8567_v49  ;;  %v7840_v63 = vsub.f32 %v2686_v56, %v7825_v47  ;;  %v7842_v5 = vand.u32 4294901760, %v2689_v50 }
 0x33f   : > { %6355 = vlog2.f32 %v4852_v59  ;;  %v4845_v33 = vadd.f32 1.0, %v4837_v55  ;;  %v4830_v57 = vsub.f32 1.0, %v4822_v43  ;;  %v502_v59 = vld [vmem:[%s7774_s24 + $0x30] sm:$0xff] }
 0x340   : > { %v6348_v0 = vpop.eup %6347  ;;  %4873 = vst.msk [vmem:[%s7831_s27] sm:$0xff] %vm536_vm0, %v4858_v54  ;;  %v2803_v4 = vand.u32 4294901760, %v2802_v16  ;;  %v8570_v17 = vand.u32 4294901760, %v7840_v63  ;;  %v7848_v7 = vsub.f32 %v2689_v50, %v7842_v5 }
 0x341   : > { %v6350_v32 = vpop.eup %6349  ;;  %v4853_v37 = vand.u32 2147483647, %v4845_v33  ;;  %v4838_v56 = vmul.f32 %v4830_v57, %v501_v38  ;;  %v4823_v49 = vmul.f32 %v6348_v0, %v6348_v0  ;;  %v2692_v29 = vsel %vm536_vm0, %v6348_v0, 0 }
 0x342   : > { %v4860_v1 = vmul.f32 0.6931472, %v6350_v32  ;;  %2804 = vmatmul.mubr.f32.gmra.mrb[22].mxu0 %v2803_v4  ;;  %v2813_v55 = vsub.f32 %v7840_v63, %v8570_v17  ;;  %v8573_v43 = vand.u32 4294901760, %v7848_v7  ;;  %v7856_v54 = vand.u32 4294901760, %v2692_v29 }
 0x343   : > { %6357 = vlog2.f32 %v4853_v37  ;;  %v4846_v50 = vadd.f32 1.0, %v4838_v56  ;;  %v4831_v16 = vsub.f32 1.0, %v4823_v49  ;;  %2809 = vmatprep.mubr.f32.mxu0 %v8845_v36 }
 0x344   : > { %v6352_v38 = vpop.eup %6351  ;;  %4874 = vst.msk [vmem:[%s7831_s27 + $0x8] sm:$0xff] %vm536_vm0, %v4860_v1  ;;  %v2814_v33 = vand.u32 4294901760, %v2813_v55  ;;  %v2824_v57 = vsub.f32 %v7848_v7, %v8573_v43  ;;  %v7865_v0 = vsub.f32 %v2692_v29, %v7856_v54 }
 0x345   : > { %v6354_v4 = vpop.eup %6353  ;;  %v4854_v32 = vand.u32 2147483647, %v4846_v50  ;;  %v4839_v17 = vmul.f32 %v4831_v16, %v502_v59  ;;  %v4824_v37 = vmul.f32 %v6352_v38, %v6352_v38  ;;  %v2695_v49 = vsel %vm536_vm0, %v6352_v38, 0 }
 0x346   : > { %v4862_v56 = vmul.f32 0.6931472, %v6354_v4  ;;  %2815 = vmatmul.mubr.f32.gmra.mrb[24].mxu0 %v2814_v33  ;;  %v2825_v28 = vand.u32 4294901760, %v2824_v57  ;;  %v2834_v1 = vand.u32 4294901760, %v7865_v0  ;;  %v7870_v55 = vand.u32 4294901760, %v2695_v49 }
 0x347   : > { %6359 = vlog2.f32 %v4854_v32  ;;  %v4847_v43 = vadd.f32 1.0, %v4839_v17  ;;  %v4832_v29 = vsub.f32 1.0, %v4824_v37  ;;  %2820 = vmatprep.mubr.f32.mxu0 %v8845_v36 }
 0x348   : > { %4875 = vst.msk [vmem:[%s7831_s27 + $0x10] sm:$0xff] %vm536_vm0, %v4862_v56  ;;  %v2835_v59 = vsub.f32 %v7865_v0, %v2834_v1  ;;  %v7879_v50 = vsub.f32 %v2695_v49, %v7870_v55 }
 0x349   : > { %v6356_v16 = vpop.eup %6355  ;;  %v4855_v38 = vand.u32 2147483647, %v4847_v43  ;;  %v4840_v33 = vmul.f32 %v4832_v29, %v503_v10 }
 0x34a   : > { %v4864_v57 = vmul.f32 0.6931472, %v6356_v16  ;;  %2826 = vmatmul.mubr.f32.gmra.mrb[26].mxu0 %v2825_v28  ;;  %v2836_v17 = vand.u32 4294901760, %v2835_v59  ;;  %v2845_v4 = vand.u32 4294901760, %v7879_v50 }
 0x34b   : > { %6361 = vlog2.f32 %v4855_v38  ;;  %v4848_v32 = vadd.f32 1.0, %v4840_v33  ;;  %2831 = vmatprep.mubr.f32.mxu0 %v8845_v36  ;;  %v8847_v38 = vld [vmem:[#allocation8_spill] sm:$0xff]  ;;  %v8848_v33 = vld [vmem:[#allocation2_spill] sm:$0xff] }
 0x34c   : > { %4876 = vst.msk [vmem:[%s7831_s27 + $0x18] sm:$0xff] %vm536_vm0, %v4864_v57  ;;  %v2846_v37 = vsub.f32 %v7879_v50, %v2845_v4 }
 0x34d   : > { %v6358_v49 = vpop.eup %6357  ;;  %v4856_v43 = vand.u32 2147483647, %v4848_v32  ;;  %v8849_v32 = vld [vmem:[#allocation3_spill] sm:$0xff] }
 0x34e   : > { %v4866_v10 = vmul.f32 0.6931472, %v6358_v49  ;;  %2837 = vmatmul.mubr.f32.gmra.mrb[28].mxu0 %v2836_v17  ;;  %v2847_v28 = vand.u32 4294901760, %v2846_v37  ;;  %v8850_v37 = vld [vmem:[#allocation4_spill] sm:$0xff]  ;;  %v8851_v49 = vand.u32 4294901760, %v7781_v48 }
 0x34f   : > { %6363 = vlog2.f32 %v4856_v43  ;;  %2842 = vmatprep.mubr.f32.mxu0 %v8845_v36  ;;  %v8852_v43 = vld [vmem:[#allocation7_spill] sm:$0xff] }
 0x350   : > { %4877 = vst.msk [vmem:[%s7831_s27 + $0x20] sm:$0xff] %vm536_vm0, %v4866_v10  ;;  %v8853_v10 = vand.u32 4294901760, %v7792_v19 }
 0x351   : > { %v6360_v56 = vpop.eup %6359 }
 0x352   : > { %v4868_v29 = vmul.f32 0.6931472, %v6360_v56  ;;  %2848 = vmatmul.mubr.f32.gmra.mrb[30].mxu0 %v2847_v28  ;;  %v8854_v28 = vand.u32 4294901760, %v7806_v51  ;;  %v8855_v56 = vand.u32 4294901760, %v7821_v20 }
 0x353   : > { %2938 = vmatprep.mubr.f32.mxu0 %v8845_v36 }
 0x354   : > { %4878 = vst.msk [vmem:[%s7831_s27 + $0x28] sm:$0xff] %vm536_vm0, %v4868_v29 }
 0x355   : > { %v6362_v59 = vpop.eup %6361 }
 0x356   : > { %v4870_v16 = vmul.f32 0.6931472, %v6362_v59  ;;  %2940 = vmatmul.mubr.f32.vlgmr.msra.gmra.mrb[16].mxu0 %v7778_v35 }
 0x357   : > { %5943 = vmatpush1.bf16.msra.mxu0 %v8847_v38  ;;  %2945 = vmatprep.mubr.f32.mxu0 %v8845_v36 }
 0x358   : > { %4879 = vst.msk [vmem:[%s7831_s27 + $0x30] sm:$0xff] %vm536_vm0, %v4870_v16  ;;  %5945 = vmatprep.subr.bf16.mxu0 %v8848_v33  ;;  %v509_v16 = vld [vmem:[%s8013_s10 + $0x28] sm:$0xff] }
 0x359   : > { %v6364_v57 = vpop.eup %6363 }
 0x35a   : > { %v4872_v17 = vmul.f32 0.6931472, %v6364_v57  ;;  %2947 = vmatmul.mubr.f32.gmra.mrb[18].mxu0 %v7786_v45 }
 0x35b   : > { %2952 = vmatprep.mubr.f32.mxu0 %v8845_v36 }
 0x35c   : > { %4880 = vst.msk [vmem:[%s7831_s27 + $0x38] sm:$0xff] %vm536_vm0, %v4872_v17 }
 0x35e   : > { %2954 = vmatmul.mubr.f32.gmra.mrb[20].mxu0 %v7797_v2 }
 0x35f   : > { %2959 = vmatprep.mubr.f32.mxu0 %v8845_v36 }
 0x362   : > { %2961 = vmatmul.mubr.f32.gmra.mrb[22].mxu0 %v7813_v27 }
 0x363   : > { %2966 = vmatprep.mubr.f32.mxu0 %v8845_v36 }
 0x366   : > { %2968 = vmatmul.mubr.f32.gmra.mrb[24].mxu0 %v7825_v47 }
 0x367   : > { %2973 = vmatprep.mubr.f32.mxu0 %v8845_v36 }
 0x36a   : > { %2975 = vmatmul.mubr.f32.gmra.mrb[26].mxu0 %v7842_v5 }
 0x36b   : > { %2980 = vmatprep.mubr.f32.mxu0 %v8845_v36 }
 0x36e   : > { %2982 = vmatmul.mubr.f32.gmra.mrb[28].mxu0 %v7856_v54 }
 0x36f   : > { %2987 = vmatprep.mubr.f32.mxu0 %v8845_v36 }
 0x372   : > { %2989 = vmatmul.mubr.f32.gmra.mrb[30].mxu0 %v7870_v55 }
 0x373   : > { %3067 = vmatprep.mubr.f32.mxu0 %v8845_v36 }
 0x376   : > { %3070 = vmatmul.mubr.f32.vlgmr.msra.gmra.mrb[16].mxu0 %v7781_v48  ;;  %v8856_v48 = vand.u32 4294901760, %v7840_v63 }
 0x377   : > { %5947 = vmatpush1.bf16.msra.mxu0 %v8849_v32  ;;  %3075 = vmatprep.mubr.f32.mxu0 %v8845_v36 }
 0x378   : > { %5949 = vmatprep.subr.bf16.mxu0 %v8850_v37 }
 0x37a   : > { %3078 = vmatmul.mubr.f32.gmra.mrb[18].mxu0 %v7792_v19  ;;  %v8857_v19 = vand.u32 4294901760, %v7848_v7 }
 0x37b   : > { %3083 = vmatprep.mubr.f32.mxu0 %v8845_v36 }
 0x37e   : > { %3086 = vmatmul.mubr.f32.gmra.mrb[20].mxu0 %v7806_v51 }
 0x37f   : > { %3091 = vmatprep.mubr.f32.mxu0 %v8845_v36 }
 0x382   : > { %3094 = vmatmul.mubr.f32.gmra.mrb[22].mxu0 %v7821_v20  ;;  %v506_v20 = vld [vmem:[%s8013_s10 + $0x10] sm:$0xff] }
 0x383   : > { %3099 = vmatprep.mubr.f32.mxu0 %v8845_v36 }
 0x386   : > { %3102 = vmatmul.mubr.f32.gmra.mrb[24].mxu0 %v7840_v63  ;;  %v507_v63 = vld [vmem:[%s8013_s10 + $0x18] sm:$0xff] }
 0x387   : > { %3107 = vmatprep.mubr.f32.mxu0 %v8845_v36 }
 0x38a   : > { %3110 = vmatmul.mubr.f32.gmra.mrb[26].mxu0 %v7848_v7 }
 0x38b   : > { %3115 = vmatprep.mubr.f32.mxu0 %v8845_v36 }
 0x38e   : > { %3118 = vmatmul.mubr.f32.gmra.mrb[28].mxu0 %v7865_v0 }
 0x38f   : > { %3123 = vmatprep.mubr.f32.mxu0 %v8845_v36 }
 0x392   : > { %3126 = vmatmul.mubr.f32.gmra.mrb[30].mxu0 %v7879_v50 }
 0x393   : > { %3200 = vmatprep.mubr.f32.mxu0 %v8845_v36 }
 0x396   : > { %3204 = vmatmul.mubr.f32.vlgmr.msra.gmra.mrb[16].mxu0 %v8851_v49 }
 0x397   : > { %5951 = vmatpush1.bf16.msra.mxu0 %v8852_v43  ;;  %3209 = vmatprep.mubr.f32.mxu0 %v8845_v36 }
 0x398   : > { %5953 = vmatprep.subr.bf16.mxu0 %v8848_v33 }
 0x39a   : > { %3213 = vmatmul.mubr.f32.gmra.mrb[18].mxu0 %v8853_v10 }
 0x39b   : > { %3218 = vmatprep.mubr.f32.mxu0 %v8845_v36 }
 0x39e   : > { %3222 = vmatmul.mubr.f32.gmra.mrb[20].mxu0 %v8854_v28  ;;  %v510_v28 = vld [vmem:[%s8013_s10 + $0x30] sm:$0xff] }
 0x39f   : > { %3227 = vmatprep.mubr.f32.mxu0 %v8845_v36 }
 0x3a2   : > { %3231 = vmatmul.mubr.f32.gmra.mrb[22].mxu0 %v8855_v56 }
 0x3a3   : > { %3236 = vmatprep.mubr.f32.mxu0 %v8845_v36 }
 0x3a6   : > { %3240 = vmatmul.mubr.f32.gmra.mrb[24].mxu0 %v8856_v48 }
 0x3a7   : > { %3245 = vmatprep.mubr.f32.mxu0 %v8845_v36 }
 0x3aa   : > { %3249 = vmatmul.mubr.f32.gmra.mrb[26].mxu0 %v8857_v19  ;;  %v511_v19 = vld [vmem:[%s8013_s10 + $0x38] sm:$0xff] }
 0x3ab   : > { %3254 = vmatprep.mubr.f32.mxu0 %v8845_v36 }
 0x3ae   : > { %3258 = vmatmul.mubr.f32.gmra.mrb[28].mxu0 %v2834_v1 }
 0x3af   : > { %3263 = vmatprep.mubr.f32.mxu0 %v8845_v36 }
 0x3b2   : > { %3267 = vmatmul.mubr.f32.gmra.mrb[30].mxu0 %v2845_v4  ;;  %v508_v4 = vld [vmem:[%s8013_s10 + $0x20] sm:$0xff] }
 0x3b3   : > { %3349 = vmatprep.mubr.f32.mxu0 %v8845_v36 }
 0x3b6   : > { %3351 = vmatmul.mubr.f32.vlgmr.msra.gmra.mrb[16].mxu0 %v7778_v35 }
 0x3b7   : > { %5955 = vmatpush1.bf16.msra.mxu0 %v8849_v32  ;;  %3356 = vmatprep.mubr.f32.mxu0 %v8845_v36 }
 0x3b8   : > { %6117 = vmatprep.subr.bf16.mxu0 %v8735_v9 }
 0x3ba   : > { %3358 = vmatmul.mubr.f32.gmra.mrb[18].mxu0 %v7786_v45 }
 0x3bb   : > { %3363 = vmatprep.mubr.f32.mxu0 %v8845_v36 }
 0x3be   : > { %3365 = vmatmul.mubr.f32.gmra.mrb[20].mxu0 %v7797_v2 }
 0x3bf   : > { %3370 = vmatprep.mubr.f32.mxu0 %v8845_v36 }
 0x3c2   : > { %3372 = vmatmul.mubr.f32.gmra.mrb[22].mxu0 %v7813_v27 }
 0x3c3   : > { %3377 = vmatprep.mubr.f32.mxu0 %v8845_v36 }
 0x3c6   : > { %3379 = vmatmul.mubr.f32.gmra.mrb[24].mxu0 %v7825_v47 }
 0x3c7   : > { %3384 = vmatprep.mubr.f32.mxu0 %v8845_v36 }
 0x3ca   : > { %3386 = vmatmul.mubr.f32.gmra.mrb[26].mxu0 %v7842_v5 }
 0x3cb   : > { %3391 = vmatprep.mubr.f32.mxu0 %v8845_v36 }
 0x3ce   : > { %3393 = vmatmul.mubr.f32.gmra.mrb[28].mxu0 %v7856_v54 }
 0x3cf   : > { %3398 = vmatprep.mubr.f32.mxu0 %v8845_v36 }
 0x3d2   : > { %3400 = vmatmul.mubr.f32.gmra.mrb[30].mxu0 %v7870_v55 }
 0x3d3   : > { %3474 = vmatprep.mubr.f32.mxu0 %v8845_v36 }
 0x3d6   : > { %3476 = vmatmul.mubr.f32.vlgmr.msra.gmra.mrb[16].mxu0 %v7778_v35  ;;  %v504_v35 = vld [vmem:[%s8013_s10] sm:$0xff] }
 0x3d7   : > { %3481 = vmatprep.mubr.f32.mxu0 %v8845_v36  ;;  %6119 = vmatpush3.bf16.msra.mxu0 %v8737_v53 }
 0x3d8   : > { %6121 = vmatprep.subr.bf16.mxu0 %v8739_v62 }
 0x3da   : > { %3483 = vmatmul.mubr.f32.gmra.mrb[18].mxu0 %v7786_v45  ;;  %v505_v45 = vld [vmem:[%s8013_s10 + $0x8] sm:$0xff] }
 0x3db   : > { %3488 = vmatprep.mubr.f32.mxu0 %v8845_v36  ;;  %6123 = vmatpush3.bf16.msra.mxu0 %v8741_v24 }
 0x3dc   : > { %6125 = vmatprep.subr.bf16.mxu0 %v8743_v52 }
 0x3de   : > { %3490 = vmatmul.mubr.f32.gmra.mrb[20].mxu0 %v7797_v2 }
 0x3df   : > { %3495 = vmatprep.mubr.f32.mxu0 %v8845_v36  ;;  %6127 = vmatpush3.bf16.msra.mxu0 %v8745_v12 }
 0x3e0   : > { %6129 = vmatprep.subr.bf16.mxu0 %v8746_v41 }
 0x3e2   : > { %3497 = vmatmul.mubr.f32.gmra.mrb[22].mxu0 %v7813_v27 }
 0x3e3   : > { %3502 = vmatprep.mubr.f32.mxu0 %v8845_v36  ;;  %6131 = vmatpush3.bf16.msra.mxu0 %v8747_v8 }
 0x3e4   : > { %6133 = vmatprep.subr.bf16.mxu0 %v8748_v34 }
 0x3e6   : > { %3504 = vmatmul.mubr.f32.gmra.mrb[24].mxu0 %v7825_v47 }
 0x3e7   : > { %3509 = vmatprep.mubr.f32.mxu0 %v8845_v36  ;;  %6135 = vmatpush3.bf16.msra.mxu0 %v8832_v15 }
 0x3e8   : > { %6137 = vmatprep.subr.bf16.mxu0 %v8834_v58 }
 0x3ea   : > { %3511 = vmatmul.mubr.f32.gmra.mrb[26].mxu0 %v7842_v5 }
 0x3eb   : > { %3516 = vmatprep.mubr.f32.mxu0 %v8845_v36  ;;  %6139 = vmatpush3.bf16.msra.mxu0 %v8836_v40 }
 0x3ec   : > { %6141 = vmatprep.subr.bf16.mxu0 %v8838_v31 }
 0x3ee   : > { %3518 = vmatmul.mubr.f32.gmra.mrb[28].mxu0 %v7856_v54 }
 0x3ef   : > { %3523 = vmatprep.mubr.f32.mxu0 %v8845_v36  ;;  %6143 = vmatpush3.bf16.msra.mxu0 %v8840_v42 }
 0x3f0   : > { %6145 = vmatprep.subr.bf16.mxu0 %v8755_v13 }
 0x3f2   : > { %3525 = vmatmul.mubr.f32.gmra.mrb[30].mxu0 %v7870_v55 }
 0x3f3   : > { %6147 = vmatpush3.bf16.msra.mxu0 %v8760_v11 }
 0x4a9   : > { %v3477_v2 = vpop.f32.mrb[16].mxu0 }
 0x4aa   : > { %v3531_v36 = vmul.f32 %v3477_v2, %v504_v35  ;;  %v3479_v51 = vpop.f32.mrb[17].mxu0 }
 0x4ab   : > { %v3532_v27 = vmul.f32 %v3479_v51, %v505_v45 }
 0x4ac   : > { %v8018_v47 = vand.u32 4294901760, %v3531_v36 }
 0x4ad   : > { %v8021_v5 = vand.u32 4294901760, %v3532_v27  ;;  %v3484_v7 = vpop.f32.mrb[18].mxu0 }
 0x4ae   : > { %v8024_v54 = vsub.f32 %v3531_v36, %v8018_v47  ;;  %v3533_v0 = vmul.f32 %v3484_v7, %v506_v20  ;;  %v3486_v1 = vpop.f32.mrb[19].mxu0 }
 0x4af   : > { %v8027_v55 = vsub.f32 %v3532_v27, %v8021_v5  ;;  %v3534_v50 = vmul.f32 %v3486_v1, %v507_v63  ;;  %4745 = vmatprep.mubr.f32.mxu0 %v8021_v5 }
 0x4b0   : > { %v8576_v29 = vand.u32 4294901760, %v8024_v54  ;;  %v8032_v59 = vand.u32 4294901760, %v3533_v0  ;;  %4747 = vmatmul.mubr.f32.vlgmr.msra.gmra.mrb[32].mxu0 %v8018_v47 }
 0x4b1   : > { %v8036_v38 = vand.u32 4294901760, %v3534_v50  ;;  %v3491_v33 = vpop.f32.mrb[20].mxu0  ;;  %v8577_v57 = vand.u32 4294901760, %v8027_v55 }
 0x4b2   : > { %v3652_v17 = vsub.f32 %v8024_v54, %v8576_v29  ;;  %v8043_v32 = vsub.f32 %v3533_v0, %v8032_v59  ;;  %v3535_v37 = vmul.f32 %v3491_v33, %v508_v4  ;;  %v3493_v49 = vpop.f32.mrb[21].mxu0  ;;  %v512_v4 = vld [vmem:[%s8013_s10 + $0x40] sm:$0xff] }
 0x4b3   : > { %v8046_v43 = vsub.f32 %v3534_v50, %v8036_v38  ;;  %v3536_v10 = vmul.f32 %v3493_v49, %v509_v16  ;;  %4752 = vmatprep.mubr.f32.mxu0 %v8036_v38  ;;  %v3646_v56 = vsub.f32 %v8027_v55, %v8577_v57 }
 0x4b4   : > { %v8053_v48 = vand.u32 4294901760, %v3535_v37  ;;  %4754 = vmatmul.mubr.f32.gmra.mrb[34].mxu0 %v8032_v59  ;;  %v8574_v35 = vand.u32 4294901760, %v8043_v32  ;;  %v3653_v27 = vand.u32 4294901760, %v3652_v17  ;;  %v513_v17 = vld [vmem:[%s8013_s10 + $0x48] sm:$0xff] }
 0x4b5   : > { %v8058_v45 = vand.u32 4294901760, %v3536_v10  ;;  %v3498_v2 = vpop.f32.mrb[22].mxu0  ;;  %v3647_v36 = vand.u32 4294901760, %v3646_v56  ;;  %v8575_v51 = vand.u32 4294901760, %v8046_v43 }
 0x4b6   : > { %v8062_v20 = vsub.f32 %v3535_v37, %v8053_v48  ;;  %v3537_v63 = vmul.f32 %v3498_v2, %v510_v28  ;;  %v3500_v7 = vpop.f32.mrb[23].mxu0  ;;  %v3667_v0 = vsub.f32 %v8043_v32, %v8574_v35 }
 0x4b7   : > { %v8068_v1 = vsub.f32 %v3536_v10, %v8058_v45  ;;  %v3538_v50 = vmul.f32 %v3500_v7, %v511_v19  ;;  %3648 = vmatprep.mubr.f32.mxu1 %v3647_v36  ;;  %4759 = vmatprep.mubr.f32.mxu0 %v8058_v45  ;;  %v3661_v16 = vsub.f32 %v8046_v43, %v8575_v51  ;;  %v8858_v10 = vld [vmem:[#allocation53_spill] sm:$0xff]  ;;  %v8859_v7 = vld [vmem:[#allocation54_spill] sm:$0xff] }
 0x4b8   : > { %v8075_v33 = vand.u32 4294901760, %v3537_v63  ;;  %3654 = vmatmul.mubr.f32.vlgmr.msra.gmra.mrb[96].mxu1 %v3653_v27  ;;  %4761 = vmatmul.mubr.f32.gmra.mrb[36].mxu0 %v8053_v48  ;;  %v8578_v37 = vand.u32 4294901760, %v8062_v20  ;;  %v3668_v35 = vand.u32 4294901760, %v3667_v0 }
 0x4b9   : > { %v8080_v49 = vand.u32 4294901760, %v3538_v50  ;;  %5991 = vmatpush3.bf16.msra.mxu1 %v8858_v10  ;;  %v3505_v28 = vpop.f32.mrb[24].mxu0  ;;  %v3662_v56 = vand.u32 4294901760, %v3661_v16  ;;  %v8579_v19 = vand.u32 4294901760, %v8068_v1  ;;  %v514_v16 = vld [vmem:[%s8013_s10 + $0x50] sm:$0xff] }
 0x4ba   : > { %v8085_v2 = vsub.f32 %v3537_v63, %v8075_v33  ;;  %v3539_v36 = vmul.f32 %v3505_v28, %v512_v4  ;;  %v3507_v27 = vpop.f32.mrb[25].mxu0  ;;  %5993 = vmatprep.subr.bf16.mxu1 %v8859_v7  ;;  %v3682_v51 = vsub.f32 %v8062_v20, %v8578_v37  ;;  %v515_v4 = vld [vmem:[%s8013_s10 + $0x58] sm:$0xff]  ;;  %v8860_v7 = vld [vmem:[#allocation55_spill] sm:$0xff] }
 0x4bb   : > { %v8092_v29 = vsub.f32 %v3538_v50, %v8080_v49  ;;  %v3540_v10 = vmul.f32 %v3507_v27, %v513_v17  ;;  %3663 = vmatprep.mubr.f32.mxu1 %v3662_v56  ;;  %v3676_v63 = vsub.f32 %v8068_v1, %v8579_v19 }
 0x4bc   : > { %v8098_v57 = vand.u32 4294901760, %v3539_v36  ;;  %3669 = vmatmul.mubr.f32.gmra.mrb[98].mxu1 %v3668_v35  ;;  %v8584_v0 = vand.u32 4294901760, %v8085_v2  ;;  %v3683_v35 = vand.u32 4294901760, %v3682_v51 }
 0x4bd   : > { %v8102_v28 = vand.u32 4294901760, %v3540_v10  ;;  %5995 = vmatpush3.bf16.msra.mxu1 %v8860_v7  ;;  %v3512_v50 = vpop.f32.mrb[26].mxu0  ;;  %v3677_v17 = vand.u32 4294901760, %v3676_v63  ;;  %v8585_v56 = vand.u32 4294901760, %v8092_v29  ;;  %v516_v63 = vld [vmem:[%s8013_s10 + $0x60] sm:$0xff] }
 0x4be   : > { %v8107_v27 = vsub.f32 %v3539_v36, %v8098_v57  ;;  %v3541_v37 = vmul.f32 %v3512_v50, %v514_v16  ;;  %v3514_v19 = vpop.f32.mrb[27].mxu0  ;;  %5997 = vmatprep.subr.bf16.mxu1 %v8861_v44  ;;  %v3697_v60 = vsub.f32 %v8085_v2, %v8584_v0  ;;  %v517_v16 = vld [vmem:[%s8013_s10 + $0x68] sm:$0xff] }
 0x4bf   : > { %v8114_v3 = vsub.f32 %v3540_v10, %v8102_v28  ;;  %v3542_v7 = vmul.f32 %v3514_v19, %v515_v4  ;;  %3678 = vmatprep.mubr.f32.mxu1 %v3677_v17  ;;  %v3691_v36 = vsub.f32 %v8092_v29, %v8585_v56  ;;  %v8862_v50 = vld [vmem:[#allocation59_spill] sm:$0xff] }
 0x4c0   : > { %v8120_v30 = vand.u32 4294901760, %v3541_v37  ;;  %3684 = vmatmul.mubr.f32.gmra.mrb[100].mxu1 %v3683_v35  ;;  %v8590_v44 = vand.u32 4294901760, %v8107_v27  ;;  %v3698_v35 = vand.u32 4294901760, %v3697_v60 }
 0x4c1   : > { %v8124_v51 = vand.u32 4294901760, %v3542_v7  ;;  %5999 = vmatpush3.bf16.msra.mxu1 %v8862_v50  ;;  %v3519_v10 = vpop.f32.mrb[28].mxu0  ;;  %v3692_v19 = vand.u32 4294901760, %v3691_v36  ;;  %v8592_v4 = vand.u32 4294901760, %v8114_v3  ;;  %v518_v36 = vld [vmem:[%s8013_s10 + $0x70] sm:$0xff] }
 0x4c2   : > { %v8129_v17 = vsub.f32 %v3541_v37, %v8120_v30  ;;  %v3543_v0 = vmul.f32 %v3519_v10, %v516_v63  ;;  %v3521_v56 = vpop.f32.mrb[29].mxu0  ;;  %6001 = vmatprep.subr.bf16.mxu1 %v8863_v14  ;;  %v3712_v25 = vsub.f32 %v8107_v27, %v8590_v44  ;;  %v519_v63 = vld [vmem:[%s8013_s10 + $0x78] sm:$0xff]  ;;  %v8864_v10 = vld [vmem:[#allocation66_spill] sm:$0xff] }
 0x4c3   : > { %v8136_v46 = vsub.f32 %v3542_v7, %v8124_v51  ;;  %v3544_v50 = vmul.f32 %v3521_v56, %v517_v16  ;;  %3693 = vmatprep.mubr.f32.mxu1 %v3692_v19  ;;  %v3706_v37 = vsub.f32 %v8114_v3, %v8592_v4  ;;  %v8865_v4 = vld [vmem:[#allocation68_spill] sm:$0xff] }
 0x4c4   : > { %v8142_v6 = vand.u32 4294901760, %v3543_v0  ;;  %3699 = vmatmul.mubr.f32.gmra.mrb[102].mxu1 %v3698_v35  ;;  %v8595_v14 = vand.u32 4294901760, %v8129_v17  ;;  %v3713_v39 = vand.u32 4294901760, %v3712_v25  ;;  %v8866_v25 = vld [vmem:[#allocation72_spill] sm:$0xff] }
 0x4c5   : > { %v8146_v60 = vand.u32 4294901760, %v3544_v50  ;;  %6003 = vmatpush3.bf16.msra.mxu1 %v8864_v10  ;;  %v3526_v44 = vpop.f32.mrb[30].mxu0  ;;  %v3707_v7 = vand.u32 4294901760, %v3706_v37  ;;  %v8596_v56 = vand.u32 4294901760, %v8136_v46 }
 0x4c6   : > { %v8151_v16 = vsub.f32 %v3543_v0, %v8142_v6  ;;  %v3545_v19 = vmul.f32 %v3526_v44, %v518_v36  ;;  %v3528_v22 = vpop.f32.mrb[31].mxu0  ;;  %6005 = vmatprep.subr.bf16.mxu1 %v8865_v4  ;;  %v3727_v35 = vsub.f32 %v8129_v17, %v8595_v14 }
 0x4c7   : > { %v8158_v61 = vsub.f32 %v3544_v50, %v8146_v60  ;;  %v3546_v10 = vmul.f32 %v3528_v22, %v519_v63  ;;  %3708 = vmatprep.mubr.f32.mxu1 %v3707_v7  ;;  %v3721_v37 = vsub.f32 %v8136_v46, %v8596_v56  ;;  %v8867_v22 = vld [vmem:[#allocation37_spill] sm:$0xff] }
 0x4c8   : > { %v8163_v0 = vand.u32 4294901760, %v3545_v19  ;;  %3714 = vmatmul.mubr.f32.gmra.mrb[104].mxu1 %v3713_v39  ;;  %v8598_v44 = vand.u32 4294901760, %v8151_v16  ;;  %v3728_v63 = vand.u32 4294901760, %v3727_v35 }
 0x4c9   : > { %v8166_v4 = vand.u32 4294901760, %v3546_v10  ;;  %6007 = vmatpush3.bf16.msra.mxu1 %v8866_v25  ;;  %v3722_v36 = vand.u32 4294901760, %v3721_v37  ;;  %v3735_v14 = vand.u32 4294901760, %v8158_v61 }
 0x4ca   : > { %v8171_v50 = vsub.f32 %v3545_v19, %v8163_v0  ;;  %6009 = vmatprep.subr.bf16.mxu1 %v8867_v22  ;;  %v3742_v7 = vsub.f32 %v8151_v16, %v8598_v44  ;;  %v8868_v19 = vld [vmem:[#allocation39_spill] sm:$0xff]  ;;  %v8869_v22 = vld [vmem:[#allocation42_spill] sm:$0xff] }
 0x4cb   : > { %v8178_v39 = vsub.f32 %v3546_v10, %v8166_v4  ;;  %3723 = vmatprep.mubr.f32.mxu1 %v3722_v36  ;;  %v3736_v37 = vsub.f32 %v8158_v61, %v3735_v14 }
 0x4cc   : > { %3729 = vmatmul.mubr.f32.gmra.mrb[106].mxu1 %v3728_v63  ;;  %v3756_v25 = vand.u32 4294901760, %v8171_v50  ;;  %v3743_v18 = vand.u32 4294901760, %v3742_v7  ;;  %v8870_v63 = vld [vmem:[#allocation43_spill] sm:$0xff]  ;;  %v8873_v7 = vld [vmem:[#allocation44_spill] sm:$0xff] }
 0x4cd   : > { %6011 = vmatpush3.bf16.msra.mxu1 %v8868_v19  ;;  %v3737_v56 = vand.u32 4294901760, %v3736_v37  ;;  %v3750_v35 = vand.u32 4294901760, %v8178_v39  ;;  %v8871_v19 = vld [vmem:[#allocation45_spill] sm:$0xff] }
 0x4ce   : > { %6013 = vmatprep.subr.bf16.mxu1 %v8869_v22  ;;  %v3757_v10 = vsub.f32 %v8171_v50, %v3756_v25  ;;  %v8872_v22 = vld [vmem:[#allocation46_spill] sm:$0xff] }
 0x4cf   : > { %3738 = vmatprep.mubr.f32.mxu1 %v3737_v56  ;;  %v3751_v36 = vsub.f32 %v8178_v39, %v3750_v35  ;;  %v8874_v56 = vld [vmem:[#allocation75_spill] sm:$0xff] }
 0x4d0   : > { %3744 = vmatmul.mubr.f32.gmra.mrb[108].mxu1 %v3743_v18  ;;  %v3758_v37 = vand.u32 4294901760, %v3757_v10  ;;  %v8875_v18 = vld [vmem:[#allocation76_spill] sm:$0xff]  ;;  %v8878_v10 = vld [vmem:[#allocation79_spill] sm:$0xff] }
 0x4d1   : > { %6015 = vmatpush3.bf16.msra.mxu1 %v8870_v63  ;;  %v3752_v44 = vand.u32 4294901760, %v3751_v36  ;;  %v8876_v36 = vld [vmem:[#allocation77_spill] sm:$0xff]  ;;  %v8879_v63 = vld [vmem:[#allocation80_spill] sm:$0xff] }
 0x4d2   : > { %6017 = vmatprep.subr.bf16.mxu1 %v8871_v19  ;;  %v8880_v19 = vld [vmem:[#allocation81_spill] sm:$0xff] }
 0x4d3   : > { %3753 = vmatprep.mubr.f32.mxu1 %v3752_v44  ;;  %v8877_v44 = vld [vmem:[#allocation78_spill] sm:$0xff] }
 0x4d4   : > { %3759 = vmatmul.mubr.f32.gmra.mrb[110].mxu1 %v3758_v37  ;;  %v8881_v37 = vld [vmem:[#allocation82_spill] sm:$0xff] }
 0x4d5   : > { %6019 = vmatpush3.bf16.msra.mxu1 %v8872_v22  ;;  %3989 = vmatprep.mubr.f32.mxu1 %v8021_v5  ;;  %v8882_v22 = vld [vmem:[#allocation83_spill] sm:$0xff] }
 0x4d6   : > { %6021 = vmatprep.subr.bf16.mxu1 %v8873_v7  ;;  %v8883_v7 = vld [vmem:[#allocation47_spill] sm:$0xff] }
 0x4d8   : > { %3991 = vmatmul.mubr.f32.vlgmr.msra.gmra.mrb[112].mxu1 %v8018_v47 }
 0x4d9   : > { %6023 = vmatpush3.bf16.msra.mxu1 %v8874_v56  ;;  %3996 = vmatprep.mubr.f32.mxu1 %v8036_v38  ;;  %v8884_v56 = vld [vmem:[#allocation48_spill] sm:$0xff] }
 0x4da   : > { %6025 = vmatprep.subr.bf16.mxu1 %v8875_v18  ;;  %v8885_v18 = vld [vmem:[#allocation49_spill] sm:$0xff] }
 0x4dc   : > { %3998 = vmatmul.mubr.f32.gmra.mrb[114].mxu1 %v8032_v59 }
 0x4dd   : > { %6027 = vmatpush3.bf16.msra.mxu1 %v8876_v36  ;;  %4003 = vmatprep.mubr.f32.mxu1 %v8058_v45  ;;  %v8886_v36 = vld [vmem:[#allocation50_spill] sm:$0xff] }
 0x4de   : > { %6029 = vmatprep.subr.bf16.mxu1 %v8877_v44  ;;  %v8887_v44 = vld [vmem:[#allocation51_spill] sm:$0xff] }
 0x4e0   : > { %4005 = vmatmul.mubr.f32.gmra.mrb[116].mxu1 %v8053_v48 }
 0x4e1   : > { %6031 = vmatpush3.bf16.msra.mxu1 %v8878_v10  ;;  %4010 = vmatprep.mubr.f32.mxu1 %v8080_v49  ;;  %v8888_v10 = vld [vmem:[#allocation52_spill] sm:$0xff] }
 0x4e2   : > { %6033 = vmatprep.subr.bf16.mxu1 %v8879_v63  ;;  %v8889_v63 = vand.u32 4294901760, %v8027_v55 }
 0x4e4   : > { %4012 = vmatmul.mubr.f32.gmra.mrb[118].mxu1 %v8075_v33 }
 0x4e5   : > { %6035 = vmatpush3.bf16.msra.mxu1 %v8880_v19  ;;  %4017 = vmatprep.mubr.f32.mxu1 %v8102_v28  ;;  %v8890_v19 = vand.u32 4294901760, %v8024_v54 }
 0x4e6   : > { %6037 = vmatprep.subr.bf16.mxu1 %v8881_v37  ;;  %v8891_v37 = vand.u32 4294901760, %v8046_v43 }
 0x4e8   : > { %4019 = vmatmul.mubr.f32.gmra.mrb[120].mxu1 %v8098_v57 }
 0x4e9   : > { %6039 = vmatpush3.bf16.msra.mxu1 %v8882_v22  ;;  %4024 = vmatprep.mubr.f32.mxu1 %v8124_v51  ;;  %v8892_v22 = vand.u32 4294901760, %v8043_v32 }
 0x4ea   : > { %6041 = vmatprep.subr.bf16.mxu1 %v8883_v7  ;;  %v8893_v7 = vld [vmem:[#allocation58_spill] sm:$0xff] }
 0x4ec   : > { %4026 = vmatmul.mubr.f32.gmra.mrb[122].mxu1 %v8120_v30 }
 0x4ed   : > { %6043 = vmatpush3.bf16.msra.mxu1 %v8884_v56  ;;  %4031 = vmatprep.mubr.f32.mxu1 %v8146_v60  ;;  %v8895_v56 = vld [vmem:[#allocation9_spill] sm:$0xff] }
 0x4ee   : > { %6045 = vmatprep.subr.bf16.mxu1 %v8885_v18  ;;  %v8903_v18 = vld [vmem:[#allocation11_spill] sm:$0xff] }
 0x4f0   : > { %4033 = vmatmul.mubr.f32.gmra.mrb[124].mxu1 %v8142_v6 }
 0x4f1   : > { %6047 = vmatpush3.bf16.msra.mxu1 %v8886_v36  ;;  %4038 = vmatprep.mubr.f32.mxu1 %v8166_v4  ;;  %v8905_v36 = vld [vmem:[#allocation60_spill] sm:$0xff] }
 0x4f2   : > { %6049 = vmatprep.subr.bf16.mxu1 %v8887_v44  ;;  %v8907_v44 = vld [vmem:[#allocation12_spill] sm:$0xff] }
 0x4f4   : > { %4040 = vmatmul.mubr.f32.gmra.mrb[126].mxu1 %v8163_v0 }
 0x4f5   : > { %6051 = vmatpush3.bf16.msra.mxu1 %v8888_v10  ;;  %4175 = vmatprep.mubr.f32.mxu1 %v8027_v55  ;;  %v8894_v55 = vand.u32 4294901760, %v8068_v1  ;;  %v8909_v10 = vld [vmem:[#allocation63_spill] sm:$0xff] }
 0x4f6   : > { %6053 = vmatprep.subr.bf16.mxu1 %v8735_v9 }
 0x4f8   : > { %4178 = vmatmul.mubr.f32.vlgmr.msra.gmra.mrb[128].mxu1 %v8024_v54  ;;  %v8897_v54 = vld [vmem:[#allocation57_spill] sm:$0xff] }
 0x4f9   : > { %6055 = vmatpush3.bf16.msra.mxu1 %v8737_v53  ;;  %4184 = vmatprep.mubr.f32.mxu1 %v8046_v43  ;;  %v8899_v43 = vld [vmem:[#allocation10_spill] sm:$0xff] }
 0x4fa   : > { %6057 = vmatprep.subr.bf16.mxu1 %v8739_v62 }
 0x4fc   : > { %4187 = vmatmul.mubr.f32.gmra.mrb[130].mxu1 %v8043_v32  ;;  %v8901_v32 = vld [vmem:[#allocation61_spill] sm:$0xff] }
 0x4fd   : > { %6059 = vmatpush3.bf16.msra.mxu1 %v8741_v24  ;;  %4193 = vmatprep.mubr.f32.mxu1 %v8068_v1  ;;  %v8902_v1 = vand.u32 4294901760, %v8114_v3 }
 0x4fe   : > { %6061 = vmatprep.subr.bf16.mxu1 %v8743_v52 }
 0x500   : > { %4196 = vmatmul.mubr.f32.gmra.mrb[132].mxu1 %v8062_v20 }
 0x501   : > { %6063 = vmatpush3.bf16.msra.mxu1 %v8745_v12  ;;  %4202 = vmatprep.mubr.f32.mxu1 %v8092_v29 }
 0x502   : > { %6065 = vmatprep.subr.bf16.mxu1 %v8746_v41 }
 0x504   : > { %4205 = vmatmul.mubr.f32.gmra.mrb[134].mxu1 %v8085_v2 }
 0x505   : > { %6067 = vmatpush3.bf16.msra.mxu1 %v8747_v8  ;;  %4211 = vmatprep.mubr.f32.mxu1 %v8114_v3  ;;  %v8910_v3 = vld [vmem:[#allocation13_spill] sm:$0xff] }
 0x506   : > { %6069 = vmatprep.subr.bf16.mxu1 %v8748_v34 }
 0x508   : > { %4214 = vmatmul.mubr.f32.gmra.mrb[136].mxu1 %v8107_v27 }
 0x509   : > { %6071 = vmatpush3.bf16.msra.mxu1 %v8832_v15  ;;  %4220 = vmatprep.mubr.f32.mxu1 %v8136_v46 }
 0x50a   : > { %6073 = vmatprep.subr.bf16.mxu1 %v8834_v58 }
 0x50c   : > { %4223 = vmatmul.mubr.f32.gmra.mrb[138].mxu1 %v8129_v17 }
 0x50d   : > { %6075 = vmatpush3.bf16.msra.mxu1 %v8836_v40  ;;  %4229 = vmatprep.mubr.f32.mxu1 %v8158_v61 }
 0x50e   : > { %6077 = vmatprep.subr.bf16.mxu1 %v8838_v31 }
 0x510   : > { %4232 = vmatmul.mubr.f32.gmra.mrb[140].mxu1 %v8151_v16 }
 0x511   : > { %6079 = vmatpush3.bf16.msra.mxu1 %v8840_v42  ;;  %4238 = vmatprep.mubr.f32.mxu1 %v8178_v39 }
 0x512   : > { %6081 = vmatprep.subr.bf16.mxu1 %v8755_v13 }
 0x514   : > { %4241 = vmatmul.mubr.f32.gmra.mrb[142].mxu1 %v8171_v50 }
 0x515   : > { %6083 = vmatpush3.bf16.msra.mxu1 %v8760_v11  ;;  %4345 = vmatprep.mubr.f32.mxu1 %v8889_v63  ;;  %v8912_v63 = vld [vmem:[#allocation62_spill] sm:$0xff] }
 0x516   : > { %6085 = vmatprep.subr.bf16.mxu1 %v7545_v21  ;;  %v8896_v21 = vand.u32 4294901760, %v8062_v20  ;;  %v8904_v20 = vand.u32 4294901760, %v8107_v27  ;;  %v8911_v27 = vand.u32 4294901760, %v8151_v16 }
 0x518   : > { %4349 = vmatmul.mubr.f32.vlgmr.msra.gmra.mrb[144].mxu1 %v8890_v19 }
 0x519   : > { %6087 = vmatpush3.bf16.msra.mxu1 %v7555_v26  ;;  %4356 = vmatprep.mubr.f32.mxu1 %v8891_v37  ;;  %v8898_v26 = vand.u32 4294901760, %v8092_v29  ;;  %v8906_v29 = vand.u32 4294901760, %v8136_v46  ;;  %v8913_v46 = vld [vmem:[#allocation14_spill] sm:$0xff] }
 0x51a   : > { %6089 = vmatprep.subr.bf16.mxu1 %v7562_v23  ;;  %v8900_v23 = vand.u32 4294901760, %v8085_v2  ;;  %v8908_v2 = vand.u32 4294901760, %v8129_v17  ;;  %v8914_v17 = vld [vmem:[#allocation15_spill] sm:$0xff] }
 0x51c   : > { %4360 = vmatmul.mubr.f32.gmra.mrb[146].mxu1 %v8892_v22 }
 0x51d   : > { %6091 = vmatpush3.bf16.msra.mxu1 %v8893_v7  ;;  %4367 = vmatprep.mubr.f32.mxu1 %v8894_v55 }
 0x51e   : > { %6093 = vmatprep.subr.bf16.mxu1 %v8895_v56 }
 0x520   : > { %4371 = vmatmul.mubr.f32.gmra.mrb[148].mxu1 %v8896_v21 }
 0x521   : > { %6095 = vmatpush3.bf16.msra.mxu1 %v8897_v54  ;;  %4378 = vmatprep.mubr.f32.mxu1 %v8898_v26 }
 0x522   : > { %6097 = vmatprep.subr.bf16.mxu1 %v8899_v43 }
 0x524   : > { %4382 = vmatmul.mubr.f32.gmra.mrb[150].mxu1 %v8900_v23 }
 0x525   : > { %6099 = vmatpush3.bf16.msra.mxu1 %v8901_v32  ;;  %4389 = vmatprep.mubr.f32.mxu1 %v8902_v1 }
 0x526   : > { %6101 = vmatprep.subr.bf16.mxu1 %v8903_v18 }
 0x528   : > { %4393 = vmatmul.mubr.f32.gmra.mrb[152].mxu1 %v8904_v20 }
 0x529   : > { %6103 = vmatpush3.bf16.msra.mxu1 %v8905_v36  ;;  %4400 = vmatprep.mubr.f32.mxu1 %v8906_v29 }
 0x52a   : > { %6105 = vmatprep.subr.bf16.mxu1 %v8907_v44 }
 0x52c   : > { %4404 = vmatmul.mubr.f32.gmra.mrb[154].mxu1 %v8908_v2 }
 0x52d   : > { %6107 = vmatpush3.bf16.msra.mxu1 %v8909_v10  ;;  %4411 = vmatprep.mubr.f32.mxu1 %v3735_v14 }
 0x52e   : > { %6109 = vmatprep.subr.bf16.mxu1 %v8910_v3 }
 0x530   : > { %4415 = vmatmul.mubr.f32.gmra.mrb[156].mxu1 %v8911_v27 }
 0x531   : > { %6111 = vmatpush3.bf16.msra.mxu1 %v8912_v63  ;;  %4422 = vmatprep.mubr.f32.mxu1 %v3750_v35 }
 0x532   : > { %6113 = vmatprep.subr.bf16.mxu1 %v8913_v46 }
 0x534   : > { %4426 = vmatmul.mubr.f32.gmra.mrb[158].mxu1 %v3756_v25 }
 0x535   : > { %6115 = vmatpush3.bf16.msra.mxu1 %v8914_v17  ;;  %4592 = vmatprep.mubr.f32.mxu1 %v8021_v5 }
 0x536   : > { %6148 = vmatprep.subr.bf16.mxu1 %v8735_v9 }
 0x538   : > { %4594 = vmatmul.mubr.f32.vlgmr.msra.gmra.mrb[160].mxu1 %v8018_v47 }
 0x539   : > { %6156 = vmatpush3.bf16.msra.mxu1 %v8737_v53  ;;  %4599 = vmatprep.mubr.f32.mxu1 %v8036_v38 }
 0x53a   : > { %6149 = vmatprep.subr.bf16.mxu1 %v8739_v62 }
 0x53c   : > { %4601 = vmatmul.mubr.f32.gmra.mrb[162].mxu1 %v8032_v59 }
 0x53d   : > { %6157 = vmatpush3.bf16.msra.mxu1 %v8741_v24  ;;  %4606 = vmatprep.mubr.f32.mxu1 %v8058_v45 }
 0x53e   : > { %6150 = vmatprep.subr.bf16.mxu1 %v8743_v52 }
 0x540   : > { %4608 = vmatmul.mubr.f32.gmra.mrb[164].mxu1 %v8053_v48 }
 0x541   : > { %6158 = vmatpush3.bf16.msra.mxu1 %v8745_v12  ;;  %4613 = vmatprep.mubr.f32.mxu1 %v8080_v49 }
 0x542   : > { %6151 = vmatprep.subr.bf16.mxu1 %v8746_v41 }
 0x544   : > { %4615 = vmatmul.mubr.f32.gmra.mrb[166].mxu1 %v8075_v33 }
 0x545   : > { %6159 = vmatpush3.bf16.msra.mxu1 %v8747_v8  ;;  %4620 = vmatprep.mubr.f32.mxu1 %v8102_v28 }
 0x546   : > { %6152 = vmatprep.subr.bf16.mxu1 %v8748_v34 }
 0x548   : > { %4622 = vmatmul.mubr.f32.gmra.mrb[168].mxu1 %v8098_v57 }
 0x549   : > { %6160 = vmatpush3.bf16.msra.mxu1 %v8832_v15  ;;  %4627 = vmatprep.mubr.f32.mxu1 %v8124_v51 }
 0x54a   : > { %6153 = vmatprep.subr.bf16.mxu1 %v8834_v58 }
 0x54c   : > { %4629 = vmatmul.mubr.f32.gmra.mrb[170].mxu1 %v8120_v30 }
 0x54d   : > { %6161 = vmatpush3.bf16.msra.mxu1 %v8836_v40  ;;  %4634 = vmatprep.mubr.f32.mxu1 %v8146_v60 }
 0x54e   : > { %6154 = vmatprep.subr.bf16.mxu1 %v8838_v31 }
 0x550   : > { %4636 = vmatmul.mubr.f32.gmra.mrb[172].mxu1 %v8142_v6 }
 0x551   : > { %6162 = vmatpush3.bf16.msra.mxu1 %v8840_v42  ;;  %4641 = vmatprep.mubr.f32.mxu1 %v8166_v4 }
 0x552   : > { %6155 = vmatprep.subr.bf16.mxu1 %v8755_v13 }
 0x554   : > { %4643 = vmatmul.mubr.f32.gmra.mrb[174].mxu1 %v8163_v0 }
 0x555   : > { %6163 = vmatpush3.bf16.msra.mxu1 %v8760_v11  ;;  %4766 = vmatprep.mubr.f32.mxu1 %v8080_v49 }
 0x558   : > { %4768 = vmatmul.mubr.f32.vlgmr.msra.gmra.mrb[176].mxu1 %v8075_v33 }
 0x559   : > { %4773 = vmatprep.mubr.f32.mxu1 %v8102_v28 }
 0x55c   : > { %4775 = vmatmul.mubr.f32.gmra.mrb[178].mxu1 %v8098_v57 }
 0x55d   : > { %4780 = vmatprep.mubr.f32.mxu1 %v8124_v51 }
 0x560   : > { %4782 = vmatmul.mubr.f32.gmra.mrb[180].mxu1 %v8120_v30 }
 0x561   : > { %4787 = vmatprep.mubr.f32.mxu1 %v8146_v60 }
 0x564   : > { %4789 = vmatmul.mubr.f32.gmra.mrb[182].mxu1 %v8142_v6 }
 0x565   : > { %4794 = vmatprep.mubr.f32.mxu1 %v8166_v4 }
 0x568   : > { %4796 = vmatmul.mubr.f32.gmra.mrb[184].mxu1 %v8163_v0 }
 0x583   : > { %v5692_v8 = vpop.f32.mrb[32].mxu0 }
 0x584   : > { %v5693_v11 = vpop.f32.mrb[33].mxu0 }
 0x585   : > { %v8350_v41 = vadd.f32 %v5693_v11, %v5692_v8 }
 0x587   : > { %v5695_v34 = vpop.f32.mrb[34].mxu0 }
 0x588   : > { %v5696_v13 = vpop.f32.mrb[35].mxu0 }
 0x589   : > { %v8352_v12 = vadd.f32 %v5696_v13, %v5695_v34 }
 0x58b   : > { %v5412_v52 = vpop.f32.mrb[96].mxu1  ;;  %v5698_v24 = vpop.f32.mrb[36].mxu0 }
 0x58c   : > { %v5413_v62 = vpop.f32.mrb[97].mxu1  ;;  %v5699_v53 = vpop.f32.mrb[37].mxu0 }
 0x58d   : > { %v5414_v9 = vadd.f32 %v5413_v62, %v5412_v52  ;;  %v8354_v61 = vadd.f32 %v5699_v53, %v5698_v24 }
 0x58f   : > { %v5415_v6 = vpop.f32.mrb[98].mxu1 }
 0x590   : > { %v5416_v30 = vpop.f32.mrb[99].mxu1 }
 0x591   : > { %v5417_v15 = vadd.f32 %v5416_v30, %v5415_v6 }
 0x593   : > { %v5418_v58 = vpop.f32.mrb[100].mxu1 }
 0x594   : > { %v5419_v40 = vpop.f32.mrb[101].mxu1 }
 0x595   : > { %v5420_v31 = vadd.f32 %v5419_v40, %v5418_v58 }
 0x597   : > { %v5421_v42 = vpop.f32.mrb[102].mxu1 }
 0x598   : > { %v5422_v47 = vpop.f32.mrb[103].mxu1 }
 0x599   : > { %v5423_v5 = vadd.f32 %v5422_v47, %v5421_v42 }
 0x59b   : > { %v5424_v59 = vpop.f32.mrb[104].mxu1 }
 0x59c   : > { %v5425_v38 = vpop.f32.mrb[105].mxu1 }
 0x59d   : > { %v5426_v57 = vadd.f32 %v5425_v38, %v5424_v59 }
 0x59f   : > { %v5427_v48 = vpop.f32.mrb[106].mxu1 }
 0x5a0   : > { %v5428_v45 = vpop.f32.mrb[107].mxu1 }
 0x5a1   : > { %v5429_v33 = vadd.f32 %v5428_v45, %v5427_v48 }
 0x5a3   : > { %v5430_v49 = vpop.f32.mrb[108].mxu1 }
 0x5a4   : > { %v5431_v28 = vpop.f32.mrb[109].mxu1 }
 0x5a5   : > { %v5432_v51 = vadd.f32 %v5431_v28, %v5430_v49 }
 0x5a7   : > { %v5433_v14 = vpop.f32.mrb[110].mxu1 }
 0x5a8   : > { %v5434_v60 = vpop.f32.mrb[111].mxu1 }
 0x5a9   : > { %v5435_v16 = vadd.f32 %v5434_v60, %v5433_v14 }
 0x5ab   : > { %v5468_v0 = vpop.f32.mrb[112].mxu1 }
 0x5ac   : > { %v5469_v4 = vpop.f32.mrb[113].mxu1 }
 0x5ad   : > { %v5470_v50 = vadd.f32 %v5469_v4, %v5468_v0 }
 0x5af   : > { %v3993_v39 = vadd.f32 %v5470_v50, %v5414_v9  ;;  %v5471_v25 = vpop.f32.mrb[114].mxu1 }
 0x5b0   : > { %v5472_v35 = vpop.f32.mrb[115].mxu1 }
 0x5b1   : > { %v5473_v19 = vadd.f32 %v5472_v35, %v5471_v25 }
 0x5b3   : > { %v4000_v37 = vadd.f32 %v5473_v19, %v5417_v15  ;;  %v5474_v22 = vpop.f32.mrb[116].mxu1 }
 0x5b4   : > { %v5475_v7 = vpop.f32.mrb[117].mxu1 }
 0x5b5   : > { %v5476_v55 = vadd.f32 %v5475_v7, %v5474_v22 }
 0x5b7   : > { %v4007_v56 = vadd.f32 %v5476_v55, %v5420_v31  ;;  %v5477_v21 = vpop.f32.mrb[118].mxu1 }
 0x5b8   : > { %v5478_v54 = vpop.f32.mrb[119].mxu1 }
 0x5b9   : > { %v5479_v26 = vadd.f32 %v5478_v54, %v5477_v21 }
 0x5bb   : > { %v4014_v43 = vadd.f32 %v5479_v26, %v5423_v5  ;;  %v5480_v23 = vpop.f32.mrb[120].mxu1 }
 0x5bc   : > { %v5481_v32 = vpop.f32.mrb[121].mxu1 }
 0x5bd   : > { %v5482_v1 = vadd.f32 %v5481_v32, %v5480_v23 }
 0x5bf   : > { %v4021_v18 = vadd.f32 %v5482_v1, %v5426_v57  ;;  %v5483_v20 = vpop.f32.mrb[122].mxu1 }
 0x5c0   : > { %v5484_v36 = vpop.f32.mrb[123].mxu1 }
 0x5c1   : > { %v5485_v29 = vadd.f32 %v5484_v36, %v5483_v20 }
 0x5c3   : > { %v4028_v44 = vadd.f32 %v5485_v29, %v5429_v33  ;;  %v5486_v2 = vpop.f32.mrb[124].mxu1 }
 0x5c4   : > { %v5487_v10 = vpop.f32.mrb[125].mxu1 }
 0x5c5   : > { %v5488_v3 = vadd.f32 %v5487_v10, %v5486_v2 }
 0x5c7   : > { %v4035_v27 = vadd.f32 %v5488_v3, %v5432_v51  ;;  %v5489_v63 = vpop.f32.mrb[126].mxu1 }
 0x5c8   : > { %v5490_v46 = vpop.f32.mrb[127].mxu1 }
 0x5c9   : > { %v5491_v17 = vadd.f32 %v5490_v46, %v5489_v63 }
 0x5cb   : > { %v4042_v8 = vadd.f32 %v5491_v17, %v5435_v16  ;;  %v5524_v11 = vpop.f32.mrb[128].mxu1 }
 0x5cc   : > { %v5525_v34 = vpop.f32.mrb[129].mxu1 }
 0x5cd   : > { %v5526_v13 = vadd.f32 %v5525_v34, %v5524_v11 }
 0x5cf   : > { %v4180_v52 = vadd.f32 %v5526_v13, %v3993_v39  ;;  %v5527_v24 = vpop.f32.mrb[130].mxu1 }
 0x5d0   : > { %v5528_v62 = vpop.f32.mrb[131].mxu1 }
 0x5d1   : > { %v5529_v53 = vadd.f32 %v5528_v62, %v5527_v24 }
 0x5d3   : > { %v4189_v9 = vadd.f32 %v5529_v53, %v4000_v37  ;;  %v5530_v6 = vpop.f32.mrb[132].mxu1 }
 0x5d4   : > { %v5531_v30 = vpop.f32.mrb[133].mxu1 }
 0x5d5   : > { %v5532_v15 = vadd.f32 %v5531_v30, %v5530_v6 }
 0x5d7   : > { %v4198_v58 = vadd.f32 %v5532_v15, %v4007_v56  ;;  %v5533_v40 = vpop.f32.mrb[134].mxu1 }
 0x5d8   : > { %v5534_v31 = vpop.f32.mrb[135].mxu1 }
 0x5d9   : > { %v5535_v42 = vadd.f32 %v5534_v31, %v5533_v40 }
 0x5db   : > { %v4207_v47 = vadd.f32 %v5535_v42, %v4014_v43  ;;  %v5536_v5 = vpop.f32.mrb[136].mxu1 }
 0x5dc   : > { %v5537_v59 = vpop.f32.mrb[137].mxu1 }
 0x5dd   : > { %v5538_v38 = vadd.f32 %v5537_v59, %v5536_v5  ;;  %v6366_v59 = vld [vmem:[%s6473_s22 + $0x8] sm:$0xff] }
 0x5df   : > { %v4216_v57 = vadd.f32 %v5538_v38, %v4021_v18  ;;  %v5539_v48 = vpop.f32.mrb[138].mxu1 }
 0x5e0   : > { %v5540_v45 = vpop.f32.mrb[139].mxu1 }
 0x5e1   : > { %v5541_v33 = vadd.f32 %v5540_v45, %v5539_v48 }
 0x5e3   : > { %v4225_v49 = vadd.f32 %v5541_v33, %v4028_v44  ;;  %v5542_v28 = vpop.f32.mrb[140].mxu1 }
 0x5e4   : > { %v5543_v51 = vpop.f32.mrb[141].mxu1 }
 0x5e5   : > { %v5544_v14 = vadd.f32 %v5543_v51, %v5542_v28  ;;  %v6367_v28 = vld [vmem:[%s6473_s22 + $0x10] sm:$0xff] }
 0x5e7   : > { %v4234_v60 = vadd.f32 %v5544_v14, %v4035_v27  ;;  %v5545_v16 = vpop.f32.mrb[142].mxu1 }
 0x5e8   : > { %v5546_v0 = vpop.f32.mrb[143].mxu1 }
 0x5e9   : > { %v5547_v4 = vadd.f32 %v5546_v0, %v5545_v16 }
 0x5eb   : > { %v4243_v50 = vadd.f32 %v5547_v4, %v4042_v8  ;;  %v5580_v39 = vpop.f32.mrb[144].mxu1 }
 0x5ec   : > { %v5581_v25 = vpop.f32.mrb[145].mxu1 }
 0x5ed   : > { %v5582_v35 = vadd.f32 %v5581_v25, %v5580_v39 }
 0x5ef   : > { %v4351_v19 = vadd.f32 %v5582_v35, %v4180_v52  ;;  %v5583_v37 = vpop.f32.mrb[146].mxu1 }
 0x5f0   : > { %v5584_v22 = vpop.f32.mrb[147].mxu1 }
 0x5f1   : > { %v5585_v7 = vadd.f32 %v5584_v22, %v5583_v37 }
 0x5f3   : > { %v4362_v55 = vadd.f32 %v5585_v7, %v4189_v9  ;;  %v5586_v56 = vpop.f32.mrb[148].mxu1 }
 0x5f4   : > { %v5587_v21 = vpop.f32.mrb[149].mxu1 }
 0x5f5   : > { %v5588_v54 = vadd.f32 %v5587_v21, %v5586_v56 }
 0x5f7   : > { %v4373_v26 = vadd.f32 %v5588_v54, %v4198_v58  ;;  %v5589_v43 = vpop.f32.mrb[150].mxu1  ;;  %v6365_v58 = vld [vmem:[%s6473_s22] sm:$0xff] }
 0x5f8   : > { %v5590_v23 = vpop.f32.mrb[151].mxu1 }
 0x5f9   : > { %v5591_v32 = vadd.f32 %v5590_v23, %v5589_v43 }
 0x5fb   : > { %v4384_v1 = vadd.f32 %v5591_v32, %v4207_v47  ;;  %v5592_v18 = vpop.f32.mrb[152].mxu1 }
 0x5fc   : > { %v5593_v20 = vpop.f32.mrb[153].mxu1 }
 0x5fd   : > { %v5594_v36 = vadd.f32 %v5593_v20, %v5592_v18 }
 0x5ff   : > { %v4395_v29 = vadd.f32 %v5594_v36, %v4216_v57  ;;  %v5595_v44 = vpop.f32.mrb[154].mxu1 }
 0x600   : > { %v5596_v2 = vpop.f32.mrb[155].mxu1 }
 0x601   : > { %v5597_v10 = vadd.f32 %v5596_v2, %v5595_v44  ;;  %v6369_v2 = vld [vmem:[%s6473_s22 + $0x20] sm:$0xff] }
 0x603   : > { %v4406_v3 = vadd.f32 %v5597_v10, %v4225_v49  ;;  %v5598_v27 = vpop.f32.mrb[156].mxu1 }
 0x604   : > { %v5599_v63 = vpop.f32.mrb[157].mxu1 }
 0x605   : > { %v5600_v46 = vadd.f32 %v5599_v63, %v5598_v27 }
 0x607   : > { %v4417_v17 = vadd.f32 %v5600_v46, %v4234_v60  ;;  %v5601_v8 = vpop.f32.mrb[158].mxu1 }
 0x608   : > { %v5602_v11 = vpop.f32.mrb[159].mxu1 }
 0x609   : > { %v5603_v34 = vadd.f32 %v5602_v11, %v5601_v8 }
 0x60b   : > { %v4428_v13 = vadd.f32 %v5603_v34, %v4243_v50  ;;  %v5636_v52 = vpop.f32.mrb[160].mxu1 }
 0x60c   : > { %v5637_v24 = vpop.f32.mrb[161].mxu1 }
 0x60d   : > { %v5638_v62 = vadd.f32 %v5637_v24, %v5636_v52  ;;  %v6371_v24 = vld [vmem:[%s6473_s22 + $0x30] sm:$0xff] }
 0x60f   : > { %v4596_v53 = vadd.f32 %v5638_v62, %v4351_v19  ;;  %v5639_v9 = vpop.f32.mrb[162].mxu1 }
 0x610   : > { %v5640_v6 = vpop.f32.mrb[163].mxu1 }
 0x611   : > { %v4749_v30 = vadd.f32 %v8350_v41, %v4596_v53  ;;  %v5641_v15 = vadd.f32 %v5640_v6, %v5639_v9  ;;  %v6372_v6 = vld [vmem:[%s6473_s22 + $0x38] sm:$0xff] }
 0x613   : > { %v4801_v40 = vadd.f32 %v6365_v58, %v4749_v30  ;;  %v4603_v31 = vadd.f32 %v5641_v15, %v4362_v55  ;;  %v5642_v42 = vpop.f32.mrb[164].mxu1 }
 0x614   : > { %v5643_v47 = vpop.f32.mrb[165].mxu1 }
 0x615   : > { %4809 = vst.msk [vmem:[%s8361_s11] sm:$0xff] %vm536_vm0, %v4801_v40  ;;  %v4756_v5 = vadd.f32 %v8352_v12, %v4603_v31  ;;  %v5644_v41 = vadd.f32 %v5643_v47, %v5642_v42 }
 0x617   : > { %v4802_v38 = vadd.f32 %v6366_v59, %v4756_v5  ;;  %v4610_v57 = vadd.f32 %v5644_v41, %v4373_v26  ;;  %v5645_v48 = vpop.f32.mrb[166].mxu1 }
 0x618   : > { %v5646_v45 = vpop.f32.mrb[167].mxu1 }
 0x619   : > { %4810 = vst.msk [vmem:[%s8361_s11 + $0x8] sm:$0xff] %vm536_vm0, %v4802_v38  ;;  %v4763_v33 = vadd.f32 %v8354_v61, %v4610_v57  ;;  %v5647_v49 = vadd.f32 %v5646_v45, %v5645_v48 }
 0x61b   : > { %v4803_v51 = vadd.f32 %v6367_v28, %v4763_v33  ;;  %v4617_v14 = vadd.f32 %v5647_v49, %v4384_v1  ;;  %v5648_v60 = vpop.f32.mrb[168].mxu1  ;;  %v6368_v1 = vld [vmem:[%s6473_s22 + $0x18] sm:$0xff] }
 0x61c   : > { %v5649_v16 = vpop.f32.mrb[169].mxu1 }
 0x61d   : > { %4811 = vst.msk [vmem:[%s8361_s11 + $0x10] sm:$0xff] %vm536_vm0, %v4803_v51  ;;  %v5650_v0 = vadd.f32 %v5649_v16, %v5648_v60 }
 0x61f   : > { %v4624_v12 = vadd.f32 %v5650_v0, %v4395_v29  ;;  %v5651_v4 = vpop.f32.mrb[170].mxu1 }
 0x620   : > { %v5652_v50 = vpop.f32.mrb[171].mxu1 }
 0x621   : > { %v5653_v39 = vadd.f32 %v5652_v50, %v5651_v4 }
 0x623   : > { %v4631_v25 = vadd.f32 %v5653_v39, %v4406_v3  ;;  %v5654_v35 = vpop.f32.mrb[172].mxu1 }
 0x624   : > { %v5655_v19 = vpop.f32.mrb[173].mxu1 }
 0x625   : > { %v5656_v37 = vadd.f32 %v5655_v19, %v5654_v35 }
 0x627   : > { %v4638_v61 = vadd.f32 %v5656_v37, %v4417_v17  ;;  %v5657_v22 = vpop.f32.mrb[174].mxu1  ;;  %v6370_v17 = vld [vmem:[%s6473_s22 + $0x28] sm:$0xff] }
 0x628   : > { %v5658_v7 = vpop.f32.mrb[175].mxu1 }
 0x629   : > { %v5659_v55 = vadd.f32 %v5658_v7, %v5657_v22 }
 0x62b   : > { %v4645_v56 = vadd.f32 %v5659_v55, %v4428_v13  ;;  %v5701_v21 = vpop.f32.mrb[176].mxu1 }
 0x62c   : > { %v5702_v54 = vpop.f32.mrb[177].mxu1 }
 0x62d   : > { %v5703_v26 = vadd.f32 %v5702_v54, %v5701_v21 }
 0x62f   : > { %v4770_v43 = vadd.f32 %v5703_v26, %v4617_v14  ;;  %v5704_v23 = vpop.f32.mrb[178].mxu1 }
 0x630   : > { %v5705_v32 = vpop.f32.mrb[179].mxu1 }
 0x631   : > { %v4804_v18 = vadd.f32 %v6368_v1, %v4770_v43  ;;  %v5706_v20 = vadd.f32 %v5705_v32, %v5704_v23 }
 0x633   : > { %4812 = vst.msk [vmem:[%s8361_s11 + $0x18] sm:$0xff] %vm536_vm0, %v4804_v18  ;;  %v4777_v36 = vadd.f32 %v5706_v20, %v4624_v12  ;;  %v5707_v29 = vpop.f32.mrb[180].mxu1 }
 0x634   : > { %v5708_v44 = vpop.f32.mrb[181].mxu1 }
 0x635   : > { %v4805_v10 = vadd.f32 %v6369_v2, %v4777_v36  ;;  %v5709_v3 = vadd.f32 %v5708_v44, %v5707_v29 }
 0x637   : > { %4813 = vst.msk [vmem:[%s8361_s11 + $0x20] sm:$0xff] %vm536_vm0, %v4805_v10  ;;  %v4784_v27 = vadd.f32 %v5709_v3, %v4631_v25  ;;  %v5710_v63 = vpop.f32.mrb[182].mxu1 }
 0x638   : > { %v5711_v46 = vpop.f32.mrb[183].mxu1 }
 0x639   : > { %v4806_v8 = vadd.f32 %v6370_v17, %v4784_v27  ;;  %v5712_v11 = vadd.f32 %v5711_v46, %v5710_v63 }
 0x63b   : > { %4814 = vst.msk [vmem:[%s8361_s11 + $0x28] sm:$0xff] %vm536_vm0, %v4806_v8  ;;  %v4791_v34 = vadd.f32 %v5712_v11, %v4638_v61  ;;  %v5713_v13 = vpop.f32.mrb[184].mxu1 }
 0x63c   : > { %v5714_v52 = vpop.f32.mrb[185].mxu1 }
 0x63d   : > { %v4807_v62 = vadd.f32 %v6371_v24, %v4791_v34  ;;  %v5715_v53 = vadd.f32 %v5714_v52, %v5713_v13 }
 0x63f   : > { %4815 = vst.msk [vmem:[%s8361_s11 + $0x30] sm:$0xff] %vm536_vm0, %v4807_v62  ;;  %v4798_v9 = vadd.f32 %v5715_v53, %v4645_v56 }
 0x641   : > { %v4808_v30 = vadd.f32 %v6372_v6, %v4798_v9 }
 0x643   : > { %4816 = vst.msk [vmem:[%s8361_s11 + $0x38] sm:$0xff] %vm536_vm0, %v4808_v30 }
 0x644 PF: > { %s20_s30 = sadd.s32 1, %s6379_s30  }
 0x645   : > { %p17_p4 = scmp.ge.s32.totalorder %s20_s30, 4  }
 0x647   :  { %19 = sbr.rel (!%p17_p4) target bundleno = 1 (0x1), region = 106 }

</bundles_post_ra>
